<compile_context>
chip_gen: v6e
topology: v6e:2x2x1
jax: 0.10.0
libtpu: 0.0.40
codegen_flags: <defaults>
</compile_context>

<pallas_src>
import jax
import jax.numpy as jnp
from jax.experimental import pallas as pl
from jax.experimental.pallas import tpu as pltpu

EPS = 1e-5  # BatchNorm eps (module default)


# ----------------------------------------------------------------------------
# Fused Conv/Deconv-GEMM + BatchNorm (training mode) + PReLU kernel
# ----------------------------------------------------------------------------
def _fused_block_kernel(pT_ref, wT_ref, g_ref, b_ref, a_ref, out_ref):
    """out = PReLU(BatchNorm(W @ patches)) -- single kernel, single invocation.

    pT_ref : (K, M)  im2col patches, transposed (M = N*OH*OW on the lane axis)
    wT_ref : (C, K)  conv weight reshaped to a GEMM matrix
    g_ref  : (C, 1)  BN gamma
    b_ref  : (C, 1)  BN beta
    a_ref  : (1,)    PReLU slope (SMEM scalar)
    out_ref: (C, M)
    """
    acc = jnp.dot(wT_ref[...], pT_ref[...],
                  preferred_element_type=jnp.float32)          # (C, M)
    inv_m = 1.0 / acc.shape[1]
    mean = jnp.sum(acc, axis=1, keepdims=True) * inv_m          # (C, 1)
    centered = acc - mean
    var = jnp.sum(centered * centered, axis=1, keepdims=True) * inv_m
    scale = g_ref[...] * jax.lax.rsqrt(var + EPS)               # (C, 1)
    y = centered * scale + b_ref[...]                           # BN affine
    a = a_ref[0]
    out_ref[...] = jnp.where(y >= 0.0, y, a * y)                # PReLU


def _fused_block(pT, wT, gamma, beta, prelu_a):
    """One Conv2dSeq block: GEMM + BN + PReLU in a single pallas_call."""
    K, M = pT.shape
    C = wT.shape[0]
    vmem = pl.BlockSpec(memory_space=pltpu.MemorySpace.VMEM)
    smem = pl.BlockSpec(memory_space=pltpu.MemorySpace.SMEM)
    return pl.pallas_call(
        _fused_block_kernel,
        out_shape=jax.ShapeDtypeStruct((C, M), jnp.float32),
        in_specs=[vmem, vmem, vmem, vmem, smem],
        out_specs=vmem,
    )(pT, wT,
      gamma.reshape(C, 1).astype(jnp.float32),
      beta.reshape(C, 1).astype(jnp.float32),
      jnp.asarray(prelu_a, jnp.float32).reshape(1))


# ----------------------------------------------------------------------------
# im2col in channel-major layout (kept in XLA; arrays are tiny at these sizes)
# ----------------------------------------------------------------------------
def _extract_patches_T(x, ksize, stride, pad_lo, pad_hi):
    """x: (C, N, H, W) -> patchesT (C*ksize*ksize, N*OH*OW), K order (c, kh, kw)."""
    C, N, H, W = x.shape
    xp = jnp.pad(x, ((0, 0), (0, 0), (pad_lo, pad_hi), (pad_lo, pad_hi)))
    Hp, Wp = H + pad_lo + pad_hi, W + pad_lo + pad_hi
    OH = (Hp - ksize) // stride + 1
    OW = (Wp - ksize) // stride + 1
    cols = []
    for i in range(ksize):
        for j in range(ksize):
            cols.append(xp[:, :,
                           i:i + stride * (OH - 1) + 1:stride,
                           j:j + stride * (OW - 1) + 1:stride])
    patches = jnp.stack(cols, axis=1)                  # (C, k*k, N, OH, OW)
    return patches.reshape(C * ksize * ksize, N * OH * OW), OH, OW


def _conv_block(x, p):
    """Conv2d(k=3, s=2, pad=1) + BN + PReLU.   x: (C_in, N, H, W)."""
    W_ = p["w"]                                        # (Cout, Cin, 3, 3)
    Cout, Cin, KH, KW = W_.shape
    N = x.shape[1]
    pT, OH, OW = _extract_patches_T(x, KH, stride=2, pad_lo=1, pad_hi=1)
    wT = W_.reshape(Cout, Cin * KH * KW)               # K order (cin, kh, kw)
    # conv bias is intentionally omitted: it cancels exactly through training-mode BN
    y = _fused_block(pT, wT, p["gamma"], p["beta"], p["a"])
    return y.reshape(Cout, N, OH, OW)


def _deconv_block(x, p):
    """ConvTranspose2d(k=3, s=2, pad=1, out_pad=1) + BN + PReLU.  x: (C_in, N, H, W)."""
    W_ = p["w"]                                        # (Cin, Cout, 3, 3)
    Cin, Cout, KH, KW = W_.shape
    C, N, H, Wd = x.shape
    # zero-insertion (stride-1 dilation), then pad 1 (lo) / 2 (hi), conv stride 1
    xd = jnp.zeros((C, N, 2 * H - 1, 2 * Wd - 1), x.dtype)
    xd = xd.at[:, :, ::2, ::2].set(x)
    pT, OH, OW = _extract_patches_T(xd, KH, stride=1, pad_lo=1, pad_hi=2)
    # equivalent forward-conv weight: swap channel axes + flip spatially
    W_eq = jnp.transpose(W_[:, :, ::-1, ::-1], (1, 0, 2, 3))   # (Cout, Cin, 3, 3)
    wT = W_eq.reshape(Cout, Cin * KH * KW)
    y = _fused_block(pT, wT, p["gamma"], p["beta"], p["a"])
    return y.reshape(Cout, N, OH, OW)


# ----------------------------------------------------------------------------
# UNet5 forward
# ----------------------------------------------------------------------------
def unet5_forward(x_nchw, params):
    x = jnp.transpose(x_nchw, (1, 0, 2, 3))            # NCHW -> CNHW (channel-major)
    x1 = _conv_block(x, params["conv1"])
    x2 = _conv_block(x1, params["conv2"])
    x3 = _conv_block(x2, params["conv3"])
    x4 = _conv_block(x3, params["conv4"])
    x5 = _conv_block(x4, params["conv5"])
    x6 = _deconv_block(x5, params["deconv1"])
    x7 = _deconv_block(jnp.concatenate([x4, x6], axis=0), params["deconv2"])
    x8 = _deconv_block(jnp.concatenate([x3, x7], axis=0), params["deconv3"])
    x9 = _deconv_block(jnp.concatenate([x2, x8], axis=0), params["deconv4"])
    maps = _deconv_block(jnp.concatenate([x1, x9], axis=0), params["deconv5"])
    return jnp.transpose(maps, (1, 0, 2, 3))           # CNHW -> NCHW


def init_params(key, channels, channel_in=1, channel_out=1):
    def layer(k, cin, cout, transposed):
        kw, kb = jax.random.split(k)
        if transposed:
            w = jax.random.normal(kw, (cin, cout, 3, 3), jnp.float32) * 0.1
        else:
            w = jax.random.normal(kw, (cout, cin, 3, 3), jnp.float32) * 0.1
        return dict(
            w=w,
            # conv bias kept for module fidelity, but unused in forward: it is an
            # exact no-op through the training-mode BatchNorm that follows.
            b=jax.random.normal(kb, (cout,), jnp.float32) * 0.1,
            gamma=jnp.ones((cout,), jnp.float32),
            beta=jnp.zeros((cout,), jnp.float32),
            a=jnp.float32(0.25),                        # PReLU default slope
        )

    c = channels
    specs = [
        ("conv1", channel_in, c[0], False),
        ("conv2", c[0], c[1], False),
        ("conv3", c[1], c[2], False),
        ("conv4", c[2], c[3], False),
        ("conv5", c[3], c[4], False),
        ("deconv1", c[4], c[3], True),
        ("deconv2", c[3] * 2, c[2], True),
        ("deconv3", c[2] * 2, c[1], True),
        ("deconv4", c[1] * 2, c[0], True),
        ("deconv5", c[0] * 2, channel_out, True),
    ]
    keys = jax.random.split(key, len(specs))
    return {name: layer(k, cin, cout, t)
            for (name, cin, cout, t), k in zip(specs, keys)}


if __name__ == "__main__":
    key = jax.random.PRNGKey(0)
    k_param, k_x = jax.random.split(key)

    channels = [4, 8, 16, 32, 64]
    batch, channel_in, sides = 2, 1, 32       # sides=32 -> 1x1 bottleneck after 5 convs

    params = init_params(k_param, channels, channel_in=channel_in, channel_out=1)
    x = jax.random.normal(k_x, (batch, channel_in, sides, sides), jnp.float32)

    fwd = jax.jit(unet5_forward)
    maps = fwd(x, params)
    jax.block_until_ready(maps)

    assert maps.shape == (batch, 1, sides, sides), maps.shape
    assert jnp.all(jnp.isfinite(maps))
    print("KERNEL_OK")
</pallas_src>

<mosaic_0001>
module attributes {stable_mosaic.version = 11 : i64} {
  func.func @_fused_block_kernel(%arg0: memref<9x512xf32, #tpu.memory_space<vmem>>, %arg1: memref<4x9xf32, #tpu.memory_space<vmem>>, %arg2: memref<4x1xf32, #tpu.memory_space<vmem>>, %arg3: memref<4x1xf32, #tpu.memory_space<vmem>>, %arg4: memref<1xf32, #tpu.memory_space<smem>>, %arg5: memref<4x512xf32, #tpu.memory_space<vmem>>) attributes {dimension_semantics = [], scalar_prefetch = 0 : i64, scratch_operands = 0 : i64, tpu.core_type = #tpu.core_type<tc>} {
    %c0 = arith.constant 0 : index
    %c0_0 = arith.constant 0 : index
    %0 = vector.load %arg1[%c0, %c0_0] : memref<4x9xf32, #tpu.memory_space<vmem>>, vector<4x9xf32>
    %c0_1 = arith.constant 0 : index
    %c0_2 = arith.constant 0 : index
    %1 = vector.load %arg0[%c0_1, %c0_2] : memref<9x512xf32, #tpu.memory_space<vmem>>, vector<9x512xf32>
    %cst = arith.constant dense<0.000000e+00> : vector<4x512xf32>
    %2 = tpu.matmul %0, %1, %cst {dimension_numbers = #tpu.dot_dimension_numbers<[1], [0], [0], [1], [0, 0, 1, 1], [], []>} : vector<4x9xf32>, vector<9x512xf32>, vector<4x512xf32> -> vector<4x512xf32>
    %cst_3 = arith.constant dense<0.000000e+00> : vector<4xf32>
    %3 = vector.multi_reduction <add>, %2, %cst_3 [1] : vector<4x512xf32> to vector<4xf32>
    %4 = vector.shape_cast %3 : vector<4xf32> to vector<4x1xf32>
    %cst_4 = arith.constant 0.001953125 : f32
    %5 = vector.broadcast %cst_4 : f32 to vector<4x1xf32>
    %6 = arith.mulf %4, %5 : vector<4x1xf32>
    %7 = vector.broadcast %6 : vector<4x1xf32> to vector<4x512xf32>
    %8 = arith.subf %2, %7 : vector<4x512xf32>
    %9 = arith.mulf %8, %8 : vector<4x512xf32>
    %cst_5 = arith.constant dense<0.000000e+00> : vector<4xf32>
    %10 = vector.multi_reduction <add>, %9, %cst_5 [1] : vector<4x512xf32> to vector<4xf32>
    %11 = vector.shape_cast %10 : vector<4xf32> to vector<4x1xf32>
    %cst_6 = arith.constant 0.001953125 : f32
    %12 = vector.broadcast %cst_6 : f32 to vector<4x1xf32>
    %13 = arith.mulf %11, %12 : vector<4x1xf32>
    %c0_7 = arith.constant 0 : index
    %c0_8 = arith.constant 0 : index
    %14 = vector.load %arg2[%c0_7, %c0_8] : memref<4x1xf32, #tpu.memory_space<vmem>>, vector<4x1xf32>
    %cst_9 = arith.constant 9.99999974E-6 : f32
    %15 = vector.broadcast %cst_9 : f32 to vector<4x1xf32>
    %16 = arith.addf %13, %15 : vector<4x1xf32>
    %17 = math.rsqrt %16 : vector<4x1xf32>
    %18 = arith.mulf %14, %17 : vector<4x1xf32>
    %19 = vector.broadcast %18 : vector<4x1xf32> to vector<4x512xf32>
    %20 = arith.mulf %8, %19 : vector<4x512xf32>
    %c0_10 = arith.constant 0 : index
    %c0_11 = arith.constant 0 : index
    %21 = vector.load %arg3[%c0_10, %c0_11] : memref<4x1xf32, #tpu.memory_space<vmem>>, vector<4x1xf32>
    %22 = vector.broadcast %21 : vector<4x1xf32> to vector<4x512xf32>
    %23 = arith.addf %20, %22 : vector<4x512xf32>
    %c0_12 = arith.constant 0 : index
    %24 = memref.load %arg4[%c0_12] : memref<1xf32, #tpu.memory_space<smem>>
    %cst_13 = arith.constant 0.000000e+00 : f32
    %25 = vector.broadcast %cst_13 : f32 to vector<4x512xf32>
    %26 = arith.cmpf oge, %23, %25 : vector<4x512xf32>
    %27 = vector.broadcast %24 : f32 to vector<4x512xf32>
    %28 = arith.mulf %27, %23 : vector<4x512xf32>
    %29 = arith.select %26, %23, %28 : vector<4x512xi1>, vector<4x512xf32>
    %c0_14 = arith.constant 0 : index
    %c0_15 = arith.constant 0 : index
    %30 = vector.load %arg5[%c0_14, %c0_15] : memref<4x512xf32, #tpu.memory_space<vmem>>, vector<4x512xf32>
    tpu.vector_store %arg5[%c0_14, %c0_15], %29 {strides = array<i32>} : memref<4x512xf32, #tpu.memory_space<vmem>>, vector<4x512xf32>,
    return
  }
}

module attributes {stable_mosaic.version = 11 : i64} {
  func.func @_fused_block_kernel(%arg0: memref<36x128xf32, #tpu.memory_space<vmem>>, %arg1: memref<8x36xf32, #tpu.memory_space<vmem>>, %arg2: memref<8x1xf32, #tpu.memory_space<vmem>>, %arg3: memref<8x1xf32, #tpu.memory_space<vmem>>, %arg4: memref<1xf32, #tpu.memory_space<smem>>, %arg5: memref<8x128xf32, #tpu.memory_space<vmem>>) attributes {dimension_semantics = [], scalar_prefetch = 0 : i64, scratch_operands = 0 : i64, tpu.core_type = #tpu.core_type<tc>} {
    %c0 = arith.constant 0 : index
    %c0_0 = arith.constant 0 : index
    %0 = vector.load %arg1[%c0, %c0_0] : memref<8x36xf32, #tpu.memory_space<vmem>>, vector<8x36xf32>
    %c0_1 = arith.constant 0 : index
    %c0_2 = arith.constant 0 : index
    %1 = vector.load %arg0[%c0_1, %c0_2] : memref<36x128xf32, #tpu.memory_space<vmem>>, vector<36x128xf32>
    %cst = arith.constant dense<0.000000e+00> : vector<8x128xf32>
    %2 = tpu.matmul %0, %1, %cst {dimension_numbers = #tpu.dot_dimension_numbers<[1], [0], [0], [1], [0, 0, 1, 1], [], []>} : vector<8x36xf32>, vector<36x128xf32>, vector<8x128xf32> -> vector<8x128xf32>
    %cst_3 = arith.constant dense<0.000000e+00> : vector<8xf32>
    %3 = vector.multi_reduction <add>, %2, %cst_3 [1] : vector<8x128xf32> to vector<8xf32>
    %4 = vector.shape_cast %3 : vector<8xf32> to vector<8x1xf32>
    %cst_4 = arith.constant 7.812500e-03 : f32
    %5 = vector.broadcast %cst_4 : f32 to vector<8x1xf32>
    %6 = arith.mulf %4, %5 : vector<8x1xf32>
    %7 = vector.broadcast %6 : vector<8x1xf32> to vector<8x128xf32>
    %8 = arith.subf %2, %7 : vector<8x128xf32>
    %9 = arith.mulf %8, %8 : vector<8x128xf32>
    %cst_5 = arith.constant dense<0.000000e+00> : vector<8xf32>
    %10 = vector.multi_reduction <add>, %9, %cst_5 [1] : vector<8x128xf32> to vector<8xf32>
    %11 = vector.shape_cast %10 : vector<8xf32> to vector<8x1xf32>
    %cst_6 = arith.constant 7.812500e-03 : f32
    %12 = vector.broadcast %cst_6 : f32 to vector<8x1xf32>
    %13 = arith.mulf %11, %12 : vector<8x1xf32>
    %c0_7 = arith.constant 0 : index
    %c0_8 = arith.constant 0 : index
    %14 = vector.load %arg2[%c0_7, %c0_8] : memref<8x1xf32, #tpu.memory_space<vmem>>, vector<8x1xf32>
    %cst_9 = arith.constant 9.99999974E-6 : f32
    %15 = vector.broadcast %cst_9 : f32 to vector<8x1xf32>
    %16 = arith.addf %13, %15 : vector<8x1xf32>
    %17 = math.rsqrt %16 : vector<8x1xf32>
    %18 = arith.mulf %14, %17 : vector<8x1xf32>
    %19 = vector.broadcast %18 : vector<8x1xf32> to vector<8x128xf32>
    %20 = arith.mulf %8, %19 : vector<8x128xf32>
    %c0_10 = arith.constant 0 : index
    %c0_11 = arith.constant 0 : index
    %21 = vector.load %arg3[%c0_10, %c0_11] : memref<8x1xf32, #tpu.memory_space<vmem>>, vector<8x1xf32>
    %22 = vector.broadcast %21 : vector<8x1xf32> to vector<8x128xf32>
    %23 = arith.addf %20, %22 : vector<8x128xf32>
    %c0_12 = arith.constant 0 : index
    %24 = memref.load %arg4[%c0_12] : memref<1xf32, #tpu.memory_space<smem>>
    %cst_13 = arith.constant 0.000000e+00 : f32
    %25 = vector.broadcast %cst_13 : f32 to vector<8x128xf32>
    %26 = arith.cmpf oge, %23, %25 : vector<8x128xf32>
    %27 = vector.broadcast %24 : f32 to vector<8x128xf32>
    %28 = arith.mulf %27, %23 : vector<8x128xf32>
    %29 = arith.select %26, %23, %28 : vector<8x128xi1>, vector<8x128xf32>
    %c0_14 = arith.constant 0 : index
    %c0_15 = arith.constant 0 : index
    %30 = vector.load %arg5[%c0_14, %c0_15] : memref<8x128xf32, #tpu.memory_space<vmem>>, vector<8x128xf32>
    tpu.vector_store %arg5[%c0_14, %c0_15], %29 {strides = array<i32>} : memref<8x128xf32, #tpu.memory_space<vmem>>, vector<8x128xf32>,
    return
  }
}

module attributes {stable_mosaic.version = 11 : i64} {
  func.func @_fused_block_kernel(%arg0: memref<72x32xf32, #tpu.memory_space<vmem>>, %arg1: memref<16x72xf32, #tpu.memory_space<vmem>>, %arg2: memref<16x1xf32, #tpu.memory_space<vmem>>, %arg3: memref<16x1xf32, #tpu.memory_space<vmem>>, %arg4: memref<1xf32, #tpu.memory_space<smem>>, %arg5: memref<16x32xf32, #tpu.memory_space<vmem>>) attributes {dimension_semantics = [], scalar_prefetch = 0 : i64, scratch_operands = 0 : i64, tpu.core_type = #tpu.core_type<tc>} {
    %c0 = arith.constant 0 : index
    %c0_0 = arith.constant 0 : index
    %0 = vector.load %arg1[%c0, %c0_0] : memref<16x72xf32, #tpu.memory_space<vmem>>, vector<16x72xf32>
    %c0_1 = arith.constant 0 : index
    %c0_2 = arith.constant 0 : index
    %1 = vector.load %arg0[%c0_1, %c0_2] : memref<72x32xf32, #tpu.memory_space<vmem>>, vector<72x32xf32>
    %cst = arith.constant dense<0.000000e+00> : vector<16x32xf32>
    %2 = tpu.matmul %0, %1, %cst {dimension_numbers = #tpu.dot_dimension_numbers<[1], [0], [0], [1], [0, 0, 1, 1], [], []>} : vector<16x72xf32>, vector<72x32xf32>, vector<16x32xf32> -> vector<16x32xf32>
    %cst_3 = arith.constant dense<0.000000e+00> : vector<16xf32>
    %3 = vector.multi_reduction <add>, %2, %cst_3 [1] : vector<16x32xf32> to vector<16xf32>
    %4 = vector.shape_cast %3 : vector<16xf32> to vector<16x1xf32>
    %cst_4 = arith.constant 3.125000e-02 : f32
    %5 = vector.broadcast %cst_4 : f32 to vector<16x1xf32>
    %6 = arith.mulf %4, %5 : vector<16x1xf32>
    %7 = vector.broadcast %6 : vector<16x1xf32> to vector<16x32xf32>
    %8 = arith.subf %2, %7 : vector<16x32xf32>
    %9 = arith.mulf %8, %8 : vector<16x32xf32>
    %cst_5 = arith.constant dense<0.000000e+00> : vector<16xf32>
    %10 = vector.multi_reduction <add>, %9, %cst_5 [1] : vector<16x32xf32> to vector<16xf32>
    %11 = vector.shape_cast %10 : vector<16xf32> to vector<16x1xf32>
    %cst_6 = arith.constant 3.125000e-02 : f32
    %12 = vector.broadcast %cst_6 : f32 to vector<16x1xf32>
    %13 = arith.mulf %11, %12 : vector<16x1xf32>
    %c0_7 = arith.constant 0 : index
    %c0_8 = arith.constant 0 : index
    %14 = vector.load %arg2[%c0_7, %c0_8] : memref<16x1xf32, #tpu.memory_space<vmem>>, vector<16x1xf32>
    %cst_9 = arith.constant 9.99999974E-6 : f32
    %15 = vector.broadcast %cst_9 : f32 to vector<16x1xf32>
    %16 = arith.addf %13, %15 : vector<16x1xf32>
    %17 = math.rsqrt %16 : vector<16x1xf32>
    %18 = arith.mulf %14, %17 : vector<16x1xf32>
    %19 = vector.broadcast %18 : vector<16x1xf32> to vector<16x32xf32>
    %20 = arith.mulf %8, %19 : vector<16x32xf32>
    %c0_10 = arith.constant 0 : index
    %c0_11 = arith.constant 0 : index
    %21 = vector.load %arg3[%c0_10, %c0_11] : memref<16x1xf32, #tpu.memory_space<vmem>>, vector<16x1xf32>
    %22 = vector.broadcast %21 : vector<16x1xf32> to vector<16x32xf32>
    %23 = arith.addf %20, %22 : vector<16x32xf32>
    %c0_12 = arith.constant 0 : index
    %24 = memref.load %arg4[%c0_12] : memref<1xf32, #tpu.memory_space<smem>>
    %cst_13 = arith.constant 0.000000e+00 : f32
    %25 = vector.broadcast %cst_13 : f32 to vector<16x32xf32>
    %26 = arith.cmpf oge, %23, %25 : vector<16x32xf32>
    %27 = vector.broadcast %24 : f32 to vector<16x32xf32>
    %28 = arith.mulf %27, %23 : vector<16x32xf32>
    %29 = arith.select %26, %23, %28 : vector<16x32xi1>, vector<16x32xf32>
    %c0_14 = arith.constant 0 : index
    %c0_15 = arith.constant 0 : index
    %30 = vector.load %arg5[%c0_14, %c0_15] : memref<16x32xf32, #tpu.memory_space<vmem>>, vector<16x32xf32>
    tpu.vector_store %arg5[%c0_14, %c0_15], %29 {strides = array<i32>} : memref<16x32xf32, #tpu.memory_space<vmem>>, vector<16x32xf32>,
    return
  }
}

module attributes {stable_mosaic.version = 11 : i64} {
  func.func @_fused_block_kernel(%arg0: memref<144x8xf32, #tpu.memory_space<vmem>>, %arg1: memref<32x144xf32, #tpu.memory_space<vmem>>, %arg2: memref<32x1xf32, #tpu.memory_space<vmem>>, %arg3: memref<32x1xf32, #tpu.memory_space<vmem>>, %arg4: memref<1xf32, #tpu.memory_space<smem>>, %arg5: memref<32x8xf32, #tpu.memory_space<vmem>>) attributes {dimension_semantics = [], scalar_prefetch = 0 : i64, scratch_operands = 0 : i64, tpu.core_type = #tpu.core_type<tc>} {
    %c0 = arith.constant 0 : index
    %c0_0 = arith.constant 0 : index
    %0 = vector.load %arg1[%c0, %c0_0] : memref<32x144xf32, #tpu.memory_space<vmem>>, vector<32x144xf32>
    %c0_1 = arith.constant 0 : index
    %c0_2 = arith.constant 0 : index
    %1 = vector.load %arg0[%c0_1, %c0_2] : memref<144x8xf32, #tpu.memory_space<vmem>>, vector<144x8xf32>
    %cst = arith.constant dense<0.000000e+00> : vector<32x8xf32>
    %2 = tpu.matmul %0, %1, %cst {dimension_numbers = #tpu.dot_dimension_numbers<[1], [0], [0], [1], [0, 0, 1, 1], [], []>} : vector<32x144xf32>, vector<144x8xf32>, vector<32x8xf32> -> vector<32x8xf32>
    %cst_3 = arith.constant dense<0.000000e+00> : vector<32xf32>
    %3 = vector.multi_reduction <add>, %2, %cst_3 [1] : vector<32x8xf32> to vector<32xf32>
    %4 = vector.shape_cast %3 : vector<32xf32> to vector<32x1xf32>
    %cst_4 = arith.constant 1.250000e-01 : f32
    %5 = vector.broadcast %cst_4 : f32 to vector<32x1xf32>
    %6 = arith.mulf %4, %5 : vector<32x1xf32>
    %7 = vector.broadcast %6 : vector<32x1xf32> to vector<32x8xf32>
    %8 = arith.subf %2, %7 : vector<32x8xf32>
    %9 = arith.mulf %8, %8 : vector<32x8xf32>
    %cst_5 = arith.constant dense<0.000000e+00> : vector<32xf32>
    %10 = vector.multi_reduction <add>, %9, %cst_5 [1] : vector<32x8xf32> to vector<32xf32>
    %11 = vector.shape_cast %10 : vector<32xf32> to vector<32x1xf32>
    %cst_6 = arith.constant 1.250000e-01 : f32
    %12 = vector.broadcast %cst_6 : f32 to vector<32x1xf32>
    %13 = arith.mulf %11, %12 : vector<32x1xf32>
    %c0_7 = arith.constant 0 : index
    %c0_8 = arith.constant 0 : index
    %14 = vector.load %arg2[%c0_7, %c0_8] : memref<32x1xf32, #tpu.memory_space<vmem>>, vector<32x1xf32>
    %cst_9 = arith.constant 9.99999974E-6 : f32
    %15 = vector.broadcast %cst_9 : f32 to vector<32x1xf32>
    %16 = arith.addf %13, %15 : vector<32x1xf32>
    %17 = math.rsqrt %16 : vector<32x1xf32>
    %18 = arith.mulf %14, %17 : vector<32x1xf32>
    %19 = vector.broadcast %18 : vector<32x1xf32> to vector<32x8xf32>
    %20 = arith.mulf %8, %19 : vector<32x8xf32>
    %c0_10 = arith.constant 0 : index
    %c0_11 = arith.constant 0 : index
    %21 = vector.load %arg3[%c0_10, %c0_11] : memref<32x1xf32, #tpu.memory_space<vmem>>, vector<32x1xf32>
    %22 = vector.broadcast %21 : vector<32x1xf32> to vector<32x8xf32>
    %23 = arith.addf %20, %22 : vector<32x8xf32>
    %c0_12 = arith.constant 0 : index
    %24 = memref.load %arg4[%c0_12] : memref<1xf32, #tpu.memory_space<smem>>
    %cst_13 = arith.constant 0.000000e+00 : f32
    %25 = vector.broadcast %cst_13 : f32 to vector<32x8xf32>
    %26 = arith.cmpf oge, %23, %25 : vector<32x8xf32>
    %27 = vector.broadcast %24 : f32 to vector<32x8xf32>
    %28 = arith.mulf %27, %23 : vector<32x8xf32>
    %29 = arith.select %26, %23, %28 : vector<32x8xi1>, vector<32x8xf32>
    %c0_14 = arith.constant 0 : index
    %c0_15 = arith.constant 0 : index
    %30 = vector.load %arg5[%c0_14, %c0_15] : memref<32x8xf32, #tpu.memory_space<vmem>>, vector<32x8xf32>
    tpu.vector_store %arg5[%c0_14, %c0_15], %29 {strides = array<i32>} : memref<32x8xf32, #tpu.memory_space<vmem>>, vector<32x8xf32>,
    return
  }
}

module attributes {stable_mosaic.version = 11 : i64} {
  func.func @_fused_block_kernel(%arg0: memref<288x2xf32, #tpu.memory_space<vmem>>, %arg1: memref<64x288xf32, #tpu.memory_space<vmem>>, %arg2: memref<64x1xf32, #tpu.memory_space<vmem>>, %arg3: memref<64x1xf32, #tpu.memory_space<vmem>>, %arg4: memref<1xf32, #tpu.memory_space<smem>>, %arg5: memref<64x2xf32, #tpu.memory_space<vmem>>) attributes {dimension_semantics = [], scalar_prefetch = 0 : i64, scratch_operands = 0 : i64, tpu.core_type = #tpu.core_type<tc>} {
    %c0 = arith.constant 0 : index
    %c0_0 = arith.constant 0 : index
    %0 = vector.load %arg1[%c0, %c0_0] : memref<64x288xf32, #tpu.memory_space<vmem>>, vector<64x288xf32>
    %c0_1 = arith.constant 0 : index
    %c0_2 = arith.constant 0 : index
    %1 = vector.load %arg0[%c0_1, %c0_2] : memref<288x2xf32, #tpu.memory_space<vmem>>, vector<288x2xf32>
    %cst = arith.constant dense<0.000000e+00> : vector<64x2xf32>
    %2 = tpu.matmul %0, %1, %cst {dimension_numbers = #tpu.dot_dimension_numbers<[1], [0], [0], [1], [0, 0, 1, 1], [], []>} : vector<64x288xf32>, vector<288x2xf32>, vector<64x2xf32> -> vector<64x2xf32>
    %cst_3 = arith.constant dense<0.000000e+00> : vector<64xf32>
    %3 = vector.multi_reduction <add>, %2, %cst_3 [1] : vector<64x2xf32> to vector<64xf32>
    %4 = vector.shape_cast %3 : vector<64xf32> to vector<64x1xf32>
    %cst_4 = arith.constant 5.000000e-01 : f32
    %5 = vector.broadcast %cst_4 : f32 to vector<64x1xf32>
    %6 = arith.mulf %4, %5 : vector<64x1xf32>
    %7 = vector.broadcast %6 : vector<64x1xf32> to vector<64x2xf32>
    %8 = arith.subf %2, %7 : vector<64x2xf32>
    %9 = arith.mulf %8, %8 : vector<64x2xf32>
    %cst_5 = arith.constant dense<0.000000e+00> : vector<64xf32>
    %10 = vector.multi_reduction <add>, %9, %cst_5 [1] : vector<64x2xf32> to vector<64xf32>
    %11 = vector.shape_cast %10 : vector<64xf32> to vector<64x1xf32>
    %cst_6 = arith.constant 5.000000e-01 : f32
    %12 = vector.broadcast %cst_6 : f32 to vector<64x1xf32>
    %13 = arith.mulf %11, %12 : vector<64x1xf32>
    %c0_7 = arith.constant 0 : index
    %c0_8 = arith.constant 0 : index
    %14 = vector.load %arg2[%c0_7, %c0_8] : memref<64x1xf32, #tpu.memory_space<vmem>>, vector<64x1xf32>
    %cst_9 = arith.constant 9.99999974E-6 : f32
    %15 = vector.broadcast %cst_9 : f32 to vector<64x1xf32>
    %16 = arith.addf %13, %15 : vector<64x1xf32>
    %17 = math.rsqrt %16 : vector<64x1xf32>
    %18 = arith.mulf %14, %17 : vector<64x1xf32>
    %19 = vector.broadcast %18 : vector<64x1xf32> to vector<64x2xf32>
    %20 = arith.mulf %8, %19 : vector<64x2xf32>
    %c0_10 = arith.constant 0 : index
    %c0_11 = arith.constant 0 : index
    %21 = vector.load %arg3[%c0_10, %c0_11] : memref<64x1xf32, #tpu.memory_space<vmem>>, vector<64x1xf32>
    %22 = vector.broadcast %21 : vector<64x1xf32> to vector<64x2xf32>
    %23 = arith.addf %20, %22 : vector<64x2xf32>
    %c0_12 = arith.constant 0 : index
    %24 = memref.load %arg4[%c0_12] : memref<1xf32, #tpu.memory_space<smem>>
    %cst_13 = arith.constant 0.000000e+00 : f32
    %25 = vector.broadcast %cst_13 : f32 to vector<64x2xf32>
    %26 = arith.cmpf oge, %23, %25 : vector<64x2xf32>
    %27 = vector.broadcast %24 : f32 to vector<64x2xf32>
    %28 = arith.mulf %27, %23 : vector<64x2xf32>
    %29 = arith.select %26, %23, %28 : vector<64x2xi1>, vector<64x2xf32>
    %c0_14 = arith.constant 0 : index
    %c0_15 = arith.constant 0 : index
    %30 = vector.load %arg5[%c0_14, %c0_15] : memref<64x2xf32, #tpu.memory_space<vmem>>, vector<64x2xf32>
    tpu.vector_store %arg5[%c0_14, %c0_15], %29 {strides = array<i32>} : memref<64x2xf32, #tpu.memory_space<vmem>>, vector<64x2xf32>,
    return
  }
}

module attributes {stable_mosaic.version = 11 : i64} {
  func.func @_fused_block_kernel(%arg0: memref<576x8xf32, #tpu.memory_space<vmem>>, %arg1: memref<32x576xf32, #tpu.memory_space<vmem>>, %arg2: memref<32x1xf32, #tpu.memory_space<vmem>>, %arg3: memref<32x1xf32, #tpu.memory_space<vmem>>, %arg4: memref<1xf32, #tpu.memory_space<smem>>, %arg5: memref<32x8xf32, #tpu.memory_space<vmem>>) attributes {dimension_semantics = [], scalar_prefetch = 0 : i64, scratch_operands = 0 : i64, tpu.core_type = #tpu.core_type<tc>} {
    %c0 = arith.constant 0 : index
    %c0_0 = arith.constant 0 : index
    %0 = vector.load %arg1[%c0, %c0_0] : memref<32x576xf32, #tpu.memory_space<vmem>>, vector<32x576xf32>
    %c0_1 = arith.constant 0 : index
    %c0_2 = arith.constant 0 : index
    %1 = vector.load %arg0[%c0_1, %c0_2] : memref<576x8xf32, #tpu.memory_space<vmem>>, vector<576x8xf32>
    %cst = arith.constant dense<0.000000e+00> : vector<32x8xf32>
    %2 = tpu.matmul %0, %1, %cst {dimension_numbers = #tpu.dot_dimension_numbers<[1], [0], [0], [1], [0, 0, 1, 1], [], []>} : vector<32x576xf32>, vector<576x8xf32>, vector<32x8xf32> -> vector<32x8xf32>
    %cst_3 = arith.constant dense<0.000000e+00> : vector<32xf32>
    %3 = vector.multi_reduction <add>, %2, %cst_3 [1] : vector<32x8xf32> to vector<32xf32>
    %4 = vector.shape_cast %3 : vector<32xf32> to vector<32x1xf32>
    %cst_4 = arith.constant 1.250000e-01 : f32
    %5 = vector.broadcast %cst_4 : f32 to vector<32x1xf32>
    %6 = arith.mulf %4, %5 : vector<32x1xf32>
    %7 = vector.broadcast %6 : vector<32x1xf32> to vector<32x8xf32>
    %8 = arith.subf %2, %7 : vector<32x8xf32>
    %9 = arith.mulf %8, %8 : vector<32x8xf32>
    %cst_5 = arith.constant dense<0.000000e+00> : vector<32xf32>
    %10 = vector.multi_reduction <add>, %9, %cst_5 [1] : vector<32x8xf32> to vector<32xf32>
    %11 = vector.shape_cast %10 : vector<32xf32> to vector<32x1xf32>
    %cst_6 = arith.constant 1.250000e-01 : f32
    %12 = vector.broadcast %cst_6 : f32 to vector<32x1xf32>
    %13 = arith.mulf %11, %12 : vector<32x1xf32>
    %c0_7 = arith.constant 0 : index
    %c0_8 = arith.constant 0 : index
    %14 = vector.load %arg2[%c0_7, %c0_8] : memref<32x1xf32, #tpu.memory_space<vmem>>, vector<32x1xf32>
    %cst_9 = arith.constant 9.99999974E-6 : f32
    %15 = vector.broadcast %cst_9 : f32 to vector<32x1xf32>
    %16 = arith.addf %13, %15 : vector<32x1xf32>
    %17 = math.rsqrt %16 : vector<32x1xf32>
    %18 = arith.mulf %14, %17 : vector<32x1xf32>
    %19 = vector.broadcast %18 : vector<32x1xf32> to vector<32x8xf32>
    %20 = arith.mulf %8, %19 : vector<32x8xf32>
    %c0_10 = arith.constant 0 : index
    %c0_11 = arith.constant 0 : index
    %21 = vector.load %arg3[%c0_10, %c0_11] : memref<32x1xf32, #tpu.memory_space<vmem>>, vector<32x1xf32>
    %22 = vector.broadcast %21 : vector<32x1xf32> to vector<32x8xf32>
    %23 = arith.addf %20, %22 : vector<32x8xf32>
    %c0_12 = arith.constant 0 : index
    %24 = memref.load %arg4[%c0_12] : memref<1xf32, #tpu.memory_space<smem>>
    %cst_13 = arith.constant 0.000000e+00 : f32
    %25 = vector.broadcast %cst_13 : f32 to vector<32x8xf32>
    %26 = arith.cmpf oge, %23, %25 : vector<32x8xf32>
    %27 = vector.broadcast %24 : f32 to vector<32x8xf32>
    %28 = arith.mulf %27, %23 : vector<32x8xf32>
    %29 = arith.select %26, %23, %28 : vector<32x8xi1>, vector<32x8xf32>
    %c0_14 = arith.constant 0 : index
    %c0_15 = arith.constant 0 : index
    %30 = vector.load %arg5[%c0_14, %c0_15] : memref<32x8xf32, #tpu.memory_space<vmem>>, vector<32x8xf32>
    tpu.vector_store %arg5[%c0_14, %c0_15], %29 {strides = array<i32>} : memref<32x8xf32, #tpu.memory_space<vmem>>, vector<32x8xf32>,
    return
  }
}

module attributes {stable_mosaic.version = 11 : i64} {
  func.func @_fused_block_kernel(%arg0: memref<576x32xf32, #tpu.memory_space<vmem>>, %arg1: memref<16x576xf32, #tpu.memory_space<vmem>>, %arg2: memref<16x1xf32, #tpu.memory_space<vmem>>, %arg3: memref<16x1xf32, #tpu.memory_space<vmem>>, %arg4: memref<1xf32, #tpu.memory_space<smem>>, %arg5: memref<16x32xf32, #tpu.memory_space<vmem>>) attributes {dimension_semantics = [], scalar_prefetch = 0 : i64, scratch_operands = 0 : i64, tpu.core_type = #tpu.core_type<tc>} {
    %c0 = arith.constant 0 : index
    %c0_0 = arith.constant 0 : index
    %0 = vector.load %arg1[%c0, %c0_0] : memref<16x576xf32, #tpu.memory_space<vmem>>, vector<16x576xf32>
    %c0_1 = arith.constant 0 : index
    %c0_2 = arith.constant 0 : index
    %1 = vector.load %arg0[%c0_1, %c0_2] : memref<576x32xf32, #tpu.memory_space<vmem>>, vector<576x32xf32>
    %cst = arith.constant dense<0.000000e+00> : vector<16x32xf32>
    %2 = tpu.matmul %0, %1, %cst {dimension_numbers = #tpu.dot_dimension_numbers<[1], [0], [0], [1], [0, 0, 1, 1], [], []>} : vector<16x576xf32>, vector<576x32xf32>, vector<16x32xf32> -> vector<16x32xf32>
    %cst_3 = arith.constant dense<0.000000e+00> : vector<16xf32>
    %3 = vector.multi_reduction <add>, %2, %cst_3 [1] : vector<16x32xf32> to vector<16xf32>
    %4 = vector.shape_cast %3 : vector<16xf32> to vector<16x1xf32>
    %cst_4 = arith.constant 3.125000e-02 : f32
    %5 = vector.broadcast %cst_4 : f32 to vector<16x1xf32>
    %6 = arith.mulf %4, %5 : vector<16x1xf32>
    %7 = vector.broadcast %6 : vector<16x1xf32> to vector<16x32xf32>
    %8 = arith.subf %2, %7 : vector<16x32xf32>
    %9 = arith.mulf %8, %8 : vector<16x32xf32>
    %cst_5 = arith.constant dense<0.000000e+00> : vector<16xf32>
    %10 = vector.multi_reduction <add>, %9, %cst_5 [1] : vector<16x32xf32> to vector<16xf32>
    %11 = vector.shape_cast %10 : vector<16xf32> to vector<16x1xf32>
    %cst_6 = arith.constant 3.125000e-02 : f32
    %12 = vector.broadcast %cst_6 : f32 to vector<16x1xf32>
    %13 = arith.mulf %11, %12 : vector<16x1xf32>
    %c0_7 = arith.constant 0 : index
    %c0_8 = arith.constant 0 : index
    %14 = vector.load %arg2[%c0_7, %c0_8] : memref<16x1xf32, #tpu.memory_space<vmem>>, vector<16x1xf32>
    %cst_9 = arith.constant 9.99999974E-6 : f32
    %15 = vector.broadcast %cst_9 : f32 to vector<16x1xf32>
    %16 = arith.addf %13, %15 : vector<16x1xf32>
    %17 = math.rsqrt %16 : vector<16x1xf32>
    %18 = arith.mulf %14, %17 : vector<16x1xf32>
    %19 = vector.broadcast %18 : vector<16x1xf32> to vector<16x32xf32>
    %20 = arith.mulf %8, %19 : vector<16x32xf32>
    %c0_10 = arith.constant 0 : index
    %c0_11 = arith.constant 0 : index
    %21 = vector.load %arg3[%c0_10, %c0_11] : memref<16x1xf32, #tpu.memory_space<vmem>>, vector<16x1xf32>
    %22 = vector.broadcast %21 : vector<16x1xf32> to vector<16x32xf32>
    %23 = arith.addf %20, %22 : vector<16x32xf32>
    %c0_12 = arith.constant 0 : index
    %24 = memref.load %arg4[%c0_12] : memref<1xf32, #tpu.memory_space<smem>>
    %cst_13 = arith.constant 0.000000e+00 : f32
    %25 = vector.broadcast %cst_13 : f32 to vector<16x32xf32>
    %26 = arith.cmpf oge, %23, %25 : vector<16x32xf32>
    %27 = vector.broadcast %24 : f32 to vector<16x32xf32>
    %28 = arith.mulf %27, %23 : vector<16x32xf32>
    %29 = arith.select %26, %23, %28 : vector<16x32xi1>, vector<16x32xf32>
    %c0_14 = arith.constant 0 : index
    %c0_15 = arith.constant 0 : index
    %30 = vector.load %arg5[%c0_14, %c0_15] : memref<16x32xf32, #tpu.memory_space<vmem>>, vector<16x32xf32>
    tpu.vector_store %arg5[%c0_14, %c0_15], %29 {strides = array<i32>} : memref<16x32xf32, #tpu.memory_space<vmem>>, vector<16x32xf32>,
    return
  }
}

module attributes {stable_mosaic.version = 11 : i64} {
  func.func @_fused_block_kernel(%arg0: memref<288x128xf32, #tpu.memory_space<vmem>>, %arg1: memref<8x288xf32, #tpu.memory_space<vmem>>, %arg2: memref<8x1xf32, #tpu.memory_space<vmem>>, %arg3: memref<8x1xf32, #tpu.memory_space<vmem>>, %arg4: memref<1xf32, #tpu.memory_space<smem>>, %arg5: memref<8x128xf32, #tpu.memory_space<vmem>>) attributes {dimension_semantics = [], scalar_prefetch = 0 : i64, scratch_operands = 0 : i64, tpu.core_type = #tpu.core_type<tc>} {
    %c0 = arith.constant 0 : index
    %c0_0 = arith.constant 0 : index
    %0 = vector.load %arg1[%c0, %c0_0] : memref<8x288xf32, #tpu.memory_space<vmem>>, vector<8x288xf32>
    %c0_1 = arith.constant 0 : index
    %c0_2 = arith.constant 0 : index
    %1 = vector.load %arg0[%c0_1, %c0_2] : memref<288x128xf32, #tpu.memory_space<vmem>>, vector<288x128xf32>
    %cst = arith.constant dense<0.000000e+00> : vector<8x128xf32>
    %2 = tpu.matmul %0, %1, %cst {dimension_numbers = #tpu.dot_dimension_numbers<[1], [0], [0], [1], [0, 0, 1, 1], [], []>} : vector<8x288xf32>, vector<288x128xf32>, vector<8x128xf32> -> vector<8x128xf32>
    %cst_3 = arith.constant dense<0.000000e+00> : vector<8xf32>
    %3 = vector.multi_reduction <add>, %2, %cst_3 [1] : vector<8x128xf32> to vector<8xf32>
    %4 = vector.shape_cast %3 : vector<8xf32> to vector<8x1xf32>
    %cst_4 = arith.constant 7.812500e-03 : f32
    %5 = vector.broadcast %cst_4 : f32 to vector<8x1xf32>
    %6 = arith.mulf %4, %5 : vector<8x1xf32>
    %7 = vector.broadcast %6 : vector<8x1xf32> to vector<8x128xf32>
    %8 = arith.subf %2, %7 : vector<8x128xf32>
    %9 = arith.mulf %8, %8 : vector<8x128xf32>
    %cst_5 = arith.constant dense<0.000000e+00> : vector<8xf32>
    %10 = vector.multi_reduction <add>, %9, %cst_5 [1] : vector<8x128xf32> to vector<8xf32>
    %11 = vector.shape_cast %10 : vector<8xf32> to vector<8x1xf32>
    %cst_6 = arith.constant 7.812500e-03 : f32
    %12 = vector.broadcast %cst_6 : f32 to vector<8x1xf32>
    %13 = arith.mulf %11, %12 : vector<8x1xf32>
    %c0_7 = arith.constant 0 : index
    %c0_8 = arith.constant 0 : index
    %14 = vector.load %arg2[%c0_7, %c0_8] : memref<8x1xf32, #tpu.memory_space<vmem>>, vector<8x1xf32>
    %cst_9 = arith.constant 9.99999974E-6 : f32
    %15 = vector.broadcast %cst_9 : f32 to vector<8x1xf32>
    %16 = arith.addf %13, %15 : vector<8x1xf32>
    %17 = math.rsqrt %16 : vector<8x1xf32>
    %18 = arith.mulf %14, %17 : vector<8x1xf32>
    %19 = vector.broadcast %18 : vector<8x1xf32> to vector<8x128xf32>
    %20 = arith.mulf %8, %19 : vector<8x128xf32>
    %c0_10 = arith.constant 0 : index
    %c0_11 = arith.constant 0 : index
    %21 = vector.load %arg3[%c0_10, %c0_11] : memref<8x1xf32, #tpu.memory_space<vmem>>, vector<8x1xf32>
    %22 = vector.broadcast %21 : vector<8x1xf32> to vector<8x128xf32>
    %23 = arith.addf %20, %22 : vector<8x128xf32>
    %c0_12 = arith.constant 0 : index
    %24 = memref.load %arg4[%c0_12] : memref<1xf32, #tpu.memory_space<smem>>
    %cst_13 = arith.constant 0.000000e+00 : f32
    %25 = vector.broadcast %cst_13 : f32 to vector<8x128xf32>
    %26 = arith.cmpf oge, %23, %25 : vector<8x128xf32>
    %27 = vector.broadcast %24 : f32 to vector<8x128xf32>
    %28 = arith.mulf %27, %23 : vector<8x128xf32>
    %29 = arith.select %26, %23, %28 : vector<8x128xi1>, vector<8x128xf32>
    %c0_14 = arith.constant 0 : index
    %c0_15 = arith.constant 0 : index
    %30 = vector.load %arg5[%c0_14, %c0_15] : memref<8x128xf32, #tpu.memory_space<vmem>>, vector<8x128xf32>
    tpu.vector_store %arg5[%c0_14, %c0_15], %29 {strides = array<i32>} : memref<8x128xf32, #tpu.memory_space<vmem>>, vector<8x128xf32>,
    return
  }
}

module attributes {stable_mosaic.version = 11 : i64} {
  func.func @_fused_block_kernel(%arg0: memref<144x512xf32, #tpu.memory_space<vmem>>, %arg1: memref<4x144xf32, #tpu.memory_space<vmem>>, %arg2: memref<4x1xf32, #tpu.memory_space<vmem>>, %arg3: memref<4x1xf32, #tpu.memory_space<vmem>>, %arg4: memref<1xf32, #tpu.memory_space<smem>>, %arg5: memref<4x512xf32, #tpu.memory_space<vmem>>) attributes {dimension_semantics = [], scalar_prefetch = 0 : i64, scratch_operands = 0 : i64, tpu.core_type = #tpu.core_type<tc>} {
    %c0 = arith.constant 0 : index
    %c0_0 = arith.constant 0 : index
    %0 = vector.load %arg1[%c0, %c0_0] : memref<4x144xf32, #tpu.memory_space<vmem>>, vector<4x144xf32>
    %c0_1 = arith.constant 0 : index
    %c0_2 = arith.constant 0 : index
    %1 = vector.load %arg0[%c0_1, %c0_2] : memref<144x512xf32, #tpu.memory_space<vmem>>, vector<144x512xf32>
    %cst = arith.constant dense<0.000000e+00> : vector<4x512xf32>
    %2 = tpu.matmul %0, %1, %cst {dimension_numbers = #tpu.dot_dimension_numbers<[1], [0], [0], [1], [0, 0, 1, 1], [], []>} : vector<4x144xf32>, vector<144x512xf32>, vector<4x512xf32> -> vector<4x512xf32>
    %cst_3 = arith.constant dense<0.000000e+00> : vector<4xf32>
    %3 = vector.multi_reduction <add>, %2, %cst_3 [1] : vector<4x512xf32> to vector<4xf32>
    %4 = vector.shape_cast %3 : vector<4xf32> to vector<4x1xf32>
    %cst_4 = arith.constant 0.001953125 : f32
    %5 = vector.broadcast %cst_4 : f32 to vector<4x1xf32>
    %6 = arith.mulf %4, %5 : vector<4x1xf32>
    %7 = vector.broadcast %6 : vector<4x1xf32> to vector<4x512xf32>
    %8 = arith.subf %2, %7 : vector<4x512xf32>
    %9 = arith.mulf %8, %8 : vector<4x512xf32>
    %cst_5 = arith.constant dense<0.000000e+00> : vector<4xf32>
    %10 = vector.multi_reduction <add>, %9, %cst_5 [1] : vector<4x512xf32> to vector<4xf32>
    %11 = vector.shape_cast %10 : vector<4xf32> to vector<4x1xf32>
    %cst_6 = arith.constant 0.001953125 : f32
    %12 = vector.broadcast %cst_6 : f32 to vector<4x1xf32>
    %13 = arith.mulf %11, %12 : vector<4x1xf32>
    %c0_7 = arith.constant 0 : index
    %c0_8 = arith.constant 0 : index
    %14 = vector.load %arg2[%c0_7, %c0_8] : memref<4x1xf32, #tpu.memory_space<vmem>>, vector<4x1xf32>
    %cst_9 = arith.constant 9.99999974E-6 : f32
    %15 = vector.broadcast %cst_9 : f32 to vector<4x1xf32>
    %16 = arith.addf %13, %15 : vector<4x1xf32>
    %17 = math.rsqrt %16 : vector<4x1xf32>
    %18 = arith.mulf %14, %17 : vector<4x1xf32>
    %19 = vector.broadcast %18 : vector<4x1xf32> to vector<4x512xf32>
    %20 = arith.mulf %8, %19 : vector<4x512xf32>
    %c0_10 = arith.constant 0 : index
    %c0_11 = arith.constant 0 : index
    %21 = vector.load %arg3[%c0_10, %c0_11] : memref<4x1xf32, #tpu.memory_space<vmem>>, vector<4x1xf32>
    %22 = vector.broadcast %21 : vector<4x1xf32> to vector<4x512xf32>
    %23 = arith.addf %20, %22 : vector<4x512xf32>
    %c0_12 = arith.constant 0 : index
    %24 = memref.load %arg4[%c0_12] : memref<1xf32, #tpu.memory_space<smem>>
    %cst_13 = arith.constant 0.000000e+00 : f32
    %25 = vector.broadcast %cst_13 : f32 to vector<4x512xf32>
    %26 = arith.cmpf oge, %23, %25 : vector<4x512xf32>
    %27 = vector.broadcast %24 : f32 to vector<4x512xf32>
    %28 = arith.mulf %27, %23 : vector<4x512xf32>
    %29 = arith.select %26, %23, %28 : vector<4x512xi1>, vector<4x512xf32>
    %c0_14 = arith.constant 0 : index
    %c0_15 = arith.constant 0 : index
    %30 = vector.load %arg5[%c0_14, %c0_15] : memref<4x512xf32, #tpu.memory_space<vmem>>, vector<4x512xf32>
    tpu.vector_store %arg5[%c0_14, %c0_15], %29 {strides = array<i32>} : memref<4x512xf32, #tpu.memory_space<vmem>>, vector<4x512xf32>,
    return
  }
}

module attributes {stable_mosaic.version = 11 : i64} {
  func.func @_fused_block_kernel(%arg0: memref<72x2048xf32, #tpu.memory_space<vmem>>, %arg1: memref<1x72xf32, #tpu.memory_space<vmem>>, %arg2: memref<1x1xf32, #tpu.memory_space<vmem>>, %arg3: memref<1x1xf32, #tpu.memory_space<vmem>>, %arg4: memref<1xf32, #tpu.memory_space<smem>>, %arg5: memref<1x2048xf32, #tpu.memory_space<vmem>>) attributes {dimension_semantics = [], scalar_prefetch = 0 : i64, scratch_operands = 0 : i64, tpu.core_type = #tpu.core_type<tc>} {
    %c0 = arith.constant 0 : index
    %c0_0 = arith.constant 0 : index
    %0 = vector.load %arg1[%c0, %c0_0] : memref<1x72xf32, #tpu.memory_space<vmem>>, vector<1x72xf32>
    %c0_1 = arith.constant 0 : index
    %c0_2 = arith.constant 0 : index
    %1 = vector.load %arg0[%c0_1, %c0_2] : memref<72x2048xf32, #tpu.memory_space<vmem>>, vector<72x2048xf32>
    %cst = arith.constant dense<0.000000e+00> : vector<1x2048xf32>
    %2 = tpu.matmul %0, %1, %cst {dimension_numbers = #tpu.dot_dimension_numbers<[1], [0], [0], [1], [0, 0, 1, 1], [], []>} : vector<1x72xf32>, vector<72x2048xf32>, vector<1x2048xf32> -> vector<1x2048xf32>
    %cst_3 = arith.constant dense<0.000000e+00> : vector<1xf32>
    %3 = vector.multi_reduction <add>, %2, %cst_3 [1] : vector<1x2048xf32> to vector<1xf32>
    %4 = vector.shape_cast %3 : vector<1xf32> to vector<1x1xf32>
    %cst_4 = arith.constant 4.8828125E-4 : f32
    %5 = vector.broadcast %cst_4 : f32 to vector<1x1xf32>
    %6 = arith.mulf %4, %5 : vector<1x1xf32>
    %7 = vector.broadcast %6 : vector<1x1xf32> to vector<1x2048xf32>
    %8 = arith.subf %2, %7 : vector<1x2048xf32>
    %9 = arith.mulf %8, %8 : vector<1x2048xf32>
    %cst_5 = arith.constant dense<0.000000e+00> : vector<1xf32>
    %10 = vector.multi_reduction <add>, %9, %cst_5 [1] : vector<1x2048xf32> to vector<1xf32>
    %11 = vector.shape_cast %10 : vector<1xf32> to vector<1x1xf32>
    %cst_6 = arith.constant 4.8828125E-4 : f32
    %12 = vector.broadcast %cst_6 : f32 to vector<1x1xf32>
    %13 = arith.mulf %11, %12 : vector<1x1xf32>
    %c0_7 = arith.constant 0 : index
    %c0_8 = arith.constant 0 : index
    %14 = vector.load %arg2[%c0_7, %c0_8] : memref<1x1xf32, #tpu.memory_space<vmem>>, vector<1x1xf32>
    %cst_9 = arith.constant 9.99999974E-6 : f32
    %15 = vector.broadcast %cst_9 : f32 to vector<1x1xf32>
    %16 = arith.addf %13, %15 : vector<1x1xf32>
    %17 = math.rsqrt %16 : vector<1x1xf32>
    %18 = arith.mulf %14, %17 : vector<1x1xf32>
    %19 = vector.broadcast %18 : vector<1x1xf32> to vector<1x2048xf32>
    %20 = arith.mulf %8, %19 : vector<1x2048xf32>
    %c0_10 = arith.constant 0 : index
    %c0_11 = arith.constant 0 : index
    %21 = vector.load %arg3[%c0_10, %c0_11] : memref<1x1xf32, #tpu.memory_space<vmem>>, vector<1x1xf32>
    %22 = vector.broadcast %21 : vector<1x1xf32> to vector<1x2048xf32>
    %23 = arith.addf %20, %22 : vector<1x2048xf32>
    %c0_12 = arith.constant 0 : index
    %24 = memref.load %arg4[%c0_12] : memref<1xf32, #tpu.memory_space<smem>>
    %cst_13 = arith.constant 0.000000e+00 : f32
    %25 = vector.broadcast %cst_13 : f32 to vector<1x2048xf32>
    %26 = arith.cmpf oge, %23, %25 : vector<1x2048xf32>
    %27 = vector.broadcast %24 : f32 to vector<1x2048xf32>
    %28 = arith.mulf %27, %23 : vector<1x2048xf32>
    %29 = arith.select %26, %23, %28 : vector<1x2048xi1>, vector<1x2048xf32>
    %c0_14 = arith.constant 0 : index
    %c0_15 = arith.constant 0 : index
    %30 = vector.load %arg5[%c0_14, %c0_15] : memref<1x2048xf32, #tpu.memory_space<vmem>>, vector<1x2048xf32>
    tpu.vector_store %arg5[%c0_14, %c0_15], %29 {strides = array<i32>} : memref<1x2048xf32, #tpu.memory_space<vmem>>, vector<1x2048xf32>,
    return
  }
}

</mosaic_0001>

<bundles_post_ra>
// kernel: unet5_forward.10
= control target key start
LH: loop header
LB: loop body
LE: loop exit
PB: predicated region body
PF: predicated region fallthrough
CT: control target
= control target key end

     0   :  { %vm34_vm0 = vcmask 1040384   ;;  %v281_v3 = vmov 0.0   ;;  %vm30_vm1 = vcmask 72704   ;;  %vm189_vm2 = vcmask 1043456   ;;  %s367_s0 = inlined_call_operand.vmem [shape: f32[9,512], index: 0, kind: input, shape index: {}]   ;;  %s368_s1 = inlined_call_operand.vmem [shape: f32[4,9], index: 1, kind: input, shape index: {}]   ;;  %s369_s2 = inlined_call_operand.vmem [shape: f32[4,1], index: 2, kind: input, shape index: {}]   ;;  %s370_s3 = inlined_call_operand.vmem [shape: f32[4,1], index: 3, kind: input, shape index: {}]   ;;  %s371_s4 = inlined_call_operand.<no memory space> [shape: f32[1], index: 4, kind: input, shape index: {}]   ;;  %s372_s5 = inlined_call_operand.vmem [shape: f32[4,512], index: 5, kind: output, shape index: {}]  }
   0x1   :  { %v27_v0 = vld [vmem:[%s367_s0 + $0x28] sm:$0x1]  ;;  %v26_v1 = vld [vmem:[%s367_s0 + $0x20] sm:$0x1]  ;;  %111 = vmatprep.mubr.f32.mxu0 %v281_v3  ;;  %182 = vmatprep.mubr.f32.mxu1 %v281_v3  ;;  %v29_v4 = vld [vmem:[%s367_s0 + $0x38] sm:$0x1]  ;;  %v246_v51 = vstv %s371_s4 }
   0x2   :  { %v23_v2 = vld [vmem:[%s367_s0 + $0x8] sm:$0xff]  ;;  %269 = vmatprep.subr.msk.mxu0 %vm34_vm0, %v27_v0  ;;  %v22_v5 = vld [vmem:[%s367_s0] sm:$0xff]  ;;  %v28_v6 = vld [vmem:[%s367_s0 + $0x30] sm:$0x1]  ;;  %272 = vmatprep.subr.msk.mxu1 %vm34_vm0, %v29_v4  ;;  %v282_v38 = vmov 0  }
   0x3   :  { %270 = vmatpush1.msk.msra.mxu0 %vm34_vm0, %v26_v1  ;;  %v21_v7 = vld [vmem:[%s368_s1] sm:$0xf]  ;;  %v25_v8 = vld [vmem:[%s367_s0 + $0x18] sm:$0xff]  ;;  %v24_v9 = vld [vmem:[%s367_s0 + $0x10] sm:$0xff]  ;;  %273 = vmatpush1.msk.msra.mxu1 %vm34_vm0, %v28_v6 }
   0x4   :  { %77 = vmatprep.subr.mxu0 %v23_v2  ;;  %148 = vmatprep.subr.mxu1 %v25_v8  ;;  %v218_v42 = vld [vmem:[%s369_s2] sm:$0xf] }
   0x5   :  { %78 = vmatpush1.msra.mxu0 %v22_v5  ;;  %149 = vmatpush1.msra.mxu1 %v24_v9  ;;  %v231_v45 = vld [vmem:[%s370_s3] sm:$0xf] }
   0x6   :  { %271 = vmatmul.mubr.msk.f32.vlgmr.msra.gmra.mxu0 %vm30_vm1, %v21_v7  ;;  %274 = vmatmul.mubr.msk.f32.vlgmr.msra.gmra.mxu1 %vm30_vm1, %v21_v7 }
   0x7   :  { %277 = vset.pattern.permute.xlu1 %v282_v38  ;;  %278 = vset.pattern.permute.xlu0 %v282_v38 }
  0xc6   :  { %v113_v10 = vpop.f32.mrf.mxu0  ;;  %v184_v11 = vpop.f32.mrf.mxu1 }
  0xc7   :  { %v190_v13 = vsel %vm189_vm2, %v113_v10, 0.0  ;;  %v193_v15 = vsel %vm189_vm2, %v184_v11, 0.0 }
  0xc8   :  { %v115_v12 = vpop.f32.mrf.mxu0  ;;  %v186_v17 = vpop.f32.mrf.mxu1 }
  0xc9   :  { %v191_v14 = vsel %vm189_vm2, %v115_v12, 0.0  ;;  %v195_v19 = vsel %vm189_vm2, %v186_v17, 0.0 }
  0xca   :  { %v192_v16 = vadd.f32 %v191_v14, %v190_v13 }
  0xcc   :  { %v194_v18 = vadd.f32 %v193_v15, %v192_v16 }
  0xce   :  { %v196_v20 = vadd.f32 %v195_v19, %v194_v18 }
  0xd0   :  { %197 = vadd.xlane.f32.xlu0 %v196_v20 }
 0x159   :  { %v198_v21 = vpop.xlane.xlu0 %197 }
 0x15a   :  { %v199_v22 = vmul.f32 0.001953125, %v198_v21 }
 0x15c   :  { %v200_v23 = vsub.f32 %v113_v10, %v199_v22  ;;  %v201_v24 = vsub.f32 %v115_v12, %v199_v22  ;;  %v202_v25 = vsub.f32 %v184_v11, %v199_v22  ;;  %v203_v26 = vsub.f32 %v186_v17, %v199_v22 }
 0x15e   :  { %v204_v27 = vmul.f32 %v200_v23, %v200_v23  ;;  %v205_v28 = vmul.f32 %v201_v24, %v201_v24  ;;  %v206_v29 = vmul.f32 %v202_v25, %v202_v25  ;;  %v207_v30 = vmul.f32 %v203_v26, %v203_v26 }
 0x160   :  { %v208_v31 = vsel %vm189_vm2, %v204_v27, 0.0  ;;  %v209_v32 = vsel %vm189_vm2, %v205_v28, 0.0  ;;  %v211_v34 = vsel %vm189_vm2, %v206_v29, 0.0  ;;  %v213_v36 = vsel %vm189_vm2, %v207_v30, 0.0 }
 0x161   :  { %v210_v33 = vadd.f32 %v209_v32, %v208_v31 }
 0x163   :  { %v212_v35 = vadd.f32 %v211_v34, %v210_v33 }
 0x165   :  { %v214_v37 = vadd.f32 %v213_v36, %v212_v35 }
 0x167   :  { %215 = vadd.xlane.f32.xlu0 %v214_v37 }
 0x1f0   :  { %v216_v39 = vpop.xlane.xlu0 %215 }
 0x1f1   :  { %v217_v40 = vmul.f32 0.001953125, %v216_v39 }
 0x1f3   :  { %v219_v41 = vadd.f32 1e-05, %v217_v40 }
 0x1f5   :  { %279 = vrsqrt.f32 %v219_v41 }
 0x202   :  { %v280_v43 = vpop.eup %279 }
 0x203   :  { %v221_v44 = vmul.f32 %v280_v43, %v218_v42 }
 0x205   :  { %224 = vperm.xlu1 %277, %v221_v44  }
 0x209   :  { %234 = vperm.xlu1 %277, %v231_v45  }
 0x280   :  { %v225_v46 = vpop.permute.xlu1 %224 }
 0x281   :  { %v227_v47 = vmul.f32 %v225_v46, %v200_v23  ;;  %v228_v48 = vmul.f32 %v225_v46, %v201_v24  ;;  %v229_v49 = vmul.f32 %v225_v46, %v202_v25  ;;  %v230_v50 = vmul.f32 %v225_v46, %v203_v26 }
 0x284   :  { %v235_v52 = vpop.permute.xlu1 %234 }
 0x285   :  { %v237_v53 = vadd.f32 %v235_v52, %v227_v47  ;;  %v238_v54 = vadd.f32 %v235_v52, %v228_v48  ;;  %v239_v55 = vadd.f32 %v235_v52, %v229_v49  ;;  %v240_v56 = vadd.f32 %v235_v52, %v230_v50 }
 0x287   :  { %vm242_vm3 = vcmp.ge.f32.partialorder %v237_v53, 0.0  ;;  %vm243_vm4 = vcmp.ge.f32.partialorder %v238_v54, 0.0  ;;  %vm244_vm5 = vcmp.ge.f32.partialorder %v239_v55, 0.0  ;;  %vm245_vm6 = vcmp.ge.f32.partialorder %v240_v56, 0.0 }
 0x288   :  { %v247_v57 = vmul.f32 %v246_v51, %v237_v53  ;;  %v248_v58 = vmul.f32 %v246_v51, %v238_v54  ;;  %v249_v59 = vmul.f32 %v246_v51, %v239_v55  ;;  %v250_v60 = vmul.f32 %v246_v51, %v240_v56 }
 0x28a   :  { %v251_v61 = vsel %vm242_vm3, %v237_v53, %v247_v57  ;;  %v252_v62 = vsel %vm243_vm4, %v238_v54, %v248_v58  ;;  %v253_v63 = vsel %vm244_vm5, %v239_v55, %v249_v59  ;;  %v254_v0 = vsel %vm245_vm6, %v240_v56, %v250_v60 }
 0x28b   :  { %v259_v1 = vcombine.low %v251_v61, %v252_v62  ;;  %v260_v2 = vcombine.low %v253_v63, %v254_v0 }
 0x28d   :  { %263 = vst [vmem:[%s372_s5] sm:$0xff] %v259_v1  ;;  %264 = vst [vmem:[%s372_s5 + $0x8] sm:$0xff] %v260_v2 }

// kernel: unet5_forward.11
= control target key start
LH: loop header
LB: loop body
LE: loop exit
PB: predicated region body
PF: predicated region fallthrough
CT: control target
= control target key end

     0   :  { %vm31_vm0 = vcmask 1043456   ;;  %v168_v0 = vmov 0.0   ;;  %vm169_vm1 = vmmov 0   ;;  %vm27_vm2 = vcmask 293888   ;;  %s231_s0 = inlined_call_operand.vmem [shape: f32[36,128], index: 0, kind: input, shape index: {}]   ;;  %s232_s1 = inlined_call_operand.vmem [shape: f32[8,36], index: 1, kind: input, shape index: {}]   ;;  %s233_s2 = inlined_call_operand.vmem [shape: f32[8,1], index: 2, kind: input, shape index: {}]   ;;  %s234_s3 = inlined_call_operand.vmem [shape: f32[8,1], index: 3, kind: input, shape index: {}]   ;;  %s235_s4 = inlined_call_operand.<no memory space> [shape: f32[1], index: 4, kind: input, shape index: {}]   ;;  %s236_s5 = inlined_call_operand.vmem [shape: f32[8,128], index: 5, kind: output, shape index: {}]  }
   0x1   :  { %148 = vmatprep.subr.mxu0 %v168_v0  ;;  %v26_v1 = vld [vmem:[%s231_s0 + $0x20] sm:$0xf]  ;;  %v25_v2 = vld [vmem:[%s231_s0 + $0x18] sm:$0xff]  ;;  %158 = vmatprep.mubr.msk.f32.mxu0 %vm169_vm1, %v168_v0  ;;  %v24_v3 = vld [vmem:[%s231_s0 + $0x10] sm:$0xff]  ;;  %v170_v13 = vmov 0   ;;  %v132_v23 = vstv %s235_s4 }
   0x2   :  { %149 = vmatpush3.msk.msra.mxu0 %vm31_vm0, %v26_v1  ;;  %v23_v4 = vld [vmem:[%s231_s0 + $0x8] sm:$0xff]  ;;  %v22_v5 = vld [vmem:[%s231_s0] sm:$0xff]  ;;  %164 = vset.pattern.permute.xlu1 %v170_v13 }
   0x3   :  { %150 = vmatprep.subr.mxu0 %v168_v0  ;;  %v21_v6 = vld [vmem:[%s232_s1] sm:$0xff]  ;;  %165 = vset.pattern.permute.xlu0 %v170_v13 }
   0x4   :  { %151 = vmatpush3.msra.mxu0 %v25_v2  ;;  %v113_v17 = vld [vmem:[%s233_s2] sm:$0xff] }
   0x5   :  { %152 = vmatprep.subr.mxu0 %v168_v0  ;;  %v123_v20 = vld [vmem:[%s234_s3] sm:$0xff] }
   0x6   :  { %153 = vmatpush3.msra.mxu0 %v24_v3 }
   0x7   :  { %154 = vmatprep.subr.mxu0 %v168_v0 }
   0x8   :  { %155 = vmatpush3.msra.mxu0 %v23_v4 }
   0x9   :  { %156 = vmatprep.subr.mxu0 %v168_v0 }
   0xa   :  { %157 = vmatpush3.msra.mxu0 %v22_v5 }
   0xb   :  { %159 = vmatmul.mubr.msk.f32.vlgmr.msra.gmra.mxu0 %vm27_vm2, %v21_v6 }
  0xcb   :  { %v101_v7 = vpop.f32.mrf.mxu0 }
  0xcc   :  { %105 = vadd.xlane.f32.xlu0 %v101_v7 }
  0xcd   :  { %v160_v8 = vpop.f32.mrf.mxu0 }
 0x155   :  { %v106_v9 = vpop.xlane.xlu0 %105 }
 0x156   :  { %v107_v10 = vmul.f32 0.0078125, %v106_v9 }
 0x158   :  { %v108_v11 = vsub.f32 %v101_v7, %v107_v10 }
 0x15a   :  { %v109_v12 = vmul.f32 %v108_v11, %v108_v11 }
 0x15c   :  { %110 = vadd.xlane.f32.xlu0 %v109_v12 }
 0x1e5   :  { %v111_v14 = vpop.xlane.xlu0 %110 }
 0x1e6   :  { %v112_v15 = vmul.f32 0.0078125, %v111_v14 }
 0x1e8   :  { %v114_v16 = vadd.f32 1e-05, %v112_v15 }
 0x1ea   :  { %166 = vrsqrt.f32 %v114_v16 }
 0x1f7   :  { %v167_v18 = vpop.eup %166 }
 0x1f8   :  { %v116_v19 = vmul.f32 %v167_v18, %v113_v17 }
 0x1fa   :  { %119 = vperm.xlu1 %164, %v116_v19  }
 0x1fe   :  { %126 = vperm.xlu1 %164, %v123_v20  }
 0x275   :  { %v120_v21 = vpop.permute.xlu1 %119 }
 0x276   :  { %v122_v22 = vmul.f32 %v120_v21, %v108_v11 }
 0x279   :  { %v127_v24 = vpop.permute.xlu1 %126 }
 0x27a   :  { %v129_v25 = vadd.f32 %v127_v24, %v122_v22 }
 0x27c   :  { %vm131_vm3 = vcmp.ge.f32.partialorder %v129_v25, 0.0  ;;  %v133_v26 = vmul.f32 %v132_v23, %v129_v25 }
 0x27e   :  { %v134_v27 = vsel %vm131_vm3, %v129_v25, %v133_v26 }
 0x27f   :  { %135 = vst [vmem:[%s236_s5] sm:$0xff] %v134_v27 }

// kernel: unet5_forward.12
= control target key start
LH: loop header
LB: loop body
LE: loop exit
PB: predicated region body
PF: predicated region fallthrough
CT: control target
= control target key end

     0   :  { %vm32_vm0 = vcmask 588800   ;;  %vm114_vm1 = vcmask 261120   ;;  %v224_v25 = vmov 0   ;;  %s317_s0 = inlined_call_operand.vmem [shape: f32[72,32], index: 0, kind: input, shape index: {}]   ;;  %s318_s1 = inlined_call_operand.vmem [shape: f32[16,72], index: 1, kind: input, shape index: {}]   ;;  %s319_s2 = inlined_call_operand.vmem [shape: f32[16,1], index: 2, kind: input, shape index: {}]   ;;  %s320_s3 = inlined_call_operand.vmem [shape: f32[16,1], index: 3, kind: input, shape index: {}]   ;;  %s321_s4 = inlined_call_operand.<no memory space> [shape: f32[1], index: 4, kind: input, shape index: {}]   ;;  %s322_s5 = inlined_call_operand.vmem [shape: f32[16,32], index: 5, kind: output, shape index: {}]  }
   0x1   :  { %v31_v0 = vld [vmem:[%s317_s0 + $0x40] sm:$0xff]  ;;  %v30_v1 = vld [vmem:[%s317_s0 + $0x38] sm:$0xff]  ;;  %v29_v2 = vld [vmem:[%s317_s0 + $0x30] sm:$0xff]  ;;  %218 = vset.pattern.permute.xlu0 %v224_v25  ;;  %219 = vset.pattern.permute.xlu1 %v224_v25  ;;  %v172_v43 = vstv %s321_s4 }
   0x2   :  { %196 = vmatprep.subr.mxu0 %v31_v0  ;;  %v21_v3 = vld [vmem:[%s318_s1] sm:$0xff]  ;;  %v28_v4 = vld [vmem:[%s317_s0 + $0x28] sm:$0xff]  ;;  %v26_v6 = vld [vmem:[%s317_s0 + $0x18] sm:$0xff] }
   0x3   :  { %197 = vmatpush3.msra.mxu0 %v31_v0  ;;  %214 = vmatprep.mubr.msk.f32.mxu0 %vm32_vm0, %v21_v3  ;;  %v27_v5 = vld [vmem:[%s317_s0 + $0x20] sm:$0xff]  ;;  %v25_v7 = vld [vmem:[%s317_s0 + $0x10] sm:$0xff]  ;;  %v24_v8 = vld [vmem:[%s317_s0 + $0x8] sm:$0xff] }
   0x4   :  { %198 = vmatprep.subr.mxu0 %v30_v1  ;;  %v23_v9 = vld [vmem:[%s317_s0] sm:$0xff]  ;;  %v22_v10 = vld [vmem:[%s318_s1 + $0x8] sm:$0xff] }
   0x5   :  { %199 = vmatpush3.msra.mxu0 %v30_v1  ;;  %v135_v32 = vld [vmem:[%s319_s2] sm:$0xff]  ;;  %v136_v35 = vld [vmem:[%s319_s2 + $0x8] sm:$0xff] }
   0x6   :  { %200 = vmatprep.subr.mxu0 %v29_v2  ;;  %v155_v38 = vld [vmem:[%s320_s3] sm:$0xff]  ;;  %v156_v39 = vld [vmem:[%s320_s3 + $0x8] sm:$0xff] }
   0x7   :  { %201 = vmatpush3.msra.mxu0 %v29_v2 }
   0x8   :  { %202 = vmatprep.subr.mxu0 %v28_v4 }
   0x9   :  { %203 = vmatpush3.msra.mxu0 %v28_v4 }
   0xa   :  { %204 = vmatprep.subr.mxu0 %v27_v5 }
   0xb   :  { %205 = vmatpush3.msra.mxu0 %v27_v5 }
   0xc   :  { %206 = vmatprep.subr.mxu0 %v26_v6 }
   0xd   :  { %207 = vmatpush3.msra.mxu0 %v26_v6 }
   0xe   :  { %208 = vmatprep.subr.mxu0 %v25_v7 }
   0xf   :  { %209 = vmatpush3.msra.mxu0 %v25_v7 }
  0x10   :  { %210 = vmatprep.subr.mxu0 %v24_v8 }
  0x11   :  { %211 = vmatpush3.msra.mxu0 %v24_v8 }
  0x12   :  { %212 = vmatprep.subr.mxu0 %v23_v9 }
  0x13   :  { %213 = vmatpush3.msra.mxu0 %v23_v9 }
  0x14   :  { %215 = vmatmul.mubr.msk.f32.vlgmr.msra.gmra.mxu0 %vm32_vm0, %v22_v10 }
  0xd4   :  { %v216_v11 = vpop.f32.mrf.mxu0 }
  0xd5   :  { %v118_v14 = vsel %vm114_vm1, %v216_v11, 0.0 }
  0xd6   :  { %v105_v12 = vpop.f32.mrf.mxu0 }
  0xd7   :  { %v115_v13 = vsel %vm114_vm1, %v105_v12, 0.0 }
  0xd8   :  { %116 = vadd.xlane.f32.xlu0 %v115_v13 }
  0xdc   :  { %119 = vadd.xlane.f32.xlu0 %v118_v14 }
 0x161   :  { %v117_v15 = vpop.xlane.xlu0 %116 }
 0x162   :  { %v121_v16 = vmul.f32 0.03125, %v117_v15 }
 0x164   :  { %v123_v17 = vsub.f32 %v105_v12, %v121_v16 }
 0x165   :  { %v120_v18 = vpop.xlane.xlu0 %119 }
 0x166   :  { %v122_v19 = vmul.f32 0.03125, %v120_v18  ;;  %v125_v20 = vmul.f32 %v123_v17, %v123_v17 }
 0x168   :  { %v124_v21 = vsub.f32 %v216_v11, %v122_v19  ;;  %v127_v22 = vsel %vm114_vm1, %v125_v20, 0.0 }
 0x169   :  { %128 = vadd.xlane.f32.xlu1 %v127_v22 }
 0x16a   :  { %v126_v23 = vmul.f32 %v124_v21, %v124_v21 }
 0x16c   :  { %v130_v24 = vsel %vm114_vm1, %v126_v23, 0.0 }
 0x16d   :  { %131 = vadd.xlane.f32.xlu1 %v130_v24 }
 0x1f2   :  { %v129_v26 = vpop.xlane.xlu1 %128 }
 0x1f3   :  { %v133_v27 = vmul.f32 0.03125, %v129_v26 }
 0x1f5   :  { %v137_v28 = vadd.f32 1e-05, %v133_v27 }
 0x1f6   :  { %v132_v29 = vpop.xlane.xlu1 %131 }
 0x1f7   :  { %220 = vrsqrt.f32 %v137_v28  ;;  %v134_v30 = vmul.f32 0.03125, %v132_v29 }
 0x1f9   :  { %v138_v31 = vadd.f32 1e-05, %v134_v30 }
 0x1fb   :  { %222 = vrsqrt.f32 %v138_v31 }
 0x204   :  { %v221_v33 = vpop.eup %220 }
 0x205   :  { %v141_v34 = vmul.f32 %v221_v33, %v135_v32 }
 0x207   :  { %145 = vperm.xlu0 %218, %v141_v34  }
 0x208   :  { %v223_v36 = vpop.eup %222 }
 0x209   :  { %v142_v37 = vmul.f32 %v223_v36, %v136_v35 }
 0x20b   :  { %150 = vperm.xlu1 %219, %v142_v37  }
 0x20f   :  { %159 = vperm.xlu1 %219, %v155_v38  }
 0x213   :  { %164 = vperm.xlu1 %219, %v156_v39  }
 0x282   :  { %v146_v40 = vpop.permute.xlu0 %145 }
 0x283   :  { %v153_v42 = vmul.f32 %v146_v40, %v123_v17 }
 0x286   :  { %v151_v41 = vpop.permute.xlu1 %150 }
 0x287   :  { %v154_v46 = vmul.f32 %v151_v41, %v124_v21 }
 0x28a   :  { %v160_v44 = vpop.permute.xlu1 %159 }
 0x28b   :  { %v167_v45 = vadd.f32 %v160_v44, %v153_v42 }
 0x28d   :  { %vm170_vm2 = vcmp.ge.f32.partialorder %v167_v45, 0.0  ;;  %v173_v47 = vmul.f32 %v172_v43, %v167_v45 }
 0x28e   :  { %v165_v48 = vpop.permute.xlu1 %164 }
 0x28f   :  { %v175_v49 = vsel %vm170_vm2, %v167_v45, %v173_v47  ;;  %v168_v50 = vadd.f32 %v165_v48, %v154_v46 }
 0x290   :  { %177 = vst.msk [vmem:[%s322_s5] sm:$0xff] %vm114_vm1, %v175_v49 }
 0x291   :  { %vm171_vm3 = vcmp.ge.f32.partialorder %v168_v50, 0.0  ;;  %v174_v51 = vmul.f32 %v172_v43, %v168_v50 }
 0x293   :  { %v176_v52 = vsel %vm171_vm3, %v168_v50, %v174_v51 }
 0x294   :  { %178 = vst.msk [vmem:[%s322_s5 + $0x8] sm:$0xff] %vm114_vm1, %v176_v52 }

// kernel: unet5_forward.13
= control target key start
LH: loop header
LB: loop body
LE: loop exit
PB: predicated region body
PF: predicated region fallthrough
CT: control target
= control target key end

     0   :  { %v328_v0 = vmov 0.0   ;;  %vm47_vm0 = vcmask 130048   ;;  %vm145_vm1 = vcmask 64512   ;;  %v329_v59 = vmov 0   ;;  %s545_s0 = inlined_call_operand.vmem [shape: f32[144,8], index: 0, kind: input, shape index: {}]   ;;  %s546_s1 = inlined_call_operand.vmem [shape: f32[32,144], index: 1, kind: input, shape index: {}]   ;;  %s547_s3 = inlined_call_operand.vmem [shape: f32[32,1], index: 3, kind: input, shape index: {}]   ;;  %s548_s2 = inlined_call_operand.vmem [shape: f32[32,1], index: 2, kind: input, shape index: {}]   ;;  %s549_s4 = inlined_call_operand.<no memory space> [shape: f32[1], index: 4, kind: input, shape index: {}]   ;;  %s550_s5 = inlined_call_operand.vmem [shape: f32[32,8], index: 5, kind: output, shape index: {}]  }
   0x1   :  { %60 = vmatprep.subr.mxu0 %v328_v0  ;;  %280 = vmatprep.subr.mxu1 %v328_v0  ;;  %v44_v1 = vld [vmem:[%s545_s0 + $0x78] sm:$0xff]  ;;  %v43_v2 = vld [vmem:[%s545_s0 + $0x70] sm:$0xff]  ;;  %v42_v3 = vld [vmem:[%s545_s0 + $0x68] sm:$0xff] }
   0x2   :  { %61 = vmatpush1.msra.mxu0 %v44_v1  ;;  %298 = vmatpush1.msra.mxu1 %v44_v1  ;;  %v41_v4 = vld [vmem:[%s545_s0 + $0x60] sm:$0xff]  ;;  %v40_v5 = vld [vmem:[%s545_s0 + $0x58] sm:$0xff]  ;;  %v39_v6 = vld [vmem:[%s545_s0 + $0x50] sm:$0xff] }
   0x3   :  { %62 = vmatprep.subr.mxu0 %v328_v0  ;;  %281 = vmatprep.subr.mxu1 %v328_v0  ;;  %v38_v7 = vld [vmem:[%s545_s0 + $0x48] sm:$0xff]  ;;  %v37_v8 = vld [vmem:[%s545_s0 + $0x40] sm:$0xff]  ;;  %v36_v9 = vld [vmem:[%s545_s0 + $0x38] sm:$0xff] }
   0x4   :  { %63 = vmatpush1.msra.mxu0 %v43_v2  ;;  %299 = vmatpush1.msra.mxu1 %v43_v2  ;;  %v35_v10 = vld [vmem:[%s545_s0 + $0x30] sm:$0xff]  ;;  %v34_v11 = vld [vmem:[%s545_s0 + $0x28] sm:$0xff]  ;;  %v33_v12 = vld [vmem:[%s545_s0 + $0x20] sm:$0xff] }
   0x5   :  { %64 = vmatprep.subr.mxu0 %v328_v0  ;;  %282 = vmatprep.subr.mxu1 %v328_v0  ;;  %v32_v13 = vld [vmem:[%s545_s0 + $0x18] sm:$0xff]  ;;  %v31_v14 = vld [vmem:[%s545_s0 + $0x10] sm:$0xff]  ;;  %v30_v15 = vld [vmem:[%s545_s0 + $0x8] sm:$0xff] }
   0x6   :  { %65 = vmatpush1.msra.mxu0 %v42_v3  ;;  %300 = vmatpush1.msra.mxu1 %v42_v3  ;;  %v29_v16 = vld [vmem:[%s545_s0] sm:$0xff]  ;;  %v46_v17 = vld [vmem:[%s545_s0 + $0x88] sm:$0xff]  ;;  %v24_v23 = vld [vmem:[%s546_s1 + $0x18] sm:$0xff] }
   0x7   :  { %66 = vmatprep.subr.mxu0 %v328_v0  ;;  %283 = vmatprep.subr.mxu1 %v328_v0  ;;  %v45_v18 = vld [vmem:[%s545_s0 + $0x80] sm:$0xff]  ;;  %v22_v19 = vld [vmem:[%s546_s1 + $0x8] sm:$0xff]  ;;  %v28_v24 = vld [vmem:[%s546_s1 + $0x38] sm:$0xff] }
   0x8   :  { %67 = vmatpush1.msra.mxu0 %v41_v4  ;;  %301 = vmatpush1.msra.mxu1 %v41_v4  ;;  %v26_v20 = vld [vmem:[%s546_s1 + $0x28] sm:$0xff]  ;;  %v21_v21 = vld [vmem:[%s546_s1] sm:$0xff]  ;;  %v23_v25 = vld [vmem:[%s546_s1 + $0x10] sm:$0xff] }
   0x9   :  { %68 = vmatprep.subr.mxu0 %v328_v0  ;;  %284 = vmatprep.subr.mxu1 %v328_v0  ;;  %v25_v22 = vld [vmem:[%s546_s1 + $0x20] sm:$0xff]  ;;  %v27_v26 = vld [vmem:[%s546_s1 + $0x30] sm:$0xff]  ;;  %v227_v61 = vld [vmem:[%s547_s3 + $0x8] sm:$0xff] }
   0xa   :  { %69 = vmatpush1.msra.mxu0 %v40_v5  ;;  %302 = vmatpush1.msra.mxu1 %v40_v5  ;;  %v226_v60 = vld [vmem:[%s547_s3] sm:$0xff]  ;;  %v228_v62 = vld [vmem:[%s547_s3 + $0x10] sm:$0xff] }
   0xb   :  { %70 = vmatprep.subr.mxu0 %v328_v0  ;;  %285 = vmatprep.subr.mxu1 %v328_v0 }
   0xc   :  { %71 = vmatpush1.msra.mxu0 %v39_v6  ;;  %303 = vmatpush1.msra.mxu1 %v39_v6 }
   0xd   :  { %72 = vmatprep.subr.mxu0 %v328_v0  ;;  %286 = vmatprep.subr.mxu1 %v328_v0 }
   0xe   :  { %73 = vmatpush1.msra.mxu0 %v38_v7  ;;  %304 = vmatpush1.msra.mxu1 %v38_v7 }
   0xf   :  { %74 = vmatprep.subr.mxu0 %v328_v0  ;;  %287 = vmatprep.subr.mxu1 %v328_v0 }
  0x10   :  { %75 = vmatpush1.msra.mxu0 %v37_v8  ;;  %305 = vmatpush1.msra.mxu1 %v37_v8 }
  0x11   :  { %76 = vmatprep.subr.mxu0 %v328_v0  ;;  %288 = vmatprep.subr.mxu1 %v328_v0 }
  0x12   :  { %77 = vmatpush1.msra.mxu0 %v36_v9  ;;  %306 = vmatpush1.msra.mxu1 %v36_v9 }
  0x13   :  { %78 = vmatprep.subr.mxu0 %v328_v0  ;;  %289 = vmatprep.subr.mxu1 %v328_v0 }
  0x14   :  { %79 = vmatpush1.msra.mxu0 %v35_v10  ;;  %307 = vmatpush1.msra.mxu1 %v35_v10 }
  0x15   :  { %80 = vmatprep.subr.mxu0 %v328_v0  ;;  %290 = vmatprep.subr.mxu1 %v328_v0 }
  0x16   :  { %81 = vmatpush1.msra.mxu0 %v34_v11  ;;  %308 = vmatpush1.msra.mxu1 %v34_v11  ;;  %v186_v11 = vld [vmem:[%s548_s2] sm:$0xff] }
  0x17   :  { %82 = vmatprep.subr.mxu0 %v328_v0  ;;  %291 = vmatprep.subr.mxu1 %v328_v0 }
  0x18   :  { %83 = vmatpush1.msra.mxu0 %v33_v12  ;;  %309 = vmatpush1.msra.mxu1 %v33_v12 }
  0x19   :  { %84 = vmatprep.subr.mxu0 %v328_v0  ;;  %292 = vmatprep.subr.mxu1 %v328_v0 }
  0x1a   :  { %85 = vmatpush1.msra.mxu0 %v32_v13  ;;  %310 = vmatpush1.msra.mxu1 %v32_v13 }
  0x1b   :  { %86 = vmatprep.subr.mxu0 %v328_v0  ;;  %293 = vmatprep.subr.mxu1 %v328_v0 }
  0x1c   :  { %87 = vmatpush1.msra.mxu0 %v31_v14  ;;  %311 = vmatpush1.msra.mxu1 %v31_v14  ;;  %v188_v14 = vld [vmem:[%s548_s2 + $0x10] sm:$0xff] }
  0x1d   :  { %88 = vmatprep.subr.mxu0 %v328_v0  ;;  %294 = vmatprep.subr.mxu1 %v328_v0 }
  0x1e   :  { %89 = vmatpush1.msra.mxu0 %v30_v15  ;;  %312 = vmatpush1.msra.mxu1 %v30_v15 }
  0x1f   :  { %90 = vmatprep.subr.mxu0 %v328_v0  ;;  %295 = vmatprep.subr.mxu1 %v328_v0 }
  0x20   :  { %91 = vmatpush1.msra.mxu0 %v29_v16  ;;  %313 = vmatpush1.msra.mxu1 %v29_v16 }
  0x21   :  { %120 = vmatprep.subr.mxu0 %v328_v0  ;;  %296 = vmatprep.subr.mxu1 %v328_v0 }
  0x22   :  { %121 = vmatpush2.msra.mxu0 %v46_v17  ;;  %314 = vmatpush2.msra.mxu1 %v46_v17 }
  0x23   :  { %122 = vmatprep.subr.mxu0 %v328_v0  ;;  %297 = vmatprep.subr.mxu1 %v328_v0 }
  0x24   :  { %123 = vmatpush2.msra.mxu0 %v45_v18  ;;  %315 = vmatpush2.msra.mxu1 %v45_v18  ;;  %v187_v18 = vld [vmem:[%s548_s2 + $0x8] sm:$0xff] }
  0x25   :  { %276 = vmatprep.mubr.msk.f32.mxu0 %vm47_vm0, %v22_v19  ;;  %278 = vmatprep.mubr.msk.f32.mxu1 %vm47_vm0, %v26_v20 }
  0x26   :  { %125 = vmatmul.mubr.f32.vlgmr.msra.gmra.mxu0 %v21_v21  ;;  %135 = vmatmul.mubr.f32.vlgmr.msra.gmra.mxu1 %v25_v22  ;;  %v189_v21 = vld [vmem:[%s548_s2 + $0x18] sm:$0xff] }
  0x27   :  { %277 = vmatprep.mubr.msk.f32.mxu0 %vm47_vm0, %v24_v23  ;;  %279 = vmatprep.mubr.msk.f32.mxu1 %vm47_vm0, %v28_v24  ;;  %v229_v23 = vld [vmem:[%s547_s3 + $0x18] sm:$0xff] }
  0x28   :  { %319 = vset.pattern.permute.xlu1 %v329_v59  ;;  %318 = vset.pattern.permute.xlu0 %v329_v59 }
  0x2a   :  { %130 = vmatmul.mubr.f32.gmra.mxu0 %v23_v25  ;;  %140 = vmatmul.mubr.f32.gmra.mxu1 %v27_v26 }
  0xe6   :  { %v126_v27 = vpop.f32.mrf.mxu0  ;;  %v136_v28 = vpop.f32.mrf.mxu1 }
  0xe7   :  { %v152_v29 = vsel %vm145_vm1, %v136_v28, 0.0  ;;  %v146_v30 = vsel %vm145_vm1, %v126_v27, 0.0 }
  0xe8   :  { %153 = vadd.xlane.f32.xlu1 %v152_v29  ;;  %v138_v31 = vpop.f32.mrf.mxu1  ;;  %147 = vadd.xlane.f32.xlu0 %v146_v30  ;;  %v128_v32 = vpop.f32.mrf.mxu0  ;;  %v259_v29 = vstv %s549_s4 }
  0xea   :  { %v131_v33 = vpop.f32.mrf.mxu0  ;;  %v141_v34 = vpop.f32.mrf.mxu1 }
  0xeb   :  { %v155_v35 = vsel %vm145_vm1, %v141_v34, 0.0  ;;  %v149_v36 = vsel %vm145_vm1, %v131_v33, 0.0 }
  0xec   :  { %156 = vadd.xlane.f32.xlu1 %v155_v35  ;;  %150 = vadd.xlane.f32.xlu0 %v149_v36  ;;  %v133_v37 = vpop.f32.mrf.mxu0  ;;  %v143_v38 = vpop.f32.mrf.mxu1 }
 0x171   :  { %v154_v39 = vpop.xlane.xlu1 %153  ;;  %v148_v40 = vpop.xlane.xlu0 %147 }
 0x172   :  { %v160_v41 = vmul.f32 0.125, %v154_v39  ;;  %v158_v42 = vmul.f32 0.125, %v148_v40 }
 0x174   :  { %v478_v43 = vsub.f32 %v136_v28, %v160_v41  ;;  %v480_v44 = vsub.f32 %v126_v27, %v158_v42 }
 0x175   :  { %v157_v45 = vpop.xlane.xlu1 %156  ;;  %v151_v46 = vpop.xlane.xlu0 %150 }
 0x176   :  { %v161_v47 = vmul.f32 0.125, %v157_v45  ;;  %v159_v48 = vmul.f32 0.125, %v151_v46  ;;  %v166_v49 = vmul.f32 %v480_v44, %v480_v44  ;;  %v168_v53 = vmul.f32 %v478_v43, %v478_v43 }
 0x178   :  { %v484_v50 = vsub.f32 %v141_v34, %v161_v47  ;;  %v486_v51 = vsub.f32 %v131_v33, %v159_v48  ;;  %v170_v52 = vsel %vm145_vm1, %v166_v49, 0.0  ;;  %v176_v55 = vsel %vm145_vm1, %v168_v53, 0.0 }
 0x179   :  { %171 = vadd.xlane.f32.xlu0 %v170_v52 }
 0x17a   :  { %v167_v54 = vmul.f32 %v486_v51, %v486_v51  ;;  %v169_v57 = vmul.f32 %v484_v50, %v484_v50 }
 0x17c   :  { %v173_v56 = vsel %vm145_vm1, %v167_v54, 0.0  ;;  %v179_v58 = vsel %vm145_vm1, %v169_v57, 0.0 }
 0x17d   :  { %177 = vadd.xlane.f32.xlu0 %v176_v55  ;;  %174 = vadd.xlane.f32.xlu1 %v173_v56 }
 0x181   :  { %180 = vadd.xlane.f32.xlu1 %v179_v58 }
 0x192   :  { %232 = vperm.xlu1 %319, %v226_v60  }
 0x196   :  { %237 = vperm.xlu1 %319, %v227_v61  }
 0x19a   :  { %242 = vperm.xlu1 %319, %v228_v62  }
 0x202   :  { %v172_v63 = vpop.xlane.xlu0 %171 }
 0x203   :  { %v182_v0 = vmul.f32 0.125, %v172_v63 }
 0x205   :  { %v190_v1 = vadd.f32 1e-05, %v182_v0 }
 0x206   :  { %v175_v2 = vpop.xlane.xlu1 %174  ;;  %v178_v3 = vpop.xlane.xlu0 %177 }
 0x207   :  { %320 = vrsqrt.f32 %v190_v1  ;;  %v183_v4 = vmul.f32 0.125, %v175_v2  ;;  %v184_v5 = vmul.f32 0.125, %v178_v3 }
 0x209   :  { %v192_v6 = vadd.f32 1e-05, %v184_v5  ;;  %v191_v7 = vadd.f32 1e-05, %v183_v4 }
 0x20a   :  { %v181_v8 = vpop.xlane.xlu1 %180 }
 0x20b   :  { %v185_v9 = vmul.f32 0.125, %v181_v8  ;;  %322 = vrsqrt.f32 %v192_v6 }
 0x20c   :  { %324 = vrsqrt.f32 %v191_v7 }
 0x20d   :  { %v193_v10 = vadd.f32 1e-05, %v185_v9 }
 0x20e   :  { %v233_v24 = vpop.permute.xlu1 %232 }
 0x20f   :  { %326 = vrsqrt.f32 %v193_v10 }
 0x212   :  { %v238_v25 = vpop.permute.xlu1 %237 }
 0x214   :  { %v321_v12 = vpop.eup %320 }
 0x215   :  { %v198_v13 = vmul.f32 %v321_v12, %v186_v11 }
 0x216   :  { %v243_v27 = vpop.permute.xlu1 %242 }
 0x217   :  { %204 = vperm.xlu0 %318, %v198_v13  }
 0x218   :  { %v323_v15 = vpop.eup %322 }
 0x219   :  { %v200_v16 = vmul.f32 %v323_v15, %v188_v14  ;;  %v325_v17 = vpop.eup %324 }
 0x21a   :  { %v199_v19 = vmul.f32 %v325_v17, %v187_v18 }
 0x21b   :  { %214 = vperm.xlu1 %319, %v200_v16  }
 0x21c   :  { %v327_v20 = vpop.eup %326 }
 0x21d   :  { %v201_v22 = vmul.f32 %v327_v20, %v189_v21 }
 0x21f   :  { %209 = vperm.xlu1 %319, %v199_v19  }
 0x223   :  { %219 = vperm.xlu1 %319, %v201_v22  }
 0x227   :  { %247 = vperm.xlu1 %319, %v229_v23  }
 0x292   :  { %v205_v26 = vpop.permute.xlu0 %204 }
 0x293   :  { %v222_v28 = vmul.f32 %v205_v26, %v480_v44 }
 0x295   :  { %v250_v30 = vadd.f32 %v233_v24, %v222_v28 }
 0x296   :  { %v215_v32 = vpop.permute.xlu1 %214 }
 0x297   :  { %vm255_vm2 = vcmp.ge.f32.partialorder %v250_v30, 0.0  ;;  %v260_v31 = vmul.f32 %v259_v29, %v250_v30  ;;  %v224_v33 = vmul.f32 %v215_v32, %v478_v43 }
 0x299   :  { %v264_v34 = vsel %vm255_vm2, %v250_v30, %v260_v31  ;;  %v252_v35 = vadd.f32 %v243_v27, %v224_v33 }
 0x29a   :  { %268 = vst.msk [vmem:[%s550_s5] sm:$0xff] %vm145_vm1, %v264_v34  ;;  %v210_v36 = vpop.permute.xlu1 %209 }
 0x29b   :  { %vm257_vm3 = vcmp.ge.f32.partialorder %v252_v35, 0.0  ;;  %v262_v37 = vmul.f32 %v259_v29, %v252_v35  ;;  %v223_v38 = vmul.f32 %v210_v36, %v486_v51 }
 0x29d   :  { %v266_v39 = vsel %vm257_vm3, %v252_v35, %v262_v37  ;;  %v251_v40 = vadd.f32 %v238_v25, %v223_v38 }
 0x29e   :  { %270 = vst.msk [vmem:[%s550_s5 + $0x10] sm:$0xff] %vm145_vm1, %v266_v39  ;;  %v220_v41 = vpop.permute.xlu1 %219 }
 0x29f   :  { %vm256_vm4 = vcmp.ge.f32.partialorder %v251_v40, 0.0  ;;  %v261_v42 = vmul.f32 %v259_v29, %v251_v40  ;;  %v225_v44 = vmul.f32 %v220_v41, %v484_v50 }
 0x2a1   :  { %v265_v43 = vsel %vm256_vm4, %v251_v40, %v261_v42 }
 0x2a2   :  { %269 = vst.msk [vmem:[%s550_s5 + $0x8] sm:$0xff] %vm145_vm1, %v265_v43  ;;  %v248_v45 = vpop.permute.xlu1 %247 }
 0x2a3   :  { %v253_v46 = vadd.f32 %v248_v45, %v225_v44 }
 0x2a5   :  { %vm258_vm5 = vcmp.ge.f32.partialorder %v253_v46, 0.0  ;;  %v263_v47 = vmul.f32 %v259_v29, %v253_v46 }
 0x2a7   :  { %v267_v48 = vsel %vm258_vm5, %v253_v46, %v263_v47 }
 0x2a8   :  { %271 = vst.msk [vmem:[%s550_s5 + $0x18] sm:$0xff] %vm145_vm1, %v267_v48 }

// kernel: unet5_forward.14
= control target key start
LH: loop header
LB: loop body
LE: loop exit
PB: predicated region body
PF: predicated region fallthrough
CT: control target
= control target key end

     0   :  { %vm81_vm0 = vcmask 261120   ;;  %vm316_vm1 = vcmask 15360   ;;  %s1076_s0 = inlined_call_operand.vmem [shape: f32[288,2], index: 0, kind: input, shape index: {}]   ;;  %s1077_s1 = inlined_call_operand.vmem [shape: f32[64,288], index: 1, kind: input, shape index: {}]   ;;  %s1078_s3 = inlined_call_operand.vmem [shape: f32[64,1], index: 3, kind: input, shape index: {}]   ;;  %s1079_s2 = inlined_call_operand.vmem [shape: f32[64,1], index: 2, kind: input, shape index: {}]   ;;  %s1080_s4 = inlined_call_operand.<no memory space> [shape: f32[1], index: 4, kind: input, shape index: {}]   ;;  %s1081_s5 = inlined_call_operand.vmem [shape: f32[64,2], index: 5, kind: output, shape index: {}]  }
   0x1   :  { %v76_v0 = vld [vmem:[%s1076_s0 + $0xf8] sm:$0xff]  ;;  %v75_v2 = vld [vmem:[%s1076_s0 + $0xf0] sm:$0xff]  ;;  %v74_v4 = vld [vmem:[%s1076_s0 + $0xe8] sm:$0xff] }
   0x2   :  { %v60_v1 = vld [vmem:[%s1076_s0 + $0x78] sm:$0xff]  ;;  %579 = vmatprep.subr.mxu0 %v76_v0  ;;  %667 = vmatprep.subr.mxu1 %v76_v0  ;;  %v59_v3 = vld [vmem:[%s1076_s0 + $0x70] sm:$0xff]  ;;  %v58_v5 = vld [vmem:[%s1076_s0 + $0x68] sm:$0xff] }
   0x3   :  { %580 = vmatpush3.msra.mxu0 %v60_v1  ;;  %683 = vmatpush3.msra.mxu1 %v60_v1  ;;  %v73_v6 = vld [vmem:[%s1076_s0 + $0xe0] sm:$0xff]  ;;  %v72_v8 = vld [vmem:[%s1076_s0 + $0xd8] sm:$0xff]  ;;  %v71_v10 = vld [vmem:[%s1076_s0 + $0xd0] sm:$0xff] }
   0x4   :  { %581 = vmatprep.subr.mxu0 %v75_v2  ;;  %668 = vmatprep.subr.mxu1 %v75_v2  ;;  %v57_v7 = vld [vmem:[%s1076_s0 + $0x60] sm:$0xff]  ;;  %v56_v9 = vld [vmem:[%s1076_s0 + $0x58] sm:$0xff]  ;;  %v55_v11 = vld [vmem:[%s1076_s0 + $0x50] sm:$0xff] }
   0x5   :  { %582 = vmatpush3.msra.mxu0 %v59_v3  ;;  %684 = vmatpush3.msra.mxu1 %v59_v3  ;;  %v70_v12 = vld [vmem:[%s1076_s0 + $0xc8] sm:$0xff]  ;;  %v69_v14 = vld [vmem:[%s1076_s0 + $0xc0] sm:$0xff]  ;;  %v68_v16 = vld [vmem:[%s1076_s0 + $0xb8] sm:$0xff] }
   0x6   :  { %583 = vmatprep.subr.mxu0 %v74_v4  ;;  %669 = vmatprep.subr.mxu1 %v74_v4  ;;  %v54_v13 = vld [vmem:[%s1076_s0 + $0x48] sm:$0xff]  ;;  %v53_v15 = vld [vmem:[%s1076_s0 + $0x40] sm:$0xff]  ;;  %v52_v17 = vld [vmem:[%s1076_s0 + $0x38] sm:$0xff] }
   0x7   :  { %584 = vmatpush3.msra.mxu0 %v58_v5  ;;  %685 = vmatpush3.msra.mxu1 %v58_v5  ;;  %v67_v18 = vld [vmem:[%s1076_s0 + $0xb0] sm:$0xff]  ;;  %v66_v20 = vld [vmem:[%s1076_s0 + $0xa8] sm:$0xff]  ;;  %v65_v22 = vld [vmem:[%s1076_s0 + $0xa0] sm:$0xff] }
   0x8   :  { %585 = vmatprep.subr.mxu0 %v73_v6  ;;  %670 = vmatprep.subr.mxu1 %v73_v6  ;;  %v51_v19 = vld [vmem:[%s1076_s0 + $0x30] sm:$0xff]  ;;  %v50_v21 = vld [vmem:[%s1076_s0 + $0x28] sm:$0xff]  ;;  %v49_v23 = vld [vmem:[%s1076_s0 + $0x20] sm:$0xff] }
   0x9   :  { %586 = vmatpush3.msra.mxu0 %v57_v7  ;;  %686 = vmatpush3.msra.mxu1 %v57_v7  ;;  %v64_v24 = vld [vmem:[%s1076_s0 + $0x98] sm:$0xff]  ;;  %v63_v26 = vld [vmem:[%s1076_s0 + $0x90] sm:$0xff]  ;;  %v62_v28 = vld [vmem:[%s1076_s0 + $0x88] sm:$0xff] }
   0xa   :  { %587 = vmatprep.subr.mxu0 %v72_v8  ;;  %671 = vmatprep.subr.mxu1 %v72_v8  ;;  %v48_v25 = vld [vmem:[%s1076_s0 + $0x18] sm:$0xff]  ;;  %v47_v27 = vld [vmem:[%s1076_s0 + $0x10] sm:$0xff]  ;;  %v46_v29 = vld [vmem:[%s1076_s0 + $0x8] sm:$0xff] }
   0xb   :  { %588 = vmatpush3.msra.mxu0 %v56_v9  ;;  %687 = vmatpush3.msra.mxu1 %v56_v9  ;;  %v61_v30 = vld [vmem:[%s1076_s0 + $0x80] sm:$0xff]  ;;  %v22_v32 = vld [vmem:[%s1077_s1 + $0x8] sm:$0xff]  ;;  %v40_v33 = vld [vmem:[%s1077_s1 + $0x98] sm:$0xff] }
   0xc   :  { %589 = vmatprep.subr.mxu0 %v71_v10  ;;  %672 = vmatprep.subr.mxu1 %v71_v10  ;;  %v45_v31 = vld [vmem:[%s1076_s0] sm:$0xff]  ;;  %v39_v35 = vld [vmem:[%s1077_s1 + $0x90] sm:$0xff]  ;;  %v80_v36 = vld [vmem:[%s1076_s0 + $0x118] sm:$0xff] }
   0xd   :  { %590 = vmatpush3.msra.mxu0 %v55_v11  ;;  %688 = vmatpush3.msra.mxu1 %v55_v11  ;;  %v21_v34 = vld [vmem:[%s1077_s1] sm:$0xff]  ;;  %v43_v38 = vld [vmem:[%s1077_s1 + $0xb0] sm:$0xff]  ;;  %v24_v40 = vld [vmem:[%s1077_s1 + $0x18] sm:$0xff] }
   0xe   :  { %591 = vmatprep.subr.mxu0 %v70_v12  ;;  %673 = vmatprep.subr.mxu1 %v70_v12  ;;  %v25_v37 = vld [vmem:[%s1077_s1 + $0x20] sm:$0xff]  ;;  %v79_v39 = vld [vmem:[%s1076_s0 + $0x110] sm:$0xff]  ;;  %v42_v41 = vld [vmem:[%s1077_s1 + $0xa8] sm:$0xff] }
   0xf   :  { %592 = vmatpush3.msra.mxu0 %v54_v13  ;;  %689 = vmatpush3.msra.mxu1 %v54_v13  ;;  %v78_v42 = vld [vmem:[%s1076_s0 + $0x108] sm:$0xff]  ;;  %v28_v43 = vld [vmem:[%s1077_s1 + $0x38] sm:$0xff]  ;;  %v77_v44 = vld [vmem:[%s1076_s0 + $0x100] sm:$0xff] }
  0x10   :  { %593 = vmatprep.subr.mxu0 %v69_v14  ;;  %674 = vmatprep.subr.mxu1 %v69_v14  ;;  %v23_v45 = vld [vmem:[%s1077_s1 + $0x10] sm:$0xff]  ;;  %v26_v47 = vld [vmem:[%s1077_s1 + $0x28] sm:$0xff]  ;;  %v29_v49 = vld [vmem:[%s1077_s1 + $0x40] sm:$0xff] }
  0x11   :  { %594 = vmatpush3.msra.mxu0 %v53_v15  ;;  %690 = vmatpush3.msra.mxu1 %v53_v15  ;;  %v27_v46 = vld [vmem:[%s1077_s1 + $0x30] sm:$0xff]  ;;  %v30_v50 = vld [vmem:[%s1077_s1 + $0x48] sm:$0xff]  ;;  %v32_v51 = vld [vmem:[%s1077_s1 + $0x58] sm:$0xff] }
  0x12   :  { %595 = vmatprep.subr.mxu0 %v68_v16  ;;  %675 = vmatprep.subr.mxu1 %v68_v16  ;;  %v31_v48 = vld [vmem:[%s1077_s1 + $0x50] sm:$0xff]  ;;  %v34_v52 = vld [vmem:[%s1077_s1 + $0x68] sm:$0xff]  ;;  %v33_v54 = vld [vmem:[%s1077_s1 + $0x60] sm:$0xff] }
  0x13   :  { %596 = vmatpush3.msra.mxu0 %v52_v17  ;;  %691 = vmatpush3.msra.mxu1 %v52_v17  ;;  %v35_v53 = vld [vmem:[%s1077_s1 + $0x70] sm:$0xff]  ;;  %v38_v55 = vld [vmem:[%s1077_s1 + $0x88] sm:$0xff]  ;;  %v37_v56 = vld [vmem:[%s1077_s1 + $0x80] sm:$0xff] }
  0x14   :  { %597 = vmatprep.subr.mxu0 %v67_v18  ;;  %676 = vmatprep.subr.mxu1 %v67_v18  ;;  %v41_v57 = vld [vmem:[%s1077_s1 + $0xa0] sm:$0xff]  ;;  %v36_v58 = vld [vmem:[%s1077_s1 + $0x78] sm:$0xff] }
  0x15   :  { %598 = vmatpush3.msra.mxu0 %v51_v19  ;;  %692 = vmatpush3.msra.mxu1 %v51_v19  ;;  %v44_v59 = vld [vmem:[%s1077_s1 + $0xb8] sm:$0xff] }
  0x16   :  { %599 = vmatprep.subr.mxu0 %v66_v20  ;;  %677 = vmatprep.subr.mxu1 %v66_v20 }
  0x17   :  { %600 = vmatpush3.msra.mxu0 %v50_v21  ;;  %693 = vmatpush3.msra.mxu1 %v50_v21 }
  0x18   :  { %601 = vmatprep.subr.mxu0 %v65_v22  ;;  %678 = vmatprep.subr.mxu1 %v65_v22 }
  0x19   :  { %602 = vmatpush3.msra.mxu0 %v49_v23  ;;  %694 = vmatpush3.msra.mxu1 %v49_v23 }
  0x1a   :  { %603 = vmatprep.subr.mxu0 %v64_v24  ;;  %679 = vmatprep.subr.mxu1 %v64_v24 }
  0x1b   :  { %604 = vmatpush3.msra.mxu0 %v48_v25  ;;  %695 = vmatpush3.msra.mxu1 %v48_v25 }
  0x1c   :  { %605 = vmatprep.subr.mxu0 %v63_v26  ;;  %680 = vmatprep.subr.mxu1 %v63_v26 }
  0x1d   :  { %606 = vmatpush3.msra.mxu0 %v47_v27  ;;  %696 = vmatpush3.msra.mxu1 %v47_v27 }
  0x1e   :  { %607 = vmatprep.subr.mxu0 %v62_v28  ;;  %681 = vmatprep.subr.mxu1 %v62_v28 }
  0x1f   :  { %608 = vmatpush3.msra.mxu0 %v46_v29  ;;  %697 = vmatpush3.msra.mxu1 %v46_v29 }
  0x20   :  { %609 = vmatprep.subr.mxu0 %v61_v30  ;;  %682 = vmatprep.subr.mxu1 %v61_v30 }
  0x21   :  { %610 = vmatpush3.msra.mxu0 %v45_v31  ;;  %698 = vmatpush3.msra.mxu1 %v45_v31 }
  0x22   :  { %170 = vmatprep.mubr.f32.mxu0 %v22_v32  ;;  %200 = vmatprep.mubr.f32.mxu1 %v40_v33 }
  0x23   :  { %171 = vmatmul.mubr.f32.vlgmr.msra.gmra.mxu0 %v21_v34  ;;  %201 = vmatmul.mubr.f32.vlgmr.msra.gmra.mxu1 %v39_v35 }
  0x24   :  { %647 = vmatprep.subr.mxu1 %v80_v36  ;;  %175 = vmatprep.mubr.f32.mxu0 %v25_v37 }
  0x25   :  { %648 = vmatpush3.msra.mxu1 %v80_v36  ;;  %205 = vmatprep.mubr.f32.mxu1 %v43_v38 }
  0x26   :  { %649 = vmatprep.subr.mxu1 %v79_v39 }
  0x27   :  { %650 = vmatpush3.msra.mxu1 %v79_v39  ;;  %176 = vmatmul.mubr.f32.gmra.mxu0 %v24_v40 }
  0x28   :  { %206 = vmatmul.mubr.f32.gmra.mxu1 %v42_v41  ;;  %651 = vmatprep.subr.mxu1 %v78_v42 }
  0x29   :  { %652 = vmatpush3.msra.mxu1 %v78_v42  ;;  %180 = vmatprep.mubr.f32.mxu0 %v28_v43 }
  0x2a   :  { %653 = vmatprep.subr.mxu1 %v77_v44  ;;  %655 = vmatprep.mubr.msk.f32.mxu1 %vm81_vm0, %v23_v45 }
  0x2b   :  { %654 = vmatpush3.msra.mxu1 %v77_v44  ;;  %181 = vmatmul.mubr.f32.gmra.mxu0 %v27_v46 }
  0x2c   :  { %656 = vmatmul.mubr.msk.f32.vlgmr.msra.gmra.mxu1 %vm81_vm0, %v26_v47  ;;  %185 = vmatprep.mubr.f32.mxu0 %v31_v48 }
  0x2d   :  { %658 = vmatprep.mubr.msk.f32.mxu1 %vm81_vm0, %v29_v49 }
  0x2f   :  { %186 = vmatmul.mubr.f32.gmra.mxu0 %v30_v50 }
  0x30   :  { %659 = vmatmul.mubr.msk.f32.gmra.mxu1 %vm81_vm0, %v32_v51  ;;  %190 = vmatprep.mubr.f32.mxu0 %v34_v52 }
  0x31   :  { %661 = vmatprep.mubr.msk.f32.mxu1 %vm81_vm0, %v35_v53 }
  0x33   :  { %191 = vmatmul.mubr.f32.gmra.mxu0 %v33_v54 }
  0x34   :  { %662 = vmatmul.mubr.msk.f32.gmra.mxu1 %vm81_vm0, %v38_v55  ;;  %195 = vmatprep.mubr.f32.mxu0 %v37_v56 }
  0x35   :  { %664 = vmatprep.mubr.msk.f32.mxu1 %vm81_vm0, %v41_v57 }
  0x37   :  { %196 = vmatmul.mubr.f32.gmra.mxu0 %v36_v58 }
  0x38   :  { %665 = vmatmul.mubr.msk.f32.gmra.mxu1 %vm81_vm0, %v44_v59 }
  0xe3   :  { %v611_v60 = vpop.f32.mrf.mxu0  ;;  %v629_v61 = vpop.f32.mrf.mxu1 }
  0xe5   :  { %v612_v62 = vpop.f32.mrf.mxu0  ;;  %v630_v63 = vpop.f32.mrf.mxu1 }
  0xe6   :  { %v613_v7 = vadd.f32 %v612_v62, %v611_v60  ;;  %v631_v31 = vadd.f32 %v630_v63, %v629_v61 }
  0xe7   :  { %v614_v0 = vpop.f32.mrf.mxu0 }
  0xe8   :  { %v632_v1 = vpop.f32.mrf.mxu1 }
  0xe9   :  { %v615_v2 = vpop.f32.mrf.mxu0 }
  0xea   :  { %v616_v3 = vadd.f32 %v615_v2, %v614_v0  ;;  %v633_v4 = vpop.f32.mrf.mxu1 }
  0xeb   :  { %v617_v5 = vpop.f32.mrf.mxu0  ;;  %v634_v38 = vadd.f32 %v633_v4, %v632_v1 }
  0xec   :  { %v657_v6 = vpop.f32.mrf.mxu1 }
  0xed   :  { %v283_v8 = vadd.f32 %v657_v6, %v616_v3  ;;  %v618_v9 = vpop.f32.mrf.mxu0 }
  0xee   :  { %v277_v10 = vpop.f32.mrf.mxu1  ;;  %v619_v15 = vadd.f32 %v618_v9, %v617_v5 }
  0xef   :  { %v278_v11 = vadd.f32 %v613_v7, %v277_v10  ;;  %v620_v12 = vpop.f32.mrf.mxu0  ;;  %v320_v13 = vsel %vm316_vm1, %v283_v8, 0.0 }
  0xf0   :  { %v660_v14 = vpop.f32.mrf.mxu1  ;;  %321 = vadd.xlane.f32.xlu0 %v320_v13 }
  0xf1   :  { %v621_v16 = vpop.f32.mrf.mxu0  ;;  %v317_v21 = vsel %vm316_vm1, %v278_v11, 0.0 }
  0xf2   :  { %v622_v17 = vadd.f32 %v621_v16, %v620_v12  ;;  %v287_v18 = vpop.f32.mrf.mxu1 }
  0xf3   :  { %v288_v19 = vadd.f32 %v619_v15, %v287_v18  ;;  %v623_v20 = vpop.f32.mrf.mxu0  ;;  %v718_v15 = vmov 0  }
  0xf4   :  { %v663_v22 = vpop.f32.mrf.mxu1  ;;  %318 = vadd.xlane.f32.xlu0 %v317_v21  ;;  %v293_v25 = vadd.f32 %v660_v14, %v622_v17  ;;  %700 = vset.pattern.permute.xlu1 %v718_v15  ;;  %v477_v21 = vld [vmem:[%s1078_s3] sm:$0xff] }
  0xf5   :  { %v624_v23 = vpop.f32.mrf.mxu0  ;;  %v323_v24 = vsel %vm316_vm1, %v288_v19, 0.0  ;;  %701 = vset.pattern.permute.xlu0 %v718_v15 }
  0xf6   :  { %v625_v26 = vadd.f32 %v624_v23, %v623_v20  ;;  %v297_v27 = vpop.f32.mrf.mxu1  ;;  %324 = vadd.xlane.f32.xlu1 %v323_v24  ;;  %v326_v33 = vsel %vm316_vm1, %v293_v25, 0.0  ;;  %v479_v23 = vld [vmem:[%s1078_s3 + $0x10] sm:$0xff]  ;;  %v480_v24 = vld [vmem:[%s1078_s3 + $0x18] sm:$0xff] }
  0xf7   :  { %v626_v28 = vpop.f32.mrf.mxu0 }
  0xf8   :  { %v298_v29 = vadd.f32 %v625_v26, %v297_v27  ;;  %v666_v30 = vpop.f32.mrf.mxu1  ;;  %v482_v26 = vld [vmem:[%s1078_s3 + $0x28] sm:$0xff] }
  0xf9   :  { %v627_v32 = vpop.f32.mrf.mxu0  ;;  %v313_v40 = vadd.f32 %v666_v30, %v634_v38 }
  0xfa   :  { %v628_v34 = vadd.f32 %v627_v32, %v626_v28  ;;  %v307_v35 = vpop.f32.mrf.mxu1  ;;  %327 = vadd.xlane.f32.xlu1 %v326_v33  ;;  %v329_v36 = vsel %vm316_vm1, %v298_v29, 0.0 }
  0xfb   :  { %v308_v37 = vadd.f32 %v631_v31, %v307_v35  ;;  %330 = vadd.xlane.f32.xlu0 %v329_v36  ;;  %v338_v43 = vsel %vm316_vm1, %v313_v40, 0.0 }
  0xfc   :  { %v303_v39 = vadd.f32 %v663_v22, %v628_v34  ;;  %v478_v22 = vld [vmem:[%s1078_s3 + $0x8] sm:$0xff] }
  0xfd   :  { %v335_v42 = vsel %vm316_vm1, %v308_v37, 0.0 }
  0xfe   :  { %v332_v41 = vsel %vm316_vm1, %v303_v39, 0.0 }
  0xff   :  { %333 = vadd.xlane.f32.xlu1 %v332_v41  ;;  %336 = vadd.xlane.f32.xlu0 %v335_v42 }
 0x103   :  { %339 = vadd.xlane.f32.xlu1 %v338_v43 }
 0x179   :  { %v322_v44 = vpop.xlane.xlu0 %321 }
 0x17a   :  { %v342_v45 = vmul.f32 0.5, %v322_v44  ;;  %v398_v44 = vld [vmem:[%s1079_s2 + $0x8] sm:$0xff] }
 0x17c   :  { %v945_v46 = vsub.f32 %v283_v8, %v342_v45 }
 0x17d   :  { %v319_v47 = vpop.xlane.xlu0 %318 }
 0x17e   :  { %v341_v48 = vmul.f32 0.5, %v319_v47  ;;  %v358_v49 = vmul.f32 %v945_v46, %v945_v46 }
 0x17f   :  { %v325_v50 = vpop.xlane.xlu1 %324 }
 0x180   :  { %v949_v51 = vsub.f32 %v278_v11, %v341_v48  ;;  %v343_v52 = vmul.f32 0.5, %v325_v50  ;;  %v368_v53 = vsel %vm316_vm1, %v358_v49, 0.0 }
 0x181   :  { %369 = vadd.xlane.f32.xlu1 %v368_v53 }
 0x182   :  { %v952_v54 = vsub.f32 %v288_v19, %v343_v52  ;;  %v357_v55 = vmul.f32 %v949_v51, %v949_v51  ;;  %v397_v52 = vld [vmem:[%s1079_s2] sm:$0xff] }
 0x183   :  { %v328_v56 = vpop.xlane.xlu1 %327 }
 0x184   :  { %v344_v57 = vmul.f32 0.5, %v328_v56  ;;  %v365_v58 = vsel %vm316_vm1, %v357_v55, 0.0  ;;  %v331_v59 = vpop.xlane.xlu0 %330  ;;  %v359_v60 = vmul.f32 %v952_v54, %v952_v54 }
 0x185   :  { %366 = vadd.xlane.f32.xlu0 %v365_v58  ;;  %v345_v61 = vmul.f32 0.5, %v331_v59  ;;  %v399_v59 = vld [vmem:[%s1079_s2 + $0x10] sm:$0xff] }
 0x186   :  { %v959_v62 = vsub.f32 %v293_v25, %v344_v57  ;;  %v371_v1 = vsel %vm316_vm1, %v359_v60, 0.0  ;;  %v481_v25 = vld [vmem:[%s1078_s3 + $0x20] sm:$0xff] }
 0x187   :  { %v961_v63 = vsub.f32 %v298_v29, %v345_v61  ;;  %v484_v61 = vld [vmem:[%s1078_s3 + $0x38] sm:$0xff] }
 0x188   :  { %v334_v0 = vpop.xlane.xlu1 %333  ;;  %v337_v2 = vpop.xlane.xlu0 %336  ;;  %v360_v3 = vmul.f32 %v959_v62, %v959_v62 }
 0x189   :  { %v346_v4 = vmul.f32 0.5, %v334_v0  ;;  %372 = vadd.xlane.f32.xlu0 %v371_v1  ;;  %v347_v5 = vmul.f32 0.5, %v337_v2  ;;  %v361_v6 = vmul.f32 %v961_v63, %v961_v63 }
 0x18a   :  { %v374_v7 = vsel %vm316_vm1, %v360_v3, 0.0  ;;  %v400_v3 = vld [vmem:[%s1079_s2 + $0x18] sm:$0xff] }
 0x18b   :  { %v969_v8 = vsub.f32 %v303_v39, %v346_v4  ;;  %v971_v9 = vsub.f32 %v308_v37, %v347_v5  ;;  %375 = vadd.xlane.f32.xlu1 %v374_v7  ;;  %v377_v10 = vsel %vm316_vm1, %v361_v6, 0.0  ;;  %v401_v6 = vld [vmem:[%s1079_s2 + $0x20] sm:$0xff] }
 0x18c   :  { %v340_v11 = vpop.xlane.xlu1 %339 }
 0x18d   :  { %v348_v12 = vmul.f32 0.5, %v340_v11  ;;  %378 = vadd.xlane.f32.xlu0 %v377_v10  ;;  %v362_v13 = vmul.f32 %v969_v8, %v969_v8  ;;  %v363_v14 = vmul.f32 %v971_v9, %v971_v9  ;;  %v404_v10 = vld [vmem:[%s1079_s2 + $0x38] sm:$0xff] }
 0x18f   :  { %v978_v16 = vsub.f32 %v313_v40, %v348_v12  ;;  %v380_v17 = vsel %vm316_vm1, %v362_v13, 0.0  ;;  %v383_v18 = vsel %vm316_vm1, %v363_v14, 0.0  ;;  %v403_v14 = vld [vmem:[%s1079_s2 + $0x30] sm:$0xff] }
 0x190   :  { %381 = vadd.xlane.f32.xlu1 %v380_v17 }
 0x191   :  { %384 = vadd.xlane.f32.xlu0 %v383_v18  ;;  %v364_v19 = vmul.f32 %v978_v16, %v978_v16  ;;  %v402_v18 = vld [vmem:[%s1079_s2 + $0x28] sm:$0xff] }
 0x193   :  { %v386_v20 = vsel %vm316_vm1, %v364_v19, 0.0 }
 0x194   :  { %387 = vadd.xlane.f32.xlu1 %v386_v20  ;;  %v483_v20 = vld [vmem:[%s1078_s3 + $0x30] sm:$0xff] }
 0x1a5   :  { %487 = vperm.xlu1 %700, %v477_v21  }
 0x1a7   :  { %492 = vperm.xlu0 %701, %v478_v22  }
 0x1a9   :  { %497 = vperm.xlu1 %700, %v479_v23  }
 0x1ab   :  { %502 = vperm.xlu0 %701, %v480_v24  }
 0x1ad   :  { %507 = vperm.xlu1 %700, %v481_v25  }
 0x1af   :  { %512 = vperm.xlu0 %701, %v482_v26  }
 0x20a   :  { %v370_v27 = vpop.xlane.xlu1 %369 }
 0x20b   :  { %v390_v28 = vmul.f32 0.5, %v370_v27 }
 0x20d   :  { %v406_v29 = vadd.f32 1e-05, %v390_v28 }
 0x20e   :  { %v367_v30 = vpop.xlane.xlu0 %366 }
 0x20f   :  { %702 = vrsqrt.f32 %v406_v29  ;;  %v389_v31 = vmul.f32 0.5, %v367_v30  ;;  %v542_v29 = vstv %s1080_s4 }
 0x211   :  { %v405_v32 = vadd.f32 1e-05, %v389_v31 }
 0x212   :  { %v373_v33 = vpop.xlane.xlu0 %372 }
 0x213   :  { %704 = vrsqrt.f32 %v405_v32  ;;  %v391_v34 = vmul.f32 0.5, %v373_v33 }
 0x214   :  { %v376_v35 = vpop.xlane.xlu1 %375 }
 0x215   :  { %v407_v36 = vadd.f32 1e-05, %v391_v34  ;;  %v392_v37 = vmul.f32 0.5, %v376_v35 }
 0x216   :  { %v379_v38 = vpop.xlane.xlu0 %378 }
 0x217   :  { %706 = vrsqrt.f32 %v407_v36  ;;  %v408_v39 = vadd.f32 1e-05, %v392_v37  ;;  %v393_v40 = vmul.f32 0.5, %v379_v38 }
 0x219   :  { %708 = vrsqrt.f32 %v408_v39  ;;  %v409_v41 = vadd.f32 1e-05, %v393_v40  ;;  %v382_v42 = vpop.xlane.xlu1 %381 }
 0x21a   :  { %v385_v43 = vpop.xlane.xlu0 %384  ;;  %v394_v56 = vmul.f32 0.5, %v382_v42 }
 0x21b   :  { %710 = vrsqrt.f32 %v409_v41  ;;  %v395_v47 = vmul.f32 0.5, %v385_v43 }
 0x21c   :  { %v703_v45 = vpop.eup %702  ;;  %v410_v0 = vadd.f32 1e-05, %v394_v56 }
 0x21d   :  { %v388_v48 = vpop.xlane.xlu1 %387  ;;  %v422_v49 = vmul.f32 %v703_v45, %v398_v44  ;;  %v411_v57 = vadd.f32 1e-05, %v395_v47 }
 0x21e   :  { %v396_v50 = vmul.f32 0.5, %v388_v48 }
 0x21f   :  { %436 = vperm.xlu1 %700, %v422_v49  }
 0x220   :  { %v705_v53 = vpop.eup %704  ;;  %v412_v55 = vadd.f32 1e-05, %v396_v50 }
 0x221   :  { %v421_v58 = vmul.f32 %v705_v53, %v397_v52  ;;  %v488_v21 = vpop.permute.xlu1 %487 }
 0x222   :  { %712 = vrsqrt.f32 %v412_v55  ;;  %v493_v22 = vpop.permute.xlu0 %492 }
 0x223   :  { %431 = vperm.xlu0 %701, %v421_v58   ;;  %714 = vrsqrt.f32 %v411_v57 }
 0x224   :  { %v707_v60 = vpop.eup %706  ;;  %716 = vrsqrt.f32 %v410_v0 }
 0x225   :  { %v423_v1 = vmul.f32 %v707_v60, %v399_v59  ;;  %v498_v23 = vpop.permute.xlu1 %497 }
 0x226   :  { %v709_v2 = vpop.eup %708  ;;  %v503_v24 = vpop.permute.xlu0 %502 }
 0x227   :  { %441 = vperm.xlu1 %700, %v423_v1   ;;  %522 = vperm.xlu0 %701, %v484_v61   ;;  %v424_v4 = vmul.f32 %v709_v2, %v400_v3 }
 0x228   :  { %v711_v5 = vpop.eup %710 }
 0x229   :  { %v425_v7 = vmul.f32 %v711_v5, %v401_v6  ;;  %v508_v25 = vpop.permute.xlu1 %507 }
 0x22a   :  { %v513_v26 = vpop.permute.xlu0 %512 }
 0x22b   :  { %446 = vperm.xlu1 %700, %v424_v4  }
 0x22f   :  { %v713_v11 = vpop.eup %712  ;;  %451 = vperm.xlu1 %700, %v425_v7  }
 0x230   :  { %v428_v12 = vmul.f32 %v713_v11, %v404_v10  ;;  %v715_v13 = vpop.eup %714 }
 0x231   :  { %v427_v15 = vmul.f32 %v715_v13, %v403_v14  ;;  %v717_v17 = vpop.eup %716 }
 0x232   :  { %v426_v19 = vmul.f32 %v717_v17, %v402_v18 }
 0x233   :  { %466 = vperm.xlu1 %700, %v428_v12  }
 0x237   :  { %461 = vperm.xlu1 %700, %v427_v15  }
 0x23b   :  { %456 = vperm.xlu1 %700, %v426_v19  }
 0x23f   :  { %517 = vperm.xlu1 %700, %v483_v20  }
 0x29a   :  { %v437_v27 = vpop.permute.xlu1 %436 }
 0x29b   :  { %v470_v28 = vmul.f32 %v437_v27, %v945_v46 }
 0x29d   :  { %v526_v30 = vadd.f32 %v493_v22, %v470_v28 }
 0x29e   :  { %v432_v31 = vpop.permute.xlu0 %431 }
 0x29f   :  { %vm535_vm2 = vcmp.ge.f32.partialorder %v526_v30, 0.0  ;;  %v544_v32 = vmul.f32 %v542_v29, %v526_v30  ;;  %v469_v33 = vmul.f32 %v432_v31, %v949_v51 }
 0x2a1   :  { %v552_v34 = vsel %vm535_vm2, %v526_v30, %v544_v32  ;;  %v525_v35 = vadd.f32 %v488_v21, %v469_v33 }
 0x2a2   :  { %560 = vst.msk [vmem:[%s1081_s5 + $0x8] sm:$0xff] %vm316_vm1, %v552_v34  ;;  %v442_v36 = vpop.permute.xlu1 %441  ;;  %v523_v52 = vpop.permute.xlu0 %522 }
 0x2a3   :  { %vm534_vm3 = vcmp.ge.f32.partialorder %v525_v35, 0.0  ;;  %v543_v46 = vmul.f32 %v542_v29, %v525_v35  ;;  %v471_v37 = vmul.f32 %v442_v36, %v952_v54 }
 0x2a5   :  { %v551_v38 = vsel %vm534_vm3, %v525_v35, %v543_v46  ;;  %v527_v39 = vadd.f32 %v498_v23, %v471_v37 }
 0x2a6   :  { %559 = vst.msk [vmem:[%s1081_s5] sm:$0xff] %vm316_vm1, %v551_v38  ;;  %v447_v51 = vpop.permute.xlu1 %446 }
 0x2a7   :  { %vm536_vm4 = vcmp.ge.f32.partialorder %v527_v39, 0.0  ;;  %v545_v40 = vmul.f32 %v542_v29, %v527_v39  ;;  %v472_v41 = vmul.f32 %v447_v51, %v959_v62 }
 0x2a9   :  { %v553_v42 = vsel %vm536_vm4, %v527_v39, %v545_v40  ;;  %v528_v43 = vadd.f32 %v503_v24, %v472_v41 }
 0x2aa   :  { %561 = vst.msk [vmem:[%s1081_s5 + $0x10] sm:$0xff] %vm316_vm1, %v553_v42  ;;  %v452_v54 = vpop.permute.xlu1 %451 }
 0x2ab   :  { %vm537_vm5 = vcmp.ge.f32.partialorder %v528_v43, 0.0  ;;  %v546_v44 = vmul.f32 %v542_v29, %v528_v43  ;;  %v473_v45 = vmul.f32 %v452_v54, %v961_v63 }
 0x2ad   :  { %v554_v47 = vsel %vm537_vm5, %v528_v43, %v546_v44  ;;  %v529_v48 = vadd.f32 %v508_v25, %v473_v45 }
 0x2ae   :  { %562 = vst.msk [vmem:[%s1081_s5 + $0x18] sm:$0xff] %vm316_vm1, %v554_v47  ;;  %v467_v62 = vpop.permute.xlu1 %466 }
 0x2af   :  { %vm538_vm6 = vcmp.ge.f32.partialorder %v529_v48, 0.0  ;;  %v547_v49 = vmul.f32 %v542_v29, %v529_v48  ;;  %v476_v50 = vmul.f32 %v467_v62, %v978_v16 }
 0x2b1   :  { %v555_v53 = vsel %vm538_vm6, %v529_v48, %v547_v49  ;;  %v532_v55 = vadd.f32 %v523_v52, %v476_v50 }
 0x2b2   :  { %563 = vst.msk [vmem:[%s1081_s5 + $0x20] sm:$0xff] %vm316_vm1, %v555_v53  ;;  %v462_v63 = vpop.permute.xlu1 %461 }
 0x2b3   :  { %vm541_vm7 = vcmp.ge.f32.partialorder %v532_v55, 0.0  ;;  %v550_v56 = vmul.f32 %v542_v29, %v532_v55  ;;  %v475_v59 = vmul.f32 %v462_v63, %v971_v9 }
 0x2b5   :  { %v558_v57 = vsel %vm541_vm7, %v532_v55, %v550_v56 }
 0x2b6   :  { %566 = vst.msk [vmem:[%s1081_s5 + $0x38] sm:$0xff] %vm316_vm1, %v558_v57  ;;  %v457_v58 = vpop.permute.xlu1 %456 }
 0x2b7   :  { %v474_v16 = vmul.f32 %v457_v58, %v969_v8 }
 0x2b9   :  { %v530_v60 = vadd.f32 %v513_v26, %v474_v16 }
 0x2ba   :  { %v518_v61 = vpop.permute.xlu1 %517 }
 0x2bb   :  { %vm539_vm8 = vcmp.ge.f32.partialorder %v530_v60, 0.0  ;;  %v548_v0 = vmul.f32 %v542_v29, %v530_v60  ;;  %v531_v1 = vadd.f32 %v518_v61, %v475_v59 }
 0x2bd   :  { %v556_v2 = vsel %vm539_vm8, %v530_v60, %v548_v0  ;;  %vm540_vm9 = vcmp.ge.f32.partialorder %v531_v1, 0.0  ;;  %v549_v3 = vmul.f32 %v542_v29, %v531_v1 }
 0x2be   :  { %564 = vst.msk [vmem:[%s1081_s5 + $0x28] sm:$0xff] %vm316_vm1, %v556_v2 }
 0x2bf   :  { %v557_v4 = vsel %vm540_vm9, %v531_v1, %v549_v3 }
 0x2c0   :  { %565 = vst.msk [vmem:[%s1081_s5 + $0x30] sm:$0xff] %vm316_vm1, %v557_v4 }

// kernel: unet5_forward.15
= control target key start
LH: loop header
LB: loop body
LE: loop exit
PB: predicated region body
PF: predicated region fallthrough
CT: control target
= control target key end

     0   :  { %vm113_vm0 = vcmask 523264   ;;  %vm381_vm1 = vcmask 64512   ;;  %s1043_s0 = inlined_call_operand.vmem [shape: f32[576,8], index: 0, kind: input, shape index: {}]   ;;  %s1044_s1 = inlined_call_operand.vmem [shape: f32[32,576], index: 1, kind: input, shape index: {}]   ;;  %s1045_s2 = inlined_call_operand.vmem [shape: f32[32,1], index: 2, kind: input, shape index: {}]   ;;  %s1046_s3 = inlined_call_operand.vmem [shape: f32[32,1], index: 3, kind: input, shape index: {}]   ;;  %s1047_s4 = inlined_call_operand.<no memory space> [shape: f32[1], index: 4, kind: input, shape index: {}]   ;;  %s1048_s5 = inlined_call_operand.vmem [shape: f32[32,8], index: 5, kind: output, shape index: {}]  }
   0x1   :  { %v72_v0 = vld [vmem:[%s1043_s0 + $0xf8] sm:$0xff]  ;;  %v71_v4 = vld [vmem:[%s1043_s0 + $0xf0] sm:$0xff]  ;;  %v70_v8 = vld [vmem:[%s1043_s0 + $0xe8] sm:$0xff] }
   0x2   :  { %v104_v1 = vld [vmem:[%s1043_s0 + $0x1f8] sm:$0xff]  ;;  %516 = vmatprep.subr.mxu0 %v72_v0  ;;  %v103_v5 = vld [vmem:[%s1043_s0 + $0x1f0] sm:$0xff]  ;;  %v102_v9 = vld [vmem:[%s1043_s0 + $0x1e8] sm:$0xff] }
   0x3   :  { %v56_v2 = vld [vmem:[%s1043_s0 + $0x78] sm:$0xff]  ;;  %560 = vmatprep.subr.mxu1 %v104_v1  ;;  %v55_v6 = vld [vmem:[%s1043_s0 + $0x70] sm:$0xff]  ;;  %v54_v10 = vld [vmem:[%s1043_s0 + $0x68] sm:$0xff] }
   0x4   :  { %v88_v3 = vld [vmem:[%s1043_s0 + $0x178] sm:$0xff]  ;;  %517 = vmatpush3.msra.mxu0 %v56_v2  ;;  %v87_v7 = vld [vmem:[%s1043_s0 + $0x170] sm:$0xff]  ;;  %v86_v11 = vld [vmem:[%s1043_s0 + $0x168] sm:$0xff] }
   0x5   :  { %561 = vmatpush3.msra.mxu1 %v88_v3  ;;  %518 = vmatprep.subr.mxu0 %v71_v4  ;;  %v69_v12 = vld [vmem:[%s1043_s0 + $0xe0] sm:$0xff]  ;;  %v68_v16 = vld [vmem:[%s1043_s0 + $0xd8] sm:$0xff]  ;;  %v67_v20 = vld [vmem:[%s1043_s0 + $0xd0] sm:$0xff] }
   0x6   :  { %562 = vmatprep.subr.mxu1 %v103_v5  ;;  %519 = vmatpush3.msra.mxu0 %v55_v6  ;;  %v101_v13 = vld [vmem:[%s1043_s0 + $0x1e0] sm:$0xff]  ;;  %v100_v17 = vld [vmem:[%s1043_s0 + $0x1d8] sm:$0xff]  ;;  %v99_v21 = vld [vmem:[%s1043_s0 + $0x1d0] sm:$0xff] }
   0x7   :  { %563 = vmatpush3.msra.mxu1 %v87_v7  ;;  %520 = vmatprep.subr.mxu0 %v70_v8  ;;  %v53_v14 = vld [vmem:[%s1043_s0 + $0x60] sm:$0xff]  ;;  %v52_v18 = vld [vmem:[%s1043_s0 + $0x58] sm:$0xff]  ;;  %v51_v22 = vld [vmem:[%s1043_s0 + $0x50] sm:$0xff] }
   0x8   :  { %564 = vmatprep.subr.mxu1 %v102_v9  ;;  %v85_v15 = vld [vmem:[%s1043_s0 + $0x160] sm:$0xff]  ;;  %521 = vmatpush3.msra.mxu0 %v54_v10  ;;  %v84_v19 = vld [vmem:[%s1043_s0 + $0x158] sm:$0xff]  ;;  %v83_v23 = vld [vmem:[%s1043_s0 + $0x150] sm:$0xff] }
   0x9   :  { %565 = vmatpush3.msra.mxu1 %v86_v11  ;;  %522 = vmatprep.subr.mxu0 %v69_v12  ;;  %v66_v24 = vld [vmem:[%s1043_s0 + $0xc8] sm:$0xff]  ;;  %v65_v28 = vld [vmem:[%s1043_s0 + $0xc0] sm:$0xff]  ;;  %v64_v32 = vld [vmem:[%s1043_s0 + $0xb8] sm:$0xff] }
   0xa   :  { %566 = vmatprep.subr.mxu1 %v101_v13  ;;  %523 = vmatpush3.msra.mxu0 %v53_v14  ;;  %v98_v25 = vld [vmem:[%s1043_s0 + $0x1c8] sm:$0xff]  ;;  %v97_v29 = vld [vmem:[%s1043_s0 + $0x1c0] sm:$0xff]  ;;  %v96_v33 = vld [vmem:[%s1043_s0 + $0x1b8] sm:$0xff] }
   0xb   :  { %567 = vmatpush3.msra.mxu1 %v85_v15  ;;  %524 = vmatprep.subr.mxu0 %v68_v16  ;;  %v50_v26 = vld [vmem:[%s1043_s0 + $0x48] sm:$0xff]  ;;  %v49_v30 = vld [vmem:[%s1043_s0 + $0x40] sm:$0xff]  ;;  %v48_v34 = vld [vmem:[%s1043_s0 + $0x38] sm:$0xff] }
   0xc   :  { %568 = vmatprep.subr.mxu1 %v100_v17  ;;  %525 = vmatpush3.msra.mxu0 %v52_v18  ;;  %v82_v27 = vld [vmem:[%s1043_s0 + $0x148] sm:$0xff]  ;;  %v81_v31 = vld [vmem:[%s1043_s0 + $0x140] sm:$0xff]  ;;  %v80_v35 = vld [vmem:[%s1043_s0 + $0x138] sm:$0xff] }
   0xd   :  { %569 = vmatpush3.msra.mxu1 %v84_v19  ;;  %526 = vmatprep.subr.mxu0 %v67_v20  ;;  %v63_v36 = vld [vmem:[%s1043_s0 + $0xb0] sm:$0xff]  ;;  %v62_v40 = vld [vmem:[%s1043_s0 + $0xa8] sm:$0xff]  ;;  %v61_v44 = vld [vmem:[%s1043_s0 + $0xa0] sm:$0xff] }
   0xe   :  { %570 = vmatprep.subr.mxu1 %v99_v21  ;;  %527 = vmatpush3.msra.mxu0 %v51_v22  ;;  %v95_v37 = vld [vmem:[%s1043_s0 + $0x1b0] sm:$0xff]  ;;  %v94_v41 = vld [vmem:[%s1043_s0 + $0x1a8] sm:$0xff]  ;;  %v93_v45 = vld [vmem:[%s1043_s0 + $0x1a0] sm:$0xff] }
   0xf   :  { %571 = vmatpush3.msra.mxu1 %v83_v23  ;;  %528 = vmatprep.subr.mxu0 %v66_v24  ;;  %v47_v38 = vld [vmem:[%s1043_s0 + $0x30] sm:$0xff]  ;;  %v46_v42 = vld [vmem:[%s1043_s0 + $0x28] sm:$0xff]  ;;  %v45_v46 = vld [vmem:[%s1043_s0 + $0x20] sm:$0xff] }
  0x10   :  { %572 = vmatprep.subr.mxu1 %v98_v25  ;;  %529 = vmatpush3.msra.mxu0 %v50_v26  ;;  %v79_v39 = vld [vmem:[%s1043_s0 + $0x130] sm:$0xff]  ;;  %v78_v43 = vld [vmem:[%s1043_s0 + $0x128] sm:$0xff]  ;;  %v77_v47 = vld [vmem:[%s1043_s0 + $0x120] sm:$0xff] }
  0x11   :  { %573 = vmatpush3.msra.mxu1 %v82_v27  ;;  %530 = vmatprep.subr.mxu0 %v65_v28  ;;  %v60_v48 = vld [vmem:[%s1043_s0 + $0x98] sm:$0xff]  ;;  %v59_v52 = vld [vmem:[%s1043_s0 + $0x90] sm:$0xff]  ;;  %v58_v56 = vld [vmem:[%s1043_s0 + $0x88] sm:$0xff] }
  0x12   :  { %574 = vmatprep.subr.mxu1 %v97_v29  ;;  %531 = vmatpush3.msra.mxu0 %v49_v30  ;;  %v92_v49 = vld [vmem:[%s1043_s0 + $0x198] sm:$0xff]  ;;  %v91_v53 = vld [vmem:[%s1043_s0 + $0x190] sm:$0xff]  ;;  %v90_v57 = vld [vmem:[%s1043_s0 + $0x188] sm:$0xff] }
  0x13   :  { %575 = vmatpush3.msra.mxu1 %v81_v31  ;;  %532 = vmatprep.subr.mxu0 %v64_v32  ;;  %v44_v50 = vld [vmem:[%s1043_s0 + $0x18] sm:$0xff]  ;;  %v43_v54 = vld [vmem:[%s1043_s0 + $0x10] sm:$0xff]  ;;  %v42_v58 = vld [vmem:[%s1043_s0 + $0x8] sm:$0xff] }
  0x14   :  { %576 = vmatprep.subr.mxu1 %v96_v33  ;;  %533 = vmatpush3.msra.mxu0 %v48_v34  ;;  %v76_v51 = vld [vmem:[%s1043_s0 + $0x118] sm:$0xff]  ;;  %v75_v55 = vld [vmem:[%s1043_s0 + $0x110] sm:$0xff]  ;;  %v74_v59 = vld [vmem:[%s1043_s0 + $0x108] sm:$0xff] }
  0x15   :  { %577 = vmatpush3.msra.mxu1 %v80_v35  ;;  %534 = vmatprep.subr.mxu0 %v63_v36  ;;  %v57_v60 = vld [vmem:[%s1043_s0 + $0x80] sm:$0xff]  ;;  %v22_v63 = vld [vmem:[%s1044_s1 + $0x8] sm:$0xff]  ;;  %v24_v1 = vld [vmem:[%s1044_s1 + $0x18] sm:$0xff] }
  0x16   :  { %578 = vmatprep.subr.mxu1 %v95_v37  ;;  %535 = vmatpush3.msra.mxu0 %v47_v38  ;;  %v89_v61 = vld [vmem:[%s1043_s0 + $0x180] sm:$0xff]  ;;  %v23_v3 = vld [vmem:[%s1044_s1 + $0x10] sm:$0xff]  ;;  %v112_v4 = vld [vmem:[%s1043_s0 + $0x238] sm:$0xff] }
  0x17   :  { %579 = vmatpush3.msra.mxu1 %v79_v39  ;;  %536 = vmatprep.subr.mxu0 %v62_v40  ;;  %v41_v62 = vld [vmem:[%s1043_s0] sm:$0xff]  ;;  %v111_v5 = vld [vmem:[%s1043_s0 + $0x230] sm:$0xff]  ;;  %v26_v8 = vld [vmem:[%s1044_s1 + $0x28] sm:$0xff] }
  0x18   :  { %580 = vmatprep.subr.mxu1 %v94_v41  ;;  %537 = vmatpush3.msra.mxu0 %v46_v42  ;;  %v73_v0 = vld [vmem:[%s1043_s0 + $0x100] sm:$0xff]  ;;  %v27_v6 = vld [vmem:[%s1044_s1 + $0x30] sm:$0xff]  ;;  %v28_v9 = vld [vmem:[%s1044_s1 + $0x38] sm:$0xff] }
  0x19   :  { %581 = vmatpush3.msra.mxu1 %v78_v43  ;;  %538 = vmatprep.subr.mxu0 %v61_v44  ;;  %v21_v2 = vld [vmem:[%s1044_s1] sm:$0xff]  ;;  %v110_v10 = vld [vmem:[%s1043_s0 + $0x228] sm:$0xff]  ;;  %v32_v12 = vld [vmem:[%s1044_s1 + $0x58] sm:$0xff] }
  0x1a   :  { %582 = vmatprep.subr.mxu1 %v93_v45  ;;  %539 = vmatpush3.msra.mxu0 %v45_v46  ;;  %v29_v7 = vld [vmem:[%s1044_s1 + $0x40] sm:$0xff]  ;;  %v34_v13 = vld [vmem:[%s1044_s1 + $0x68] sm:$0xff]  ;;  %v31_v14 = vld [vmem:[%s1044_s1 + $0x50] sm:$0xff] }
  0x1b   :  { %583 = vmatpush3.msra.mxu1 %v77_v47  ;;  %540 = vmatprep.subr.mxu0 %v60_v48  ;;  %v109_v11 = vld [vmem:[%s1043_s0 + $0x220] sm:$0xff]  ;;  %v108_v16 = vld [vmem:[%s1043_s0 + $0x218] sm:$0xff]  ;;  %v107_v17 = vld [vmem:[%s1043_s0 + $0x210] sm:$0xff] }
  0x1c   :  { %584 = vmatprep.subr.mxu1 %v92_v49  ;;  %541 = vmatpush3.msra.mxu0 %v44_v50  ;;  %v33_v15 = vld [vmem:[%s1044_s1 + $0x60] sm:$0xff]  ;;  %v39_v19 = vld [vmem:[%s1044_s1 + $0x90] sm:$0xff]  ;;  %v36_v20 = vld [vmem:[%s1044_s1 + $0x78] sm:$0xff] }
  0x1d   :  { %585 = vmatpush3.msra.mxu1 %v76_v51  ;;  %542 = vmatprep.subr.mxu0 %v59_v52  ;;  %v37_v18 = vld [vmem:[%s1044_s1 + $0x80] sm:$0xff]  ;;  %v38_v21 = vld [vmem:[%s1044_s1 + $0x88] sm:$0xff]  ;;  %v35_v25 = vld [vmem:[%s1044_s1 + $0x70] sm:$0xff] }
  0x1e   :  { %586 = vmatprep.subr.mxu1 %v91_v53  ;;  %543 = vmatpush3.msra.mxu0 %v43_v54  ;;  %v106_v22 = vld [vmem:[%s1043_s0 + $0x208] sm:$0xff]  ;;  %v105_v23 = vld [vmem:[%s1043_s0 + $0x200] sm:$0xff]  ;;  %v40_v27 = vld [vmem:[%s1044_s1 + $0x98] sm:$0xff] }
  0x1f   :  { %587 = vmatpush3.msra.mxu1 %v75_v55  ;;  %544 = vmatprep.subr.mxu0 %v58_v56  ;;  %v25_v24 = vld [vmem:[%s1044_s1 + $0x20] sm:$0xff]  ;;  %v30_v26 = vld [vmem:[%s1044_s1 + $0x48] sm:$0xff] }
  0x20   :  { %588 = vmatprep.subr.mxu1 %v90_v57  ;;  %545 = vmatpush3.msra.mxu0 %v42_v58 }
  0x21   :  { %589 = vmatpush3.msra.mxu1 %v74_v59  ;;  %546 = vmatprep.subr.mxu0 %v57_v60 }
  0x22   :  { %590 = vmatprep.subr.mxu1 %v89_v61  ;;  %547 = vmatpush3.msra.mxu0 %v41_v62 }
  0x23   :  { %190 = vmatprep.mubr.f32.mxu0 %v22_v63  ;;  %591 = vmatpush3.msra.mxu1 %v73_v0 }
  0x24   :  { %275 = vmatprep.mubr.f32.mxu1 %v24_v1  ;;  %191 = vmatmul.mubr.f32.vlgmr.msra.gmra.mxu0 %v21_v2 }
  0x25   :  { %276 = vmatmul.mubr.f32.vlgmr.msra.gmra.mxu1 %v23_v3  ;;  %616 = vmatprep.subr.mxu0 %v112_v4 }
  0x26   :  { %638 = vmatprep.subr.mxu1 %v112_v4  ;;  %617 = vmatpush3.msra.mxu0 %v112_v4 }
  0x27   :  { %646 = vmatpush3.msra.mxu1 %v112_v4  ;;  %618 = vmatprep.subr.mxu0 %v111_v5 }
  0x28   :  { %639 = vmatprep.subr.mxu1 %v111_v5  ;;  %195 = vmatprep.mubr.f32.mxu0 %v27_v6 }
  0x29   :  { %280 = vmatprep.mubr.f32.mxu1 %v29_v7  ;;  %619 = vmatpush3.msra.mxu0 %v111_v5 }
  0x2a   :  { %647 = vmatpush3.msra.mxu1 %v111_v5  ;;  %196 = vmatmul.mubr.f32.gmra.mxu0 %v26_v8 }
  0x2b   :  { %281 = vmatmul.mubr.f32.gmra.mxu1 %v28_v9  ;;  %620 = vmatprep.subr.mxu0 %v110_v10 }
  0x2c   :  { %640 = vmatprep.subr.mxu1 %v110_v10  ;;  %621 = vmatpush3.msra.mxu0 %v110_v10 }
  0x2d   :  { %648 = vmatpush3.msra.mxu1 %v110_v10  ;;  %622 = vmatprep.subr.mxu0 %v109_v11 }
  0x2e   :  { %641 = vmatprep.subr.mxu1 %v109_v11  ;;  %200 = vmatprep.mubr.f32.mxu0 %v32_v12 }
  0x2f   :  { %285 = vmatprep.mubr.f32.mxu1 %v34_v13  ;;  %623 = vmatpush3.msra.mxu0 %v109_v11 }
  0x30   :  { %649 = vmatpush3.msra.mxu1 %v109_v11  ;;  %201 = vmatmul.mubr.f32.gmra.mxu0 %v31_v14 }
  0x31   :  { %286 = vmatmul.mubr.f32.gmra.mxu1 %v33_v15  ;;  %624 = vmatprep.subr.mxu0 %v108_v16 }
  0x32   :  { %642 = vmatprep.subr.mxu1 %v108_v16  ;;  %625 = vmatpush3.msra.mxu0 %v108_v16 }
  0x33   :  { %650 = vmatpush3.msra.mxu1 %v108_v16  ;;  %626 = vmatprep.subr.mxu0 %v107_v17 }
  0x34   :  { %643 = vmatprep.subr.mxu1 %v107_v17  ;;  %205 = vmatprep.mubr.f32.mxu0 %v37_v18 }
  0x35   :  { %290 = vmatprep.mubr.f32.mxu1 %v39_v19  ;;  %627 = vmatpush3.msra.mxu0 %v107_v17 }
  0x36   :  { %651 = vmatpush3.msra.mxu1 %v107_v17  ;;  %206 = vmatmul.mubr.f32.gmra.mxu0 %v36_v20 }
  0x37   :  { %291 = vmatmul.mubr.f32.gmra.mxu1 %v38_v21  ;;  %628 = vmatprep.subr.mxu0 %v106_v22 }
  0x38   :  { %644 = vmatprep.subr.mxu1 %v106_v22  ;;  %629 = vmatpush3.msra.mxu0 %v106_v22 }
  0x39   :  { %652 = vmatpush3.msra.mxu1 %v106_v22  ;;  %630 = vmatprep.subr.mxu0 %v105_v23 }
  0x3a   :  { %645 = vmatprep.subr.mxu1 %v105_v23  ;;  %631 = vmatpush3.msra.mxu0 %v105_v23 }
  0x3b   :  { %653 = vmatpush3.msra.mxu1 %v105_v23  ;;  %632 = vmatprep.mubr.msk.f32.mxu0 %vm113_vm0, %v25_v24  ;;  %v665_v24 = vmov 0  }
  0x3c   :  { %635 = vmatprep.mubr.msk.f32.mxu1 %vm113_vm0, %v35_v25  ;;  %633 = vmatmul.mubr.msk.f32.vlgmr.msra.gmra.mxu0 %vm113_vm0, %v30_v26 }
  0x3d   :  { %636 = vmatmul.mubr.msk.f32.vlgmr.msra.gmra.mxu1 %vm113_vm0, %v40_v27  ;;  %655 = vset.pattern.permute.xlu0 %v665_v24 }
  0x3e   :  { %656 = vset.pattern.permute.xlu1 %v665_v24 }
  0xe4   :  { %v548_v28 = vpop.f32.mrf.mxu0 }
  0xe5   :  { %v592_v29 = vpop.f32.mrf.mxu1 }
  0xe6   :  { %v549_v30 = vpop.f32.mrf.mxu0 }
  0xe7   :  { %v593_v31 = vpop.f32.mrf.mxu1  ;;  %v550_v42 = vadd.f32 %v549_v30, %v548_v28 }
  0xe8   :  { %v594_v43 = vadd.f32 %v593_v31, %v592_v29 }
  0xea   :  { %v551_v32 = vpop.f32.mrf.mxu0  ;;  %v278_v55 = vadd.f32 %v594_v43, %v550_v42  ;;  %v462_v43 = vld [vmem:[%s1046_s3] sm:$0xff] }
  0xeb   :  { %v595_v33 = vpop.f32.mrf.mxu1 }
  0xec   :  { %v552_v34 = vpop.f32.mrf.mxu0 }
  0xed   :  { %v596_v35 = vpop.f32.mrf.mxu1  ;;  %v553_v50 = vadd.f32 %v552_v34, %v551_v32  ;;  %v422_v34 = vld [vmem:[%s1045_s2] sm:$0xff] }
  0xee   :  { %v597_v51 = vadd.f32 %v596_v35, %v595_v33 }
  0xf0   :  { %v554_v36 = vpop.f32.mrf.mxu0  ;;  %v283_v59 = vadd.f32 %v597_v51, %v553_v50  ;;  %v425_v50 = vld [vmem:[%s1045_s2 + $0x18] sm:$0xff] }
  0xf1   :  { %v598_v37 = vpop.f32.mrf.mxu1 }
  0xf2   :  { %v555_v38 = vpop.f32.mrf.mxu0 }
  0xf3   :  { %v599_v39 = vpop.f32.mrf.mxu1  ;;  %v556_v46 = vadd.f32 %v555_v38, %v554_v36 }
  0xf4   :  { %v600_v47 = vadd.f32 %v599_v39, %v598_v37  ;;  %v423_v39 = vld [vmem:[%s1045_s2 + $0x8] sm:$0xff] }
  0xf6   :  { %v557_v40 = vpop.f32.mrf.mxu0  ;;  %v288_v56 = vadd.f32 %v600_v47, %v556_v46  ;;  %v424_v47 = vld [vmem:[%s1045_s2 + $0x10] sm:$0xff] }
  0xf7   :  { %v601_v41 = vpop.f32.mrf.mxu1 }
  0xf8   :  { %v558_v44 = vpop.f32.mrf.mxu0 }
  0xf9   :  { %v602_v45 = vpop.f32.mrf.mxu1  ;;  %v559_v48 = vadd.f32 %v558_v44, %v557_v40  ;;  %v463_v44 = vld [vmem:[%s1046_s3 + $0x8] sm:$0xff] }
  0xfa   :  { %v603_v49 = vadd.f32 %v602_v45, %v601_v41  ;;  %v464_v45 = vld [vmem:[%s1046_s3 + $0x10] sm:$0xff] }
  0xfc   :  { %v634_v52 = vpop.f32.mrf.mxu0  ;;  %v293_v54 = vadd.f32 %v603_v49, %v559_v48 }
  0xfd   :  { %v637_v53 = vpop.f32.mrf.mxu1  ;;  %v368_v62 = vadd.f32 %v634_v52, %v283_v59  ;;  %v465_v52 = vld [vmem:[%s1046_s3 + $0x18] sm:$0xff] }
  0xfe   :  { %v362_v57 = vpop.f32.mrf.mxu0  ;;  %v378_v63 = vadd.f32 %v637_v53, %v293_v54 }
  0xff   :  { %v372_v58 = vpop.f32.mrf.mxu1  ;;  %v363_v60 = vadd.f32 %v362_v57, %v278_v55  ;;  %v385_v3 = vsel %vm381_vm1, %v368_v62, 0.0 }
 0x100   :  { %v373_v61 = vadd.f32 %v372_v58, %v288_v56  ;;  %v391_v2 = vsel %vm381_vm1, %v378_v63, 0.0  ;;  %v495_v56 = vstv %s1047_s4 }
 0x101   :  { %v382_v1 = vsel %vm381_vm1, %v363_v60, 0.0 }
 0x102   :  { %v388_v0 = vsel %vm381_vm1, %v373_v61, 0.0  ;;  %383 = vadd.xlane.f32.xlu0 %v382_v1 }
 0x103   :  { %389 = vadd.xlane.f32.xlu1 %v388_v0 }
 0x106   :  { %386 = vadd.xlane.f32.xlu0 %v385_v3 }
 0x107   :  { %392 = vadd.xlane.f32.xlu1 %v391_v2 }
 0x18b   :  { %v384_v5 = vpop.xlane.xlu0 %383 }
 0x18c   :  { %v390_v4 = vpop.xlane.xlu1 %389  ;;  %v394_v7 = vmul.f32 0.125, %v384_v5 }
 0x18d   :  { %v396_v6 = vmul.f32 0.125, %v390_v4 }
 0x18e   :  { %v978_v9 = vsub.f32 %v363_v60, %v394_v7 }
 0x18f   :  { %v976_v8 = vsub.f32 %v373_v61, %v396_v6  ;;  %v387_v11 = vpop.xlane.xlu0 %386 }
 0x190   :  { %v393_v10 = vpop.xlane.xlu1 %392  ;;  %v395_v13 = vmul.f32 0.125, %v387_v11  ;;  %v402_v14 = vmul.f32 %v978_v9, %v978_v9 }
 0x191   :  { %v397_v12 = vmul.f32 0.125, %v393_v10  ;;  %v404_v18 = vmul.f32 %v976_v8, %v976_v8 }
 0x192   :  { %v984_v16 = vsub.f32 %v368_v62, %v395_v13  ;;  %v406_v17 = vsel %vm381_vm1, %v402_v14, 0.0 }
 0x193   :  { %v982_v15 = vsub.f32 %v378_v63, %v397_v12  ;;  %407 = vadd.xlane.f32.xlu0 %v406_v17  ;;  %v412_v20 = vsel %vm381_vm1, %v404_v18, 0.0 }
 0x194   :  { %v403_v19 = vmul.f32 %v984_v16, %v984_v16 }
 0x195   :  { %v405_v22 = vmul.f32 %v982_v15, %v982_v15 }
 0x196   :  { %v409_v21 = vsel %vm381_vm1, %v403_v19, 0.0 }
 0x197   :  { %413 = vadd.xlane.f32.xlu0 %v412_v20  ;;  %410 = vadd.xlane.f32.xlu1 %v409_v21  ;;  %v415_v23 = vsel %vm381_vm1, %v405_v22, 0.0 }
 0x19b   :  { %416 = vadd.xlane.f32.xlu1 %v415_v23 }
 0x21c   :  { %v408_v25 = vpop.xlane.xlu0 %407 }
 0x21d   :  { %v418_v26 = vmul.f32 0.125, %v408_v25 }
 0x21f   :  { %v426_v27 = vadd.f32 1e-05, %v418_v26 }
 0x220   :  { %v411_v28 = vpop.xlane.xlu1 %410  ;;  %v414_v31 = vpop.xlane.xlu0 %413 }
 0x221   :  { %657 = vrsqrt.f32 %v426_v27  ;;  %v419_v29 = vmul.f32 0.125, %v411_v28  ;;  %v420_v32 = vmul.f32 0.125, %v414_v31 }
 0x223   :  { %v427_v30 = vadd.f32 1e-05, %v419_v29  ;;  %v428_v36 = vadd.f32 1e-05, %v420_v32 }
 0x224   :  { %v417_v33 = vpop.xlane.xlu1 %416 }
 0x225   :  { %659 = vrsqrt.f32 %v427_v30  ;;  %v421_v37 = vmul.f32 0.125, %v417_v33 }
 0x226   :  { %661 = vrsqrt.f32 %v428_v36 }
 0x227   :  { %v429_v41 = vadd.f32 1e-05, %v421_v37 }
 0x229   :  { %663 = vrsqrt.f32 %v429_v41 }
 0x22e   :  { %v658_v35 = vpop.eup %657 }
 0x22f   :  { %v434_v38 = vmul.f32 %v658_v35, %v422_v34 }
 0x231   :  { %440 = vperm.xlu0 %655, %v434_v38  }
 0x232   :  { %v660_v40 = vpop.eup %659 }
 0x233   :  { %v435_v42 = vmul.f32 %v660_v40, %v423_v39  ;;  %v662_v46 = vpop.eup %661 }
 0x234   :  { %v436_v48 = vmul.f32 %v662_v46, %v424_v47 }
 0x235   :  { %445 = vperm.xlu1 %656, %v435_v42  }
 0x236   :  { %v664_v49 = vpop.eup %663 }
 0x237   :  { %v437_v51 = vmul.f32 %v664_v49, %v425_v50 }
 0x239   :  { %468 = vperm.xlu1 %656, %v462_v43  }
 0x23d   :  { %473 = vperm.xlu1 %656, %v463_v44  }
 0x241   :  { %478 = vperm.xlu1 %656, %v464_v45  }
 0x245   :  { %450 = vperm.xlu1 %656, %v436_v48  }
 0x249   :  { %455 = vperm.xlu1 %656, %v437_v51  }
 0x24d   :  { %483 = vperm.xlu1 %656, %v465_v52  }
 0x2ac   :  { %v441_v53 = vpop.permute.xlu0 %440 }
 0x2ad   :  { %v458_v55 = vmul.f32 %v441_v53, %v978_v9 }
 0x2b0   :  { %v446_v54 = vpop.permute.xlu1 %445 }
 0x2b1   :  { %v459_v59 = vmul.f32 %v446_v54, %v984_v16 }
 0x2b4   :  { %v469_v57 = vpop.permute.xlu1 %468 }
 0x2b5   :  { %v486_v58 = vadd.f32 %v469_v57, %v458_v55 }
 0x2b7   :  { %vm491_vm2 = vcmp.ge.f32.partialorder %v486_v58, 0.0  ;;  %v496_v60 = vmul.f32 %v495_v56, %v486_v58 }
 0x2b8   :  { %v474_v61 = vpop.permute.xlu1 %473 }
 0x2b9   :  { %v500_v62 = vsel %vm491_vm2, %v486_v58, %v496_v60  ;;  %v487_v63 = vadd.f32 %v474_v61, %v459_v59 }
 0x2ba   :  { %504 = vst.msk [vmem:[%s1048_s5] sm:$0xff] %vm381_vm1, %v500_v62 }
 0x2bb   :  { %vm492_vm3 = vcmp.ge.f32.partialorder %v487_v63, 0.0  ;;  %v497_v0 = vmul.f32 %v495_v56, %v487_v63 }
 0x2bc   :  { %v479_v1 = vpop.permute.xlu1 %478 }
 0x2bd   :  { %v501_v2 = vsel %vm492_vm3, %v487_v63, %v497_v0 }
 0x2be   :  { %505 = vst.msk [vmem:[%s1048_s5 + $0x8] sm:$0xff] %vm381_vm1, %v501_v2 }
 0x2c0   :  { %v451_v3 = vpop.permute.xlu1 %450 }
 0x2c1   :  { %v460_v4 = vmul.f32 %v451_v3, %v976_v8 }
 0x2c3   :  { %v488_v5 = vadd.f32 %v479_v1, %v460_v4 }
 0x2c4   :  { %v456_v6 = vpop.permute.xlu1 %455 }
 0x2c5   :  { %vm493_vm4 = vcmp.ge.f32.partialorder %v488_v5, 0.0  ;;  %v498_v7 = vmul.f32 %v495_v56, %v488_v5  ;;  %v461_v10 = vmul.f32 %v456_v6, %v982_v15 }
 0x2c7   :  { %v502_v9 = vsel %vm493_vm4, %v488_v5, %v498_v7 }
 0x2c8   :  { %506 = vst.msk [vmem:[%s1048_s5 + $0x10] sm:$0xff] %vm381_vm1, %v502_v9  ;;  %v484_v11 = vpop.permute.xlu1 %483 }
 0x2c9   :  { %v489_v12 = vadd.f32 %v484_v11, %v461_v10 }
 0x2cb   :  { %vm494_vm5 = vcmp.ge.f32.partialorder %v489_v12, 0.0  ;;  %v499_v13 = vmul.f32 %v495_v56, %v489_v12 }
 0x2cd   :  { %v503_v14 = vsel %vm494_vm5, %v489_v12, %v499_v13 }
 0x2ce   :  { %507 = vst.msk [vmem:[%s1048_s5 + $0x18] sm:$0xff] %vm381_vm1, %v503_v14 }

// kernel: unet5_forward.16
= control target key start
LH: loop header
LB: loop body
LE: loop exit
PB: predicated region body
PF: predicated region fallthrough
CT: control target
= control target key end

     0   :  { %vm103_vm0 = vcmask 523264   ;;  %vm335_vm1 = vcmask 261120   ;;  %s824_s0 = inlined_call_operand.vmem [shape: f32[576,32], index: 0, kind: input, shape index: {}]   ;;  %s825_s1 = inlined_call_operand.vmem [shape: f32[16,576], index: 1, kind: input, shape index: {}]   ;;  %s826_s2 = inlined_call_operand.vmem [shape: f32[16,1], index: 2, kind: input, shape index: {}]   ;;  %s827_s3 = inlined_call_operand.vmem [shape: f32[16,1], index: 3, kind: input, shape index: {}]   ;;  %s828_s4 = inlined_call_operand.<no memory space> [shape: f32[1], index: 4, kind: input, shape index: {}]   ;;  %s829_s5 = inlined_call_operand.vmem [shape: f32[16,32], index: 5, kind: output, shape index: {}]  }
   0x1   :  { %v62_v0 = vld [vmem:[%s824_s0 + $0xf8] sm:$0xff]  ;;  %v61_v4 = vld [vmem:[%s824_s0 + $0xf0] sm:$0xff]  ;;  %v60_v8 = vld [vmem:[%s824_s0 + $0xe8] sm:$0xff] }
   0x2   :  { %v94_v1 = vld [vmem:[%s824_s0 + $0x1f8] sm:$0xff]  ;;  %406 = vmatprep.subr.mxu0 %v62_v0  ;;  %v93_v5 = vld [vmem:[%s824_s0 + $0x1f0] sm:$0xff]  ;;  %v92_v9 = vld [vmem:[%s824_s0 + $0x1e8] sm:$0xff] }
   0x3   :  { %v46_v2 = vld [vmem:[%s824_s0 + $0x78] sm:$0xff]  ;;  %444 = vmatprep.subr.mxu1 %v94_v1  ;;  %v45_v6 = vld [vmem:[%s824_s0 + $0x70] sm:$0xff]  ;;  %v44_v10 = vld [vmem:[%s824_s0 + $0x68] sm:$0xff] }
   0x4   :  { %v78_v3 = vld [vmem:[%s824_s0 + $0x178] sm:$0xff]  ;;  %407 = vmatpush3.msra.mxu0 %v46_v2  ;;  %v77_v7 = vld [vmem:[%s824_s0 + $0x170] sm:$0xff]  ;;  %v76_v11 = vld [vmem:[%s824_s0 + $0x168] sm:$0xff] }
   0x5   :  { %445 = vmatpush3.msra.mxu1 %v78_v3  ;;  %408 = vmatprep.subr.mxu0 %v61_v4  ;;  %v59_v12 = vld [vmem:[%s824_s0 + $0xe0] sm:$0xff]  ;;  %v58_v16 = vld [vmem:[%s824_s0 + $0xd8] sm:$0xff]  ;;  %v57_v20 = vld [vmem:[%s824_s0 + $0xd0] sm:$0xff] }
   0x6   :  { %446 = vmatprep.subr.mxu1 %v93_v5  ;;  %409 = vmatpush3.msra.mxu0 %v45_v6  ;;  %v91_v13 = vld [vmem:[%s824_s0 + $0x1e0] sm:$0xff]  ;;  %v90_v17 = vld [vmem:[%s824_s0 + $0x1d8] sm:$0xff]  ;;  %v89_v21 = vld [vmem:[%s824_s0 + $0x1d0] sm:$0xff] }
   0x7   :  { %447 = vmatpush3.msra.mxu1 %v77_v7  ;;  %410 = vmatprep.subr.mxu0 %v60_v8  ;;  %v43_v14 = vld [vmem:[%s824_s0 + $0x60] sm:$0xff]  ;;  %v42_v18 = vld [vmem:[%s824_s0 + $0x58] sm:$0xff]  ;;  %v41_v22 = vld [vmem:[%s824_s0 + $0x50] sm:$0xff] }
   0x8   :  { %448 = vmatprep.subr.mxu1 %v92_v9  ;;  %v75_v15 = vld [vmem:[%s824_s0 + $0x160] sm:$0xff]  ;;  %411 = vmatpush3.msra.mxu0 %v44_v10  ;;  %v74_v19 = vld [vmem:[%s824_s0 + $0x158] sm:$0xff]  ;;  %v73_v23 = vld [vmem:[%s824_s0 + $0x150] sm:$0xff] }
   0x9   :  { %449 = vmatpush3.msra.mxu1 %v76_v11  ;;  %412 = vmatprep.subr.mxu0 %v59_v12  ;;  %v56_v24 = vld [vmem:[%s824_s0 + $0xc8] sm:$0xff]  ;;  %v55_v28 = vld [vmem:[%s824_s0 + $0xc0] sm:$0xff]  ;;  %v54_v32 = vld [vmem:[%s824_s0 + $0xb8] sm:$0xff] }
   0xa   :  { %450 = vmatprep.subr.mxu1 %v91_v13  ;;  %413 = vmatpush3.msra.mxu0 %v43_v14  ;;  %v88_v25 = vld [vmem:[%s824_s0 + $0x1c8] sm:$0xff]  ;;  %v87_v29 = vld [vmem:[%s824_s0 + $0x1c0] sm:$0xff]  ;;  %v86_v33 = vld [vmem:[%s824_s0 + $0x1b8] sm:$0xff] }
   0xb   :  { %451 = vmatpush3.msra.mxu1 %v75_v15  ;;  %414 = vmatprep.subr.mxu0 %v58_v16  ;;  %v40_v26 = vld [vmem:[%s824_s0 + $0x48] sm:$0xff]  ;;  %v39_v30 = vld [vmem:[%s824_s0 + $0x40] sm:$0xff]  ;;  %v38_v34 = vld [vmem:[%s824_s0 + $0x38] sm:$0xff] }
   0xc   :  { %452 = vmatprep.subr.mxu1 %v90_v17  ;;  %415 = vmatpush3.msra.mxu0 %v42_v18  ;;  %v72_v27 = vld [vmem:[%s824_s0 + $0x148] sm:$0xff]  ;;  %v71_v31 = vld [vmem:[%s824_s0 + $0x140] sm:$0xff]  ;;  %v70_v35 = vld [vmem:[%s824_s0 + $0x138] sm:$0xff] }
   0xd   :  { %453 = vmatpush3.msra.mxu1 %v74_v19  ;;  %416 = vmatprep.subr.mxu0 %v57_v20  ;;  %v53_v36 = vld [vmem:[%s824_s0 + $0xb0] sm:$0xff]  ;;  %v52_v40 = vld [vmem:[%s824_s0 + $0xa8] sm:$0xff]  ;;  %v51_v44 = vld [vmem:[%s824_s0 + $0xa0] sm:$0xff] }
   0xe   :  { %454 = vmatprep.subr.mxu1 %v89_v21  ;;  %417 = vmatpush3.msra.mxu0 %v41_v22  ;;  %v85_v37 = vld [vmem:[%s824_s0 + $0x1b0] sm:$0xff]  ;;  %v84_v41 = vld [vmem:[%s824_s0 + $0x1a8] sm:$0xff]  ;;  %v83_v45 = vld [vmem:[%s824_s0 + $0x1a0] sm:$0xff] }
   0xf   :  { %455 = vmatpush3.msra.mxu1 %v73_v23  ;;  %418 = vmatprep.subr.mxu0 %v56_v24  ;;  %v37_v38 = vld [vmem:[%s824_s0 + $0x30] sm:$0xff]  ;;  %v36_v42 = vld [vmem:[%s824_s0 + $0x28] sm:$0xff]  ;;  %v35_v46 = vld [vmem:[%s824_s0 + $0x20] sm:$0xff] }
  0x10   :  { %456 = vmatprep.subr.mxu1 %v88_v25  ;;  %419 = vmatpush3.msra.mxu0 %v40_v26  ;;  %v69_v39 = vld [vmem:[%s824_s0 + $0x130] sm:$0xff]  ;;  %v68_v43 = vld [vmem:[%s824_s0 + $0x128] sm:$0xff]  ;;  %v67_v47 = vld [vmem:[%s824_s0 + $0x120] sm:$0xff] }
  0x11   :  { %457 = vmatpush3.msra.mxu1 %v72_v27  ;;  %420 = vmatprep.subr.mxu0 %v55_v28  ;;  %v50_v48 = vld [vmem:[%s824_s0 + $0x98] sm:$0xff]  ;;  %v49_v52 = vld [vmem:[%s824_s0 + $0x90] sm:$0xff]  ;;  %v48_v56 = vld [vmem:[%s824_s0 + $0x88] sm:$0xff] }
  0x12   :  { %458 = vmatprep.subr.mxu1 %v87_v29  ;;  %421 = vmatpush3.msra.mxu0 %v39_v30  ;;  %v82_v49 = vld [vmem:[%s824_s0 + $0x198] sm:$0xff]  ;;  %v81_v53 = vld [vmem:[%s824_s0 + $0x190] sm:$0xff]  ;;  %v80_v57 = vld [vmem:[%s824_s0 + $0x188] sm:$0xff] }
  0x13   :  { %459 = vmatpush3.msra.mxu1 %v71_v31  ;;  %422 = vmatprep.subr.mxu0 %v54_v32  ;;  %v34_v50 = vld [vmem:[%s824_s0 + $0x18] sm:$0xff]  ;;  %v33_v54 = vld [vmem:[%s824_s0 + $0x10] sm:$0xff]  ;;  %v32_v58 = vld [vmem:[%s824_s0 + $0x8] sm:$0xff] }
  0x14   :  { %460 = vmatprep.subr.mxu1 %v86_v33  ;;  %423 = vmatpush3.msra.mxu0 %v38_v34  ;;  %v66_v51 = vld [vmem:[%s824_s0 + $0x118] sm:$0xff]  ;;  %v65_v55 = vld [vmem:[%s824_s0 + $0x110] sm:$0xff]  ;;  %v64_v59 = vld [vmem:[%s824_s0 + $0x108] sm:$0xff] }
  0x15   :  { %461 = vmatpush3.msra.mxu1 %v70_v35  ;;  %424 = vmatprep.subr.mxu0 %v53_v36  ;;  %v47_v60 = vld [vmem:[%s824_s0 + $0x80] sm:$0xff]  ;;  %v22_v63 = vld [vmem:[%s825_s1 + $0x8] sm:$0xff]  ;;  %v24_v1 = vld [vmem:[%s825_s1 + $0x18] sm:$0xff] }
  0x16   :  { %462 = vmatprep.subr.mxu1 %v85_v37  ;;  %425 = vmatpush3.msra.mxu0 %v37_v38  ;;  %v79_v61 = vld [vmem:[%s824_s0 + $0x180] sm:$0xff]  ;;  %v23_v3 = vld [vmem:[%s825_s1 + $0x10] sm:$0xff]  ;;  %v102_v4 = vld [vmem:[%s824_s0 + $0x238] sm:$0xff] }
  0x17   :  { %463 = vmatpush3.msra.mxu1 %v69_v39  ;;  %426 = vmatprep.subr.mxu0 %v52_v40  ;;  %v31_v62 = vld [vmem:[%s824_s0] sm:$0xff]  ;;  %v27_v5 = vld [vmem:[%s825_s1 + $0x30] sm:$0xff]  ;;  %v28_v8 = vld [vmem:[%s825_s1 + $0x38] sm:$0xff] }
  0x18   :  { %464 = vmatprep.subr.mxu1 %v84_v41  ;;  %427 = vmatpush3.msra.mxu0 %v36_v42  ;;  %v63_v0 = vld [vmem:[%s824_s0 + $0x100] sm:$0xff]  ;;  %v101_v7 = vld [vmem:[%s824_s0 + $0x230] sm:$0xff]  ;;  %v100_v9 = vld [vmem:[%s824_s0 + $0x228] sm:$0xff] }
  0x19   :  { %465 = vmatpush3.msra.mxu1 %v68_v43  ;;  %428 = vmatprep.subr.mxu0 %v51_v44  ;;  %v21_v2 = vld [vmem:[%s825_s1] sm:$0xff]  ;;  %v26_v10 = vld [vmem:[%s825_s1 + $0x28] sm:$0xff]  ;;  %v98_v13 = vld [vmem:[%s824_s0 + $0x218] sm:$0xff] }
  0x1a   :  { %466 = vmatprep.subr.mxu1 %v83_v45  ;;  %429 = vmatpush3.msra.mxu0 %v35_v46  ;;  %v29_v6 = vld [vmem:[%s825_s1 + $0x40] sm:$0xff]  ;;  %v97_v14 = vld [vmem:[%s824_s0 + $0x210] sm:$0xff]  ;;  %v96_v15 = vld [vmem:[%s824_s0 + $0x208] sm:$0xff] }
  0x1b   :  { %467 = vmatpush3.msra.mxu1 %v67_v47  ;;  %430 = vmatprep.subr.mxu0 %v50_v48  ;;  %v25_v11 = vld [vmem:[%s825_s1 + $0x20] sm:$0xff]  ;;  %v30_v17 = vld [vmem:[%s825_s1 + $0x48] sm:$0xff]  ;;  %v518_v48 = vmov 0  }
  0x1c   :  { %468 = vmatprep.subr.mxu1 %v82_v49  ;;  %431 = vmatpush3.msra.mxu0 %v34_v50  ;;  %v99_v12 = vld [vmem:[%s824_s0 + $0x220] sm:$0xff] }
  0x1d   :  { %469 = vmatpush3.msra.mxu1 %v66_v51  ;;  %432 = vmatprep.subr.mxu0 %v49_v52  ;;  %v95_v16 = vld [vmem:[%s824_s0 + $0x200] sm:$0xff] }
  0x1e   :  { %470 = vmatprep.subr.mxu1 %v81_v53  ;;  %433 = vmatpush3.msra.mxu0 %v33_v54 }
  0x1f   :  { %471 = vmatpush3.msra.mxu1 %v65_v55  ;;  %434 = vmatprep.subr.mxu0 %v48_v56  ;;  %v356_v55 = vld [vmem:[%s826_s2] sm:$0xff] }
  0x20   :  { %472 = vmatprep.subr.mxu1 %v80_v57  ;;  %435 = vmatpush3.msra.mxu0 %v32_v58  ;;  %v357_v58 = vld [vmem:[%s826_s2 + $0x8] sm:$0xff] }
  0x21   :  { %473 = vmatpush3.msra.mxu1 %v64_v59  ;;  %436 = vmatprep.subr.mxu0 %v47_v60 }
  0x22   :  { %474 = vmatprep.subr.mxu1 %v79_v61  ;;  %437 = vmatpush3.msra.mxu0 %v31_v62  ;;  %v376_v61 = vld [vmem:[%s827_s3] sm:$0xff]  ;;  %v377_v62 = vld [vmem:[%s827_s3 + $0x8] sm:$0xff] }
  0x23   :  { %174 = vmatprep.mubr.f32.mxu0 %v22_v63  ;;  %475 = vmatpush3.msra.mxu1 %v63_v0 }
  0x24   :  { %249 = vmatprep.mubr.f32.mxu1 %v24_v1  ;;  %175 = vmatmul.mubr.f32.vlgmr.msra.gmra.mxu0 %v21_v2  ;;  %v393_v2 = vstv %s828_s4 }
  0x25   :  { %250 = vmatmul.mubr.f32.vlgmr.msra.gmra.mxu1 %v23_v3  ;;  %492 = vmatprep.subr.mxu0 %v102_v4 }
  0x26   :  { %179 = vmatprep.mubr.f32.mxu0 %v27_v5  ;;  %493 = vmatpush3.msra.mxu0 %v102_v4 }
  0x27   :  { %254 = vmatprep.mubr.f32.mxu1 %v29_v6  ;;  %494 = vmatprep.subr.mxu0 %v101_v7 }
  0x28   :  { %495 = vmatpush3.msra.mxu0 %v101_v7  ;;  %512 = vset.pattern.permute.xlu0 %v518_v48 }
  0x29   :  { %255 = vmatmul.mubr.f32.gmra.mxu1 %v28_v8  ;;  %496 = vmatprep.subr.mxu0 %v100_v9 }
  0x2a   :  { %180 = vmatmul.mubr.f32.gmra.mxu0 %v26_v10  ;;  %513 = vset.pattern.permute.xlu1 %v518_v48 }
  0x2b   :  { %497 = vmatpush3.msra.mxu0 %v100_v9  ;;  %508 = vmatprep.mubr.msk.f32.mxu0 %vm103_vm0, %v25_v11 }
  0x2c   :  { %498 = vmatprep.subr.mxu0 %v99_v12 }
  0x2d   :  { %499 = vmatpush3.msra.mxu0 %v99_v12 }
  0x2e   :  { %500 = vmatprep.subr.mxu0 %v98_v13 }
  0x2f   :  { %501 = vmatpush3.msra.mxu0 %v98_v13 }
  0x30   :  { %502 = vmatprep.subr.mxu0 %v97_v14 }
  0x31   :  { %503 = vmatpush3.msra.mxu0 %v97_v14 }
  0x32   :  { %504 = vmatprep.subr.mxu0 %v96_v15 }
  0x33   :  { %505 = vmatpush3.msra.mxu0 %v96_v15 }
  0x34   :  { %506 = vmatprep.subr.mxu0 %v95_v16 }
  0x35   :  { %507 = vmatpush3.msra.mxu0 %v95_v16 }
  0x36   :  { %509 = vmatmul.mubr.msk.f32.vlgmr.msra.gmra.mxu0 %vm103_vm0, %v30_v17 }
  0xe4   :  { %v438_v18 = vpop.f32.mrf.mxu0 }
  0xe5   :  { %v476_v19 = vpop.f32.mrf.mxu1 }
  0xe6   :  { %v439_v20 = vpop.f32.mrf.mxu0 }
  0xe7   :  { %v477_v21 = vpop.f32.mrf.mxu1  ;;  %v440_v26 = vadd.f32 %v439_v20, %v438_v18 }
  0xe8   :  { %v478_v27 = vadd.f32 %v477_v21, %v476_v19 }
  0xe9   :  { %v479_v23 = vpop.f32.mrf.mxu1 }
  0xea   :  { %v441_v22 = vpop.f32.mrf.mxu0  ;;  %v252_v32 = vadd.f32 %v478_v27, %v440_v26 }
  0xeb   :  { %v480_v25 = vpop.f32.mrf.mxu1 }
  0xec   :  { %v442_v24 = vpop.f32.mrf.mxu0  ;;  %v481_v29 = vadd.f32 %v480_v25, %v479_v23 }
  0xed   :  { %v443_v28 = vadd.f32 %v442_v24, %v441_v22 }
  0xef   :  { %v257_v31 = vadd.f32 %v481_v29, %v443_v28 }
  0xf6   :  { %v510_v30 = vpop.f32.mrf.mxu0 }
  0xf7   :  { %v332_v35 = vadd.f32 %v510_v30, %v257_v31 }
  0xf8   :  { %v326_v33 = vpop.f32.mrf.mxu0 }
  0xf9   :  { %v327_v34 = vadd.f32 %v326_v33, %v252_v32  ;;  %v339_v37 = vsel %vm335_vm1, %v332_v35, 0.0 }
  0xfb   :  { %v336_v36 = vsel %vm335_vm1, %v327_v34, 0.0 }
  0xfc   :  { %337 = vadd.xlane.f32.xlu0 %v336_v36 }
 0x100   :  { %340 = vadd.xlane.f32.xlu0 %v339_v37 }
 0x185   :  { %v338_v38 = vpop.xlane.xlu0 %337 }
 0x186   :  { %v342_v39 = vmul.f32 0.03125, %v338_v38 }
 0x188   :  { %v344_v40 = vsub.f32 %v327_v34, %v342_v39 }
 0x189   :  { %v341_v41 = vpop.xlane.xlu0 %340 }
 0x18a   :  { %v343_v42 = vmul.f32 0.03125, %v341_v41  ;;  %v346_v43 = vmul.f32 %v344_v40, %v344_v40 }
 0x18c   :  { %v345_v44 = vsub.f32 %v332_v35, %v343_v42  ;;  %v348_v45 = vsel %vm335_vm1, %v346_v43, 0.0 }
 0x18d   :  { %349 = vadd.xlane.f32.xlu1 %v348_v45 }
 0x18e   :  { %v347_v46 = vmul.f32 %v345_v44, %v345_v44 }
 0x190   :  { %v351_v47 = vsel %vm335_vm1, %v347_v46, 0.0 }
 0x191   :  { %352 = vadd.xlane.f32.xlu1 %v351_v47 }
 0x216   :  { %v350_v49 = vpop.xlane.xlu1 %349 }
 0x217   :  { %v354_v50 = vmul.f32 0.03125, %v350_v49 }
 0x219   :  { %v358_v51 = vadd.f32 1e-05, %v354_v50 }
 0x21a   :  { %v353_v52 = vpop.xlane.xlu1 %352 }
 0x21b   :  { %514 = vrsqrt.f32 %v358_v51  ;;  %v355_v53 = vmul.f32 0.03125, %v353_v52 }
 0x21d   :  { %v359_v54 = vadd.f32 1e-05, %v355_v53 }
 0x21f   :  { %516 = vrsqrt.f32 %v359_v54 }
 0x228   :  { %v515_v56 = vpop.eup %514 }
 0x229   :  { %v362_v57 = vmul.f32 %v515_v56, %v356_v55 }
 0x22b   :  { %366 = vperm.xlu0 %512, %v362_v57  }
 0x22c   :  { %v517_v59 = vpop.eup %516 }
 0x22d   :  { %v363_v60 = vmul.f32 %v517_v59, %v357_v58 }
 0x22f   :  { %371 = vperm.xlu1 %513, %v363_v60  }
 0x233   :  { %380 = vperm.xlu1 %513, %v376_v61  }
 0x237   :  { %385 = vperm.xlu1 %513, %v377_v62  }
 0x2a6   :  { %v367_v63 = vpop.permute.xlu0 %366 }
 0x2a7   :  { %v374_v1 = vmul.f32 %v367_v63, %v344_v40 }
 0x2aa   :  { %v372_v0 = vpop.permute.xlu1 %371 }
 0x2ab   :  { %v375_v5 = vmul.f32 %v372_v0, %v345_v44 }
 0x2ae   :  { %v381_v3 = vpop.permute.xlu1 %380 }
 0x2af   :  { %v388_v4 = vadd.f32 %v381_v3, %v374_v1 }
 0x2b1   :  { %vm391_vm2 = vcmp.ge.f32.partialorder %v388_v4, 0.0  ;;  %v394_v6 = vmul.f32 %v393_v2, %v388_v4 }
 0x2b2   :  { %v386_v7 = vpop.permute.xlu1 %385 }
 0x2b3   :  { %v396_v8 = vsel %vm391_vm2, %v388_v4, %v394_v6  ;;  %v389_v9 = vadd.f32 %v386_v7, %v375_v5 }
 0x2b4   :  { %398 = vst.msk [vmem:[%s829_s5] sm:$0xff] %vm335_vm1, %v396_v8 }
 0x2b5   :  { %vm392_vm3 = vcmp.ge.f32.partialorder %v389_v9, 0.0  ;;  %v395_v10 = vmul.f32 %v393_v2, %v389_v9 }
 0x2b7   :  { %v397_v11 = vsel %vm392_vm3, %v389_v9, %v395_v10 }
 0x2b8   :  { %399 = vst.msk [vmem:[%s829_s5 + $0x8] sm:$0xff] %vm335_vm1, %v397_v11 }

// kernel: unet5_forward.17
= control target key start
LH: loop header
LB: loop body
LE: loop exit
PB: predicated region body
PF: predicated region fallthrough
CT: control target
= control target key end

     0   :  { %v298_v3 = vmov 0.0   ;;  %vm299_vm0 = vmmov 0   ;;  %vm60_vm1 = vcmask 261120   ;;  %v300_v50 = vmov 0   ;;  %s460_s0 = inlined_call_operand.vmem [shape: f32[288,128], index: 0, kind: input, shape index: {}]   ;;  %s461_s1 = inlined_call_operand.vmem [shape: f32[8,288], index: 1, kind: input, shape index: {}]   ;;  %s462_s2 = inlined_call_operand.vmem [shape: f32[8,1], index: 2, kind: input, shape index: {}]   ;;  %s463_s3 = inlined_call_operand.vmem [shape: f32[8,1], index: 3, kind: input, shape index: {}]   ;;  %s464_s4 = inlined_call_operand.<no memory space> [shape: f32[1], index: 4, kind: input, shape index: {}]   ;;  %s465_s5 = inlined_call_operand.vmem [shape: f32[8,128], index: 5, kind: output, shape index: {}]  }
   0x1   :  { %v55_v0 = vld [vmem:[%s460_s0 + $0xf8] sm:$0xff]  ;;  %v54_v2 = vld [vmem:[%s460_s0 + $0xf0] sm:$0xff]  ;;  %280 = vmatprep.subr.mxu1 %v298_v3  ;;  %288 = vmatprep.mubr.msk.f32.mxu1 %vm299_vm0, %v298_v3  ;;  %v53_v5 = vld [vmem:[%s460_s0 + $0xe8] sm:$0xff]  ;;  %v231_v60 = vstv %s464_s4 }
   0x2   :  { %v39_v1 = vld [vmem:[%s460_s0 + $0x78] sm:$0xff]  ;;  %240 = vmatprep.subr.mxu0 %v55_v0  ;;  %v38_v4 = vld [vmem:[%s460_s0 + $0x70] sm:$0xff]  ;;  %v37_v6 = vld [vmem:[%s460_s0 + $0x68] sm:$0xff]  ;;  %294 = vset.pattern.permute.xlu1 %v300_v50 }
   0x3   :  { %241 = vmatpush3.msra.mxu0 %v39_v1  ;;  %v52_v7 = vld [vmem:[%s460_s0 + $0xe0] sm:$0xff]  ;;  %v51_v9 = vld [vmem:[%s460_s0 + $0xd8] sm:$0xff]  ;;  %v50_v11 = vld [vmem:[%s460_s0 + $0xd0] sm:$0xff]  ;;  %295 = vset.pattern.permute.xlu0 %v300_v50 }
   0x4   :  { %242 = vmatprep.subr.mxu0 %v54_v2  ;;  %v36_v8 = vld [vmem:[%s460_s0 + $0x60] sm:$0xff]  ;;  %v35_v10 = vld [vmem:[%s460_s0 + $0x58] sm:$0xff]  ;;  %v34_v12 = vld [vmem:[%s460_s0 + $0x50] sm:$0xff] }
   0x5   :  { %243 = vmatpush3.msra.mxu0 %v38_v4  ;;  %v59_v13 = vld [vmem:[%s460_s0 + $0x118] sm:$0xff]  ;;  %v49_v14 = vld [vmem:[%s460_s0 + $0xc8] sm:$0xff]  ;;  %v58_v15 = vld [vmem:[%s460_s0 + $0x110] sm:$0xff] }
   0x6   :  { %244 = vmatprep.subr.mxu0 %v53_v5  ;;  %281 = vmatpush3.msra.mxu1 %v59_v13  ;;  %v33_v16 = vld [vmem:[%s460_s0 + $0x48] sm:$0xff]  ;;  %v48_v18 = vld [vmem:[%s460_s0 + $0xc0] sm:$0xff]  ;;  %v47_v21 = vld [vmem:[%s460_s0 + $0xb8] sm:$0xff] }
   0x7   :  { %245 = vmatpush3.msra.mxu0 %v37_v6  ;;  %282 = vmatprep.subr.mxu1 %v298_v3  ;;  %v22_v17 = vld [vmem:[%s461_s1 + $0x8] sm:$0xff]  ;;  %v32_v20 = vld [vmem:[%s460_s0 + $0x40] sm:$0xff]  ;;  %v31_v23 = vld [vmem:[%s460_s0 + $0x38] sm:$0xff] }
   0x8   :  { %246 = vmatprep.subr.mxu0 %v52_v7  ;;  %283 = vmatpush3.msra.mxu1 %v58_v15  ;;  %v57_v19 = vld [vmem:[%s460_s0 + $0x108] sm:$0xff]  ;;  %v56_v22 = vld [vmem:[%s460_s0 + $0x100] sm:$0xff]  ;;  %v23_v24 = vld [vmem:[%s461_s1 + $0x10] sm:$0xff] }
   0x9   :  { %247 = vmatpush3.msra.mxu0 %v36_v8  ;;  %284 = vmatprep.subr.mxu1 %v298_v3  ;;  %v46_v25 = vld [vmem:[%s460_s0 + $0xb0] sm:$0xff]  ;;  %v45_v27 = vld [vmem:[%s460_s0 + $0xa8] sm:$0xff]  ;;  %v44_v29 = vld [vmem:[%s460_s0 + $0xa0] sm:$0xff] }
   0xa   :  { %248 = vmatprep.subr.mxu0 %v51_v9  ;;  %128 = vmatprep.mubr.f32.mxu0 %v22_v17  ;;  %v30_v26 = vld [vmem:[%s460_s0 + $0x30] sm:$0xff]  ;;  %v29_v28 = vld [vmem:[%s460_s0 + $0x28] sm:$0xff]  ;;  %v28_v30 = vld [vmem:[%s460_s0 + $0x20] sm:$0xff] }
   0xb   :  { %249 = vmatpush3.msra.mxu0 %v35_v10  ;;  %285 = vmatpush3.msra.mxu1 %v57_v19  ;;  %v43_v31 = vld [vmem:[%s460_s0 + $0x98] sm:$0xff]  ;;  %v42_v33 = vld [vmem:[%s460_s0 + $0x90] sm:$0xff]  ;;  %v41_v35 = vld [vmem:[%s460_s0 + $0x88] sm:$0xff] }
   0xc   :  { %250 = vmatprep.subr.mxu0 %v50_v11  ;;  %286 = vmatprep.subr.mxu1 %v298_v3  ;;  %v27_v32 = vld [vmem:[%s460_s0 + $0x18] sm:$0xff]  ;;  %v26_v34 = vld [vmem:[%s460_s0 + $0x10] sm:$0xff]  ;;  %v25_v36 = vld [vmem:[%s460_s0 + $0x8] sm:$0xff] }
   0xd   :  { %251 = vmatpush3.msra.mxu0 %v34_v12  ;;  %287 = vmatpush3.msra.mxu1 %v56_v22  ;;  %v40_v37 = vld [vmem:[%s460_s0 + $0x80] sm:$0xff] }
   0xe   :  { %252 = vmatprep.subr.mxu0 %v49_v14  ;;  %289 = vmatmul.mubr.msk.f32.vlgmr.msra.gmra.mxu1 %vm60_vm1, %v23_v24  ;;  %v24_v38 = vld [vmem:[%s460_s0] sm:$0xff] }
   0xf   :  { %253 = vmatpush3.msra.mxu0 %v33_v16  ;;  %v21_v39 = vld [vmem:[%s461_s1] sm:$0xff] }
  0x10   :  { %254 = vmatprep.subr.mxu0 %v48_v18  ;;  %v212_v54 = vld [vmem:[%s462_s2] sm:$0xff] }
  0x11   :  { %255 = vmatpush3.msra.mxu0 %v32_v20  ;;  %v222_v57 = vld [vmem:[%s463_s3] sm:$0xff] }
  0x12   :  { %256 = vmatprep.subr.mxu0 %v47_v21 }
  0x13   :  { %257 = vmatpush3.msra.mxu0 %v31_v23 }
  0x14   :  { %258 = vmatprep.subr.mxu0 %v46_v25 }
  0x15   :  { %259 = vmatpush3.msra.mxu0 %v30_v26 }
  0x16   :  { %260 = vmatprep.subr.mxu0 %v45_v27 }
  0x17   :  { %261 = vmatpush3.msra.mxu0 %v29_v28 }
  0x18   :  { %262 = vmatprep.subr.mxu0 %v44_v29 }
  0x19   :  { %263 = vmatpush3.msra.mxu0 %v28_v30 }
  0x1a   :  { %264 = vmatprep.subr.mxu0 %v43_v31 }
  0x1b   :  { %265 = vmatpush3.msra.mxu0 %v27_v32 }
  0x1c   :  { %266 = vmatprep.subr.mxu0 %v42_v33 }
  0x1d   :  { %267 = vmatpush3.msra.mxu0 %v26_v34 }
  0x1e   :  { %268 = vmatprep.subr.mxu0 %v41_v35 }
  0x1f   :  { %269 = vmatpush3.msra.mxu0 %v25_v36 }
  0x20   :  { %270 = vmatprep.subr.mxu0 %v40_v37 }
  0x21   :  { %271 = vmatpush3.msra.mxu0 %v24_v38 }
  0x22   :  { %129 = vmatmul.mubr.f32.vlgmr.msra.gmra.mxu0 %v21_v39 }
  0xce   :  { %v200_v40 = vpop.f32.mrf.mxu1 }
  0xd0   :  { %v290_v41 = vpop.f32.mrf.mxu1 }
  0xe2   :  { %v272_v42 = vpop.f32.mrf.mxu0 }
  0xe4   :  { %v273_v43 = vpop.f32.mrf.mxu0 }
  0xe5   :  { %v274_v44 = vadd.f32 %v273_v43, %v272_v42 }
  0xe7   :  { %v201_v45 = vadd.f32 %v274_v44, %v200_v40 }
  0xe9   :  { %204 = vadd.xlane.f32.xlu0 %v201_v45 }
 0x172   :  { %v205_v46 = vpop.xlane.xlu0 %204 }
 0x173   :  { %v206_v47 = vmul.f32 0.0078125, %v205_v46 }
 0x175   :  { %v207_v48 = vsub.f32 %v201_v45, %v206_v47 }
 0x177   :  { %v208_v49 = vmul.f32 %v207_v48, %v207_v48 }
 0x179   :  { %209 = vadd.xlane.f32.xlu0 %v208_v49 }
 0x202   :  { %v210_v51 = vpop.xlane.xlu0 %209 }
 0x203   :  { %v211_v52 = vmul.f32 0.0078125, %v210_v51 }
 0x205   :  { %v213_v53 = vadd.f32 1e-05, %v211_v52 }
 0x207   :  { %296 = vrsqrt.f32 %v213_v53 }
 0x214   :  { %v297_v55 = vpop.eup %296 }
 0x215   :  { %v215_v56 = vmul.f32 %v297_v55, %v212_v54 }
 0x217   :  { %218 = vperm.xlu1 %294, %v215_v56  }
 0x21b   :  { %225 = vperm.xlu1 %294, %v222_v57  }
 0x292   :  { %v219_v58 = vpop.permute.xlu1 %218 }
 0x293   :  { %v221_v59 = vmul.f32 %v219_v58, %v207_v48 }
 0x296   :  { %v226_v61 = vpop.permute.xlu1 %225 }
 0x297   :  { %v228_v62 = vadd.f32 %v226_v61, %v221_v59 }
 0x299   :  { %vm230_vm2 = vcmp.ge.f32.partialorder %v228_v62, 0.0  ;;  %v232_v63 = vmul.f32 %v231_v60, %v228_v62 }
 0x29b   :  { %v233_v0 = vsel %vm230_vm2, %v228_v62, %v232_v63 }
 0x29c   :  { %234 = vst [vmem:[%s465_s5] sm:$0xff] %v233_v0 }

// kernel: unet5_forward.18
= control target key start
LH: loop header
LB: loop body
LE: loop exit
PB: predicated region body
PF: predicated region fallthrough
CT: control target
= control target key end

     0   :  { %vm96_vm0 = vcmask 130048   ;;  %vm241_vm1 = vcmask 1043456   ;;  %s604_s0 = inlined_call_operand.vmem [shape: f32[144,512], index: 0, kind: input, shape index: {}]   ;;  %s605_s1 = inlined_call_operand.vmem [shape: f32[4,144], index: 1, kind: input, shape index: {}]   ;;  %s606_s2 = inlined_call_operand.vmem [shape: f32[4,1], index: 2, kind: input, shape index: {}]   ;;  %s607_s3 = inlined_call_operand.vmem [shape: f32[4,1], index: 3, kind: input, shape index: {}]   ;;  %s608_s4 = inlined_call_operand.<no memory space> [shape: f32[1], index: 4, kind: input, shape index: {}]   ;;  %s609_s5 = inlined_call_operand.vmem [shape: f32[4,512], index: 5, kind: output, shape index: {}]  }
   0x1   :  { %v83_v0 = vld [vmem:[%s604_s0 + $0x1e8] sm:$0xff]  ;;  %v82_v1 = vld [vmem:[%s604_s0 + $0x1e0] sm:$0xff]  ;;  %v85_v3 = vld [vmem:[%s604_s0 + $0x1f8] sm:$0xff] }
   0x2   :  { %v79_v2 = vld [vmem:[%s604_s0 + $0x1c8] sm:$0xff]  ;;  %99 = vmatprep.subr.mxu0 %v83_v0  ;;  %v78_v4 = vld [vmem:[%s604_s0 + $0x1c0] sm:$0xff]  ;;  %v84_v5 = vld [vmem:[%s604_s0 + $0x1f0] sm:$0xff]  ;;  %170 = vmatprep.subr.mxu1 %v85_v3 }
   0x3   :  { %100 = vmatpush1.msra.mxu0 %v82_v1  ;;  %v75_v6 = vld [vmem:[%s604_s0 + $0x1a8] sm:$0xff]  ;;  %v81_v7 = vld [vmem:[%s604_s0 + $0x1d8] sm:$0xff]  ;;  %171 = vmatpush1.msra.mxu1 %v84_v5  ;;  %v74_v8 = vld [vmem:[%s604_s0 + $0x1a0] sm:$0xff] }
   0x4   :  { %101 = vmatprep.subr.mxu0 %v79_v2  ;;  %v80_v9 = vld [vmem:[%s604_s0 + $0x1d0] sm:$0xff]  ;;  %v77_v10 = vld [vmem:[%s604_s0 + $0x1b8] sm:$0xff]  ;;  %172 = vmatprep.subr.mxu1 %v81_v7  ;;  %v71_v11 = vld [vmem:[%s604_s0 + $0x188] sm:$0xff] }
   0x5   :  { %102 = vmatpush1.msra.mxu0 %v78_v4  ;;  %v76_v12 = vld [vmem:[%s604_s0 + $0x1b0] sm:$0xff]  ;;  %173 = vmatpush1.msra.mxu1 %v80_v9  ;;  %v70_v13 = vld [vmem:[%s604_s0 + $0x180] sm:$0xff]  ;;  %v73_v14 = vld [vmem:[%s604_s0 + $0x198] sm:$0xff] }
   0x6   :  { %103 = vmatprep.subr.mxu0 %v75_v6  ;;  %174 = vmatprep.subr.mxu1 %v77_v10  ;;  %v67_v15 = vld [vmem:[%s604_s0 + $0x168] sm:$0xff]  ;;  %v72_v16 = vld [vmem:[%s604_s0 + $0x190] sm:$0xff]  ;;  %v66_v17 = vld [vmem:[%s604_s0 + $0x160] sm:$0xff] }
   0x7   :  { %104 = vmatpush1.msra.mxu0 %v74_v8  ;;  %175 = vmatpush1.msra.mxu1 %v76_v12  ;;  %v69_v18 = vld [vmem:[%s604_s0 + $0x178] sm:$0xff]  ;;  %v63_v19 = vld [vmem:[%s604_s0 + $0x148] sm:$0xff]  ;;  %v68_v20 = vld [vmem:[%s604_s0 + $0x170] sm:$0xff] }
   0x8   :  { %105 = vmatprep.subr.mxu0 %v71_v11  ;;  %176 = vmatprep.subr.mxu1 %v73_v14  ;;  %v62_v21 = vld [vmem:[%s604_s0 + $0x140] sm:$0xff]  ;;  %v65_v22 = vld [vmem:[%s604_s0 + $0x158] sm:$0xff]  ;;  %v59_v23 = vld [vmem:[%s604_s0 + $0x128] sm:$0xff] }
   0x9   :  { %106 = vmatpush1.msra.mxu0 %v70_v13  ;;  %177 = vmatpush1.msra.mxu1 %v72_v16  ;;  %v64_v24 = vld [vmem:[%s604_s0 + $0x150] sm:$0xff]  ;;  %v58_v25 = vld [vmem:[%s604_s0 + $0x120] sm:$0xff]  ;;  %v61_v26 = vld [vmem:[%s604_s0 + $0x138] sm:$0xff] }
   0xa   :  { %107 = vmatprep.subr.mxu0 %v67_v15  ;;  %178 = vmatprep.subr.mxu1 %v69_v18  ;;  %v55_v27 = vld [vmem:[%s604_s0 + $0x108] sm:$0xff]  ;;  %v60_v28 = vld [vmem:[%s604_s0 + $0x130] sm:$0xff]  ;;  %v54_v29 = vld [vmem:[%s604_s0 + $0x100] sm:$0xff] }
   0xb   :  { %108 = vmatpush1.msra.mxu0 %v66_v17  ;;  %179 = vmatpush1.msra.mxu1 %v68_v20  ;;  %v57_v30 = vld [vmem:[%s604_s0 + $0x118] sm:$0xff]  ;;  %v51_v31 = vld [vmem:[%s604_s0 + $0xe8] sm:$0xff]  ;;  %v56_v32 = vld [vmem:[%s604_s0 + $0x110] sm:$0xff] }
   0xc   :  { %109 = vmatprep.subr.mxu0 %v63_v19  ;;  %180 = vmatprep.subr.mxu1 %v65_v22  ;;  %v50_v33 = vld [vmem:[%s604_s0 + $0xe0] sm:$0xff]  ;;  %v53_v34 = vld [vmem:[%s604_s0 + $0xf8] sm:$0xff]  ;;  %v47_v35 = vld [vmem:[%s604_s0 + $0xc8] sm:$0xff] }
   0xd   :  { %110 = vmatpush1.msra.mxu0 %v62_v21  ;;  %181 = vmatpush1.msra.mxu1 %v64_v24  ;;  %v52_v36 = vld [vmem:[%s604_s0 + $0xf0] sm:$0xff]  ;;  %v46_v37 = vld [vmem:[%s604_s0 + $0xc0] sm:$0xff]  ;;  %v49_v38 = vld [vmem:[%s604_s0 + $0xd8] sm:$0xff] }
   0xe   :  { %111 = vmatprep.subr.mxu0 %v59_v23  ;;  %182 = vmatprep.subr.mxu1 %v61_v26  ;;  %v43_v39 = vld [vmem:[%s604_s0 + $0xa8] sm:$0xff]  ;;  %v48_v40 = vld [vmem:[%s604_s0 + $0xd0] sm:$0xff]  ;;  %v42_v41 = vld [vmem:[%s604_s0 + $0xa0] sm:$0xff] }
   0xf   :  { %112 = vmatpush1.msra.mxu0 %v58_v25  ;;  %183 = vmatpush1.msra.mxu1 %v60_v28  ;;  %v45_v42 = vld [vmem:[%s604_s0 + $0xb8] sm:$0xff]  ;;  %v39_v43 = vld [vmem:[%s604_s0 + $0x88] sm:$0xff]  ;;  %v44_v44 = vld [vmem:[%s604_s0 + $0xb0] sm:$0xff] }
  0x10   :  { %113 = vmatprep.subr.mxu0 %v55_v27  ;;  %184 = vmatprep.subr.mxu1 %v57_v30  ;;  %v38_v45 = vld [vmem:[%s604_s0 + $0x80] sm:$0xff]  ;;  %v41_v46 = vld [vmem:[%s604_s0 + $0x98] sm:$0xff]  ;;  %v35_v47 = vld [vmem:[%s604_s0 + $0x68] sm:$0xff] }
  0x11   :  { %114 = vmatpush1.msra.mxu0 %v54_v29  ;;  %185 = vmatpush1.msra.mxu1 %v56_v32  ;;  %v40_v48 = vld [vmem:[%s604_s0 + $0x90] sm:$0xff]  ;;  %v34_v49 = vld [vmem:[%s604_s0 + $0x60] sm:$0xff]  ;;  %v37_v50 = vld [vmem:[%s604_s0 + $0x78] sm:$0xff] }
  0x12   :  { %115 = vmatprep.subr.mxu0 %v51_v31  ;;  %186 = vmatprep.subr.mxu1 %v53_v34  ;;  %v31_v51 = vld [vmem:[%s604_s0 + $0x48] sm:$0xff]  ;;  %v36_v52 = vld [vmem:[%s604_s0 + $0x70] sm:$0xff]  ;;  %v30_v53 = vld [vmem:[%s604_s0 + $0x40] sm:$0xff] }
  0x13   :  { %116 = vmatpush1.msra.mxu0 %v50_v33  ;;  %187 = vmatpush1.msra.mxu1 %v52_v36  ;;  %v33_v54 = vld [vmem:[%s604_s0 + $0x58] sm:$0xff]  ;;  %v27_v55 = vld [vmem:[%s604_s0 + $0x28] sm:$0xff]  ;;  %v32_v56 = vld [vmem:[%s604_s0 + $0x50] sm:$0xff] }
  0x14   :  { %117 = vmatprep.subr.mxu0 %v47_v35  ;;  %188 = vmatprep.subr.mxu1 %v49_v38  ;;  %v26_v57 = vld [vmem:[%s604_s0 + $0x20] sm:$0xff]  ;;  %v29_v58 = vld [vmem:[%s604_s0 + $0x38] sm:$0xff]  ;;  %v23_v59 = vld [vmem:[%s604_s0 + $0x8] sm:$0xff]  ;;  %v329_v38 = vmov 0  }
  0x15   :  { %118 = vmatpush1.msra.mxu0 %v46_v37  ;;  %189 = vmatpush1.msra.mxu1 %v48_v40  ;;  %v28_v60 = vld [vmem:[%s604_s0 + $0x30] sm:$0xff]  ;;  %v21_v61 = vld [vmem:[%s605_s1] sm:$0xff]  ;;  %v25_v63 = vld [vmem:[%s604_s0 + $0x18] sm:$0xff] }
  0x16   :  { %119 = vmatprep.subr.mxu0 %v43_v39  ;;  %190 = vmatprep.subr.mxu1 %v45_v42  ;;  %v22_v62 = vld [vmem:[%s604_s0] sm:$0xff]  ;;  %v91_v0 = vld [vmem:[%s604_s0 + $0x228] sm:$0xff]  ;;  %v24_v1 = vld [vmem:[%s604_s0 + $0x10] sm:$0xff]  ;;  %v95_v4 = vcombine.high %v21_v61, %v21_v61 }
  0x17   :  { %120 = vmatpush1.msra.mxu0 %v42_v41  ;;  %191 = vmatpush1.msra.mxu1 %v44_v44  ;;  %v90_v2 = vld [vmem:[%s604_s0 + $0x220] sm:$0xff]  ;;  %v93_v3 = vld [vmem:[%s604_s0 + $0x238] sm:$0xff]  ;;  %v87_v5 = vld [vmem:[%s604_s0 + $0x208] sm:$0xff] }
  0x18   :  { %121 = vmatprep.subr.mxu0 %v39_v43  ;;  %192 = vmatprep.subr.mxu1 %v41_v46  ;;  %v86_v6 = vld [vmem:[%s604_s0 + $0x200] sm:$0xff]  ;;  %v92_v7 = vld [vmem:[%s604_s0 + $0x230] sm:$0xff]  ;;  %v89_v8 = vld [vmem:[%s604_s0 + $0x218] sm:$0xff] }
  0x19   :  { %122 = vmatpush1.msra.mxu0 %v38_v45  ;;  %193 = vmatpush1.msra.mxu1 %v40_v48  ;;  %v88_v9 = vld [vmem:[%s604_s0 + $0x210] sm:$0xff]  ;;  %v270_v42 = vld [vmem:[%s606_s2] sm:$0xf] }
  0x1a   :  { %123 = vmatprep.subr.mxu0 %v35_v47  ;;  %194 = vmatprep.subr.mxu1 %v37_v50  ;;  %v283_v45 = vld [vmem:[%s607_s3] sm:$0xf] }
  0x1b   :  { %124 = vmatpush1.msra.mxu0 %v34_v49  ;;  %195 = vmatpush1.msra.mxu1 %v36_v52 }
  0x1c   :  { %125 = vmatprep.subr.mxu0 %v31_v51  ;;  %196 = vmatprep.subr.mxu1 %v33_v54  ;;  %v298_v51 = vstv %s608_s4 }
  0x1d   :  { %126 = vmatpush1.msra.mxu0 %v30_v53  ;;  %197 = vmatpush1.msra.mxu1 %v32_v56 }
  0x1e   :  { %127 = vmatprep.subr.mxu0 %v27_v55  ;;  %198 = vmatprep.subr.mxu1 %v29_v58 }
  0x1f   :  { %128 = vmatpush1.msra.mxu0 %v26_v57  ;;  %199 = vmatpush1.msra.mxu1 %v28_v60 }
  0x20   :  { %129 = vmatprep.subr.mxu0 %v23_v59  ;;  %200 = vmatprep.subr.mxu1 %v25_v63 }
  0x21   :  { %130 = vmatpush1.msra.mxu0 %v22_v62  ;;  %201 = vmatpush1.msra.mxu1 %v24_v1 }
  0x22   :  { %159 = vmatprep.subr.mxu0 %v91_v0  ;;  %230 = vmatprep.subr.mxu1 %v93_v3 }
  0x23   :  { %160 = vmatpush2.msra.mxu0 %v90_v2  ;;  %321 = vmatprep.mubr.msk.f32.mxu0 %vm96_vm0, %v95_v4 }
  0x24   :  { %161 = vmatprep.subr.mxu0 %v87_v5  ;;  %231 = vmatpush2.msra.mxu1 %v92_v7 }
  0x25   :  { %162 = vmatpush2.msra.mxu0 %v86_v6  ;;  %232 = vmatprep.subr.mxu1 %v89_v8 }
  0x26   :  { %164 = vmatmul.mubr.f32.vlgmr.msra.gmra.mxu0 %v21_v61  ;;  %233 = vmatpush2.msra.mxu1 %v88_v9 }
  0x27   :  { %322 = vmatprep.mubr.msk.f32.mxu1 %vm96_vm0, %v95_v4  ;;  %324 = vset.pattern.permute.xlu1 %v329_v38 }
  0x28   :  { %235 = vmatmul.mubr.f32.vlgmr.msra.gmra.mxu1 %v21_v61  ;;  %325 = vset.pattern.permute.xlu0 %v329_v38 }
  0xe6   :  { %v165_v10 = vpop.f32.mrf.mxu0 }
  0xe7   :  { %v242_v13 = vsel %vm241_vm1, %v165_v10, 0.0 }
  0xe8   :  { %v167_v11 = vpop.f32.mrf.mxu0  ;;  %v236_v12 = vpop.f32.mrf.mxu1 }
  0xe9   :  { %v243_v14 = vsel %vm241_vm1, %v167_v11, 0.0  ;;  %v245_v15 = vsel %vm241_vm1, %v236_v12, 0.0 }
  0xea   :  { %v244_v16 = vadd.f32 %v243_v14, %v242_v13  ;;  %v238_v17 = vpop.f32.mrf.mxu1 }
  0xeb   :  { %v247_v19 = vsel %vm241_vm1, %v238_v17, 0.0 }
  0xec   :  { %v246_v18 = vadd.f32 %v245_v15, %v244_v16 }
  0xee   :  { %v248_v20 = vadd.f32 %v247_v19, %v246_v18 }
  0xf0   :  { %249 = vadd.xlane.f32.xlu0 %v248_v20 }
 0x179   :  { %v250_v21 = vpop.xlane.xlu0 %249 }
 0x17a   :  { %v251_v22 = vmul.f32 0.001953125, %v250_v21 }
 0x17c   :  { %v252_v23 = vsub.f32 %v165_v10, %v251_v22  ;;  %v253_v24 = vsub.f32 %v167_v11, %v251_v22  ;;  %v254_v25 = vsub.f32 %v236_v12, %v251_v22  ;;  %v255_v26 = vsub.f32 %v238_v17, %v251_v22 }
 0x17e   :  { %v256_v27 = vmul.f32 %v252_v23, %v252_v23  ;;  %v257_v28 = vmul.f32 %v253_v24, %v253_v24  ;;  %v258_v29 = vmul.f32 %v254_v25, %v254_v25  ;;  %v259_v30 = vmul.f32 %v255_v26, %v255_v26 }
 0x180   :  { %v260_v31 = vsel %vm241_vm1, %v256_v27, 0.0  ;;  %v261_v32 = vsel %vm241_vm1, %v257_v28, 0.0  ;;  %v263_v34 = vsel %vm241_vm1, %v258_v29, 0.0  ;;  %v265_v36 = vsel %vm241_vm1, %v259_v30, 0.0 }
 0x181   :  { %v262_v33 = vadd.f32 %v261_v32, %v260_v31 }
 0x183   :  { %v264_v35 = vadd.f32 %v263_v34, %v262_v33 }
 0x185   :  { %v266_v37 = vadd.f32 %v265_v36, %v264_v35 }
 0x187   :  { %267 = vadd.xlane.f32.xlu0 %v266_v37 }
 0x210   :  { %v268_v39 = vpop.xlane.xlu0 %267 }
 0x211   :  { %v269_v40 = vmul.f32 0.001953125, %v268_v39 }
 0x213   :  { %v271_v41 = vadd.f32 1e-05, %v269_v40 }
 0x215   :  { %327 = vrsqrt.f32 %v271_v41 }
 0x222   :  { %v328_v43 = vpop.eup %327 }
 0x223   :  { %v273_v44 = vmul.f32 %v328_v43, %v270_v42 }
 0x225   :  { %276 = vperm.xlu1 %324, %v273_v44  }
 0x229   :  { %286 = vperm.xlu1 %324, %v283_v45  }
 0x2a0   :  { %v277_v46 = vpop.permute.xlu1 %276 }
 0x2a1   :  { %v279_v47 = vmul.f32 %v277_v46, %v252_v23  ;;  %v280_v48 = vmul.f32 %v277_v46, %v253_v24  ;;  %v281_v49 = vmul.f32 %v277_v46, %v254_v25  ;;  %v282_v50 = vmul.f32 %v277_v46, %v255_v26 }
 0x2a4   :  { %v287_v52 = vpop.permute.xlu1 %286 }
 0x2a5   :  { %v289_v53 = vadd.f32 %v287_v52, %v279_v47  ;;  %v290_v54 = vadd.f32 %v287_v52, %v280_v48  ;;  %v291_v55 = vadd.f32 %v287_v52, %v281_v49  ;;  %v292_v56 = vadd.f32 %v287_v52, %v282_v50 }
 0x2a7   :  { %vm294_vm2 = vcmp.ge.f32.partialorder %v289_v53, 0.0  ;;  %vm295_vm3 = vcmp.ge.f32.partialorder %v290_v54, 0.0  ;;  %vm296_vm4 = vcmp.ge.f32.partialorder %v291_v55, 0.0  ;;  %vm297_vm5 = vcmp.ge.f32.partialorder %v292_v56, 0.0 }
 0x2a8   :  { %v299_v57 = vmul.f32 %v298_v51, %v289_v53  ;;  %v300_v58 = vmul.f32 %v298_v51, %v290_v54  ;;  %v301_v59 = vmul.f32 %v298_v51, %v291_v55  ;;  %v302_v60 = vmul.f32 %v298_v51, %v292_v56 }
 0x2aa   :  { %v303_v61 = vsel %vm294_vm2, %v289_v53, %v299_v57  ;;  %v304_v62 = vsel %vm295_vm3, %v290_v54, %v300_v58  ;;  %v305_v63 = vsel %vm296_vm4, %v291_v55, %v301_v59  ;;  %v306_v0 = vsel %vm297_vm5, %v292_v56, %v302_v60 }
 0x2ab   :  { %v311_v1 = vcombine.low %v303_v61, %v304_v62  ;;  %v312_v2 = vcombine.low %v305_v63, %v306_v0 }
 0x2ad   :  { %315 = vst [vmem:[%s609_s5] sm:$0xff] %v311_v1  ;;  %316 = vst [vmem:[%s609_s5 + $0x8] sm:$0xff] %v312_v2 }

// kernel: unet5_forward.19
= control target key start
LH: loop header
LB: loop body
LE: loop exit
PB: predicated region body
PF: predicated region fallthrough
CT: control target
= control target key end

     0   :  { %v1085_v3 = vmov 0.0   ;;  %vm170_vm0 = vcmask 588800   ;;  %vm742_vm1 = vcmask 1040384   ;;  %s1749_s0 = inlined_call_operand.vmem [shape: f32[72,2048], index: 0, kind: input, shape index: {}]   ;;  %s1750_s1 = inlined_call_operand.vmem [shape: f32[1,72], index: 1, kind: input, shape index: {}]   ;;  %s1751_s2 = inlined_call_operand.<no memory space> [shape: f32[1,1], index: 2, kind: input, shape index: {}]   ;;  %s1752_s3 = inlined_call_operand.<no memory space> [shape: f32[1,1], index: 3, kind: input, shape index: {}]   ;;  %s1753_s4 = inlined_call_operand.<no memory space> [shape: f32[1], index: 4, kind: input, shape index: {}]   ;;  %s1754_s5 = inlined_call_operand.vmem [shape: f32[1,2048], index: 5, kind: output, shape index: {}]  }
   0x1   :  { %v155_v0 = vld [vmem:[%s1749_s0 + $0x408] sm:$0xff]  ;;  %v154_v1 = vld [vmem:[%s1749_s0 + $0x400] sm:$0xff]  ;;  %238 = vmatprep.mubr.f32.mxu0 %v1085_v3  ;;  %309 = vmatprep.mubr.f32.mxu1 %v1085_v3  ;;  %v157_v4 = vld [vmem:[%s1749_s0 + $0x418] sm:$0xff] }
   0x2   :  { %v139_v2 = vld [vmem:[%s1749_s0 + $0x388] sm:$0xff]  ;;  %188 = vmatprep.subr.mxu0 %v155_v0  ;;  %v138_v5 = vld [vmem:[%s1749_s0 + $0x380] sm:$0xff]  ;;  %v156_v6 = vld [vmem:[%s1749_s0 + $0x410] sm:$0xff]  ;;  %259 = vmatprep.subr.mxu1 %v157_v4 }
   0x3   :  { %189 = vmatpush1.msra.mxu0 %v154_v1  ;;  %v123_v7 = vld [vmem:[%s1749_s0 + $0x308] sm:$0xff]  ;;  %v141_v8 = vld [vmem:[%s1749_s0 + $0x398] sm:$0xff]  ;;  %260 = vmatpush1.msra.mxu1 %v156_v6  ;;  %v122_v9 = vld [vmem:[%s1749_s0 + $0x300] sm:$0xff] }
   0x4   :  { %190 = vmatprep.subr.mxu0 %v139_v2  ;;  %v140_v10 = vld [vmem:[%s1749_s0 + $0x390] sm:$0xff]  ;;  %v125_v11 = vld [vmem:[%s1749_s0 + $0x318] sm:$0xff]  ;;  %261 = vmatprep.subr.mxu1 %v141_v8  ;;  %v107_v12 = vld [vmem:[%s1749_s0 + $0x288] sm:$0xff] }
   0x5   :  { %191 = vmatpush1.msra.mxu0 %v138_v5  ;;  %v124_v13 = vld [vmem:[%s1749_s0 + $0x310] sm:$0xff]  ;;  %262 = vmatpush1.msra.mxu1 %v140_v10  ;;  %v106_v14 = vld [vmem:[%s1749_s0 + $0x280] sm:$0xff]  ;;  %v109_v15 = vld [vmem:[%s1749_s0 + $0x298] sm:$0xff] }
   0x6   :  { %192 = vmatprep.subr.mxu0 %v123_v7  ;;  %263 = vmatprep.subr.mxu1 %v125_v11  ;;  %v91_v16 = vld [vmem:[%s1749_s0 + $0x208] sm:$0xff]  ;;  %v108_v17 = vld [vmem:[%s1749_s0 + $0x290] sm:$0xff]  ;;  %v90_v18 = vld [vmem:[%s1749_s0 + $0x200] sm:$0xff] }
   0x7   :  { %193 = vmatpush1.msra.mxu0 %v122_v9  ;;  %264 = vmatpush1.msra.mxu1 %v124_v13  ;;  %v93_v19 = vld [vmem:[%s1749_s0 + $0x218] sm:$0xff]  ;;  %v75_v20 = vld [vmem:[%s1749_s0 + $0x188] sm:$0xff]  ;;  %v92_v21 = vld [vmem:[%s1749_s0 + $0x210] sm:$0xff] }
   0x8   :  { %194 = vmatprep.subr.mxu0 %v107_v12  ;;  %265 = vmatprep.subr.mxu1 %v109_v15  ;;  %v74_v22 = vld [vmem:[%s1749_s0 + $0x180] sm:$0xff]  ;;  %v77_v23 = vld [vmem:[%s1749_s0 + $0x198] sm:$0xff]  ;;  %v59_v24 = vld [vmem:[%s1749_s0 + $0x108] sm:$0xff] }
   0x9   :  { %195 = vmatpush1.msra.mxu0 %v106_v14  ;;  %266 = vmatpush1.msra.mxu1 %v108_v17  ;;  %v76_v25 = vld [vmem:[%s1749_s0 + $0x190] sm:$0xff]  ;;  %v58_v26 = vld [vmem:[%s1749_s0 + $0x100] sm:$0xff]  ;;  %v61_v27 = vld [vmem:[%s1749_s0 + $0x118] sm:$0xff] }
   0xa   :  { %196 = vmatprep.subr.mxu0 %v91_v16  ;;  %267 = vmatprep.subr.mxu1 %v93_v19  ;;  %v43_v28 = vld [vmem:[%s1749_s0 + $0x88] sm:$0xff]  ;;  %v60_v29 = vld [vmem:[%s1749_s0 + $0x110] sm:$0xff]  ;;  %v42_v30 = vld [vmem:[%s1749_s0 + $0x80] sm:$0xff] }
   0xb   :  { %197 = vmatpush1.msra.mxu0 %v90_v18  ;;  %268 = vmatpush1.msra.mxu1 %v92_v21  ;;  %v45_v31 = vld [vmem:[%s1749_s0 + $0x98] sm:$0xff]  ;;  %v27_v32 = vld [vmem:[%s1749_s0 + $0x8] sm:$0xff]  ;;  %v44_v33 = vld [vmem:[%s1749_s0 + $0x90] sm:$0xff] }
   0xc   :  { %198 = vmatprep.subr.mxu0 %v75_v20  ;;  %269 = vmatprep.subr.mxu1 %v77_v23  ;;  %v26_v34 = vld [vmem:[%s1749_s0] sm:$0xff]  ;;  %v29_v35 = vld [vmem:[%s1749_s0 + $0x18] sm:$0xff]  ;;  %v159_v37 = vld [vmem:[%s1749_s0 + $0x428] sm:$0xff] }
   0xd   :  { %199 = vmatpush1.msra.mxu0 %v74_v22  ;;  %270 = vmatpush1.msra.mxu1 %v76_v25  ;;  %v1228_v36 = vld [vmem:[%s1750_s1] sm:$0x1]  ;;  %v28_v38 = vld [vmem:[%s1749_s0 + $0x10] sm:$0xff]  ;;  %v143_v40 = vld [vmem:[%s1749_s0 + $0x3a8] sm:$0xff] }
   0xe   :  { %200 = vmatprep.subr.mxu0 %v59_v24  ;;  %271 = vmatprep.subr.mxu1 %v61_v27  ;;  %v158_v39 = vld [vmem:[%s1749_s0 + $0x420] sm:$0xff]  ;;  %v161_v41 = vld [vmem:[%s1749_s0 + $0x438] sm:$0xff]  ;;  %v160_v43 = vld [vmem:[%s1749_s0 + $0x430] sm:$0xff] }
   0xf   :  { %201 = vmatpush1.msra.mxu0 %v58_v26  ;;  %272 = vmatpush1.msra.mxu1 %v60_v29  ;;  %v142_v42 = vld [vmem:[%s1749_s0 + $0x3a0] sm:$0xff]  ;;  %v127_v44 = vld [vmem:[%s1749_s0 + $0x328] sm:$0xff]  ;;  %v145_v45 = vld [vmem:[%s1749_s0 + $0x3b8] sm:$0xff] }
  0x10   :  { %202 = vmatprep.subr.mxu0 %v43_v28  ;;  %273 = vmatprep.subr.mxu1 %v45_v31  ;;  %v126_v46 = vld [vmem:[%s1749_s0 + $0x320] sm:$0xff]  ;;  %v144_v47 = vld [vmem:[%s1749_s0 + $0x3b0] sm:$0xff]  ;;  %v111_v48 = vld [vmem:[%s1749_s0 + $0x2a8] sm:$0xff] }
  0x11   :  { %203 = vmatpush1.msra.mxu0 %v42_v30  ;;  %274 = vmatpush1.msra.mxu1 %v44_v33  ;;  %v129_v49 = vld [vmem:[%s1749_s0 + $0x338] sm:$0xff]  ;;  %v110_v50 = vld [vmem:[%s1749_s0 + $0x2a0] sm:$0xff]  ;;  %v128_v51 = vld [vmem:[%s1749_s0 + $0x330] sm:$0xff] }
  0x12   :  { %204 = vmatprep.subr.mxu0 %v27_v32  ;;  %275 = vmatprep.subr.mxu1 %v29_v35  ;;  %v95_v52 = vld [vmem:[%s1749_s0 + $0x228] sm:$0xff]  ;;  %v113_v53 = vld [vmem:[%s1749_s0 + $0x2b8] sm:$0xff]  ;;  %v94_v54 = vld [vmem:[%s1749_s0 + $0x220] sm:$0xff] }
  0x13   :  { %205 = vmatpush1.msra.mxu0 %v26_v34  ;;  %276 = vmatpush1.msra.mxu1 %v28_v38  ;;  %v112_v55 = vld [vmem:[%s1749_s0 + $0x2b0] sm:$0xff]  ;;  %v79_v56 = vld [vmem:[%s1749_s0 + $0x1a8] sm:$0xff]  ;;  %v97_v57 = vld [vmem:[%s1749_s0 + $0x238] sm:$0xff] }
  0x14   :  { %1070 = vmatmul.mubr.msk.f32.vlgmr.msra.gmra.mxu0 %vm170_vm0, %v1228_v36  ;;  %330 = vmatprep.subr.mxu0 %v159_v37  ;;  %v78_v58 = vld [vmem:[%s1749_s0 + $0x1a0] sm:$0xff]  ;;  %v96_v59 = vld [vmem:[%s1749_s0 + $0x230] sm:$0xff]  ;;  %v63_v60 = vld [vmem:[%s1749_s0 + $0x128] sm:$0xff] }
  0x15   :  { %331 = vmatpush1.msra.mxu0 %v158_v39  ;;  %401 = vmatprep.subr.mxu1 %v161_v41  ;;  %v81_v61 = vld [vmem:[%s1749_s0 + $0x1b8] sm:$0xff]  ;;  %v62_v62 = vld [vmem:[%s1749_s0 + $0x120] sm:$0xff]  ;;  %v80_v63 = vld [vmem:[%s1749_s0 + $0x1b0] sm:$0xff] }
  0x16   :  { %332 = vmatprep.subr.mxu0 %v143_v40  ;;  %1071 = vmatmul.mubr.msk.f32.vlgmr.msra.gmra.mxu1 %vm170_vm0, %v1228_v36  ;;  %v47_v0 = vld [vmem:[%s1749_s0 + $0xa8] sm:$0xff]  ;;  %v65_v1 = vld [vmem:[%s1749_s0 + $0x138] sm:$0xff]  ;;  %v46_v2 = vld [vmem:[%s1749_s0 + $0xa0] sm:$0xff] }
  0x17   :  { %333 = vmatpush1.msra.mxu0 %v142_v42  ;;  %402 = vmatpush1.msra.mxu1 %v160_v43  ;;  %v64_v4 = vld [vmem:[%s1749_s0 + $0x130] sm:$0xff]  ;;  %v31_v5 = vld [vmem:[%s1749_s0 + $0x28] sm:$0xff]  ;;  %v49_v6 = vld [vmem:[%s1749_s0 + $0xb8] sm:$0xff] }
  0x18   :  { %334 = vmatprep.subr.mxu0 %v127_v44  ;;  %403 = vmatprep.subr.mxu1 %v145_v45  ;;  %v30_v7 = vld [vmem:[%s1749_s0 + $0x20] sm:$0xff]  ;;  %v48_v8 = vld [vmem:[%s1749_s0 + $0xb0] sm:$0xff]  ;;  %v33_v9 = vld [vmem:[%s1749_s0 + $0x38] sm:$0xff] }
  0x19   :  { %335 = vmatpush1.msra.mxu0 %v126_v46  ;;  %404 = vmatpush1.msra.mxu1 %v144_v47  ;;  %v163_v10 = vld [vmem:[%s1749_s0 + $0x448] sm:$0xff]  ;;  %v32_v11 = vld [vmem:[%s1749_s0 + $0x30] sm:$0xff]  ;;  %v162_v12 = vld [vmem:[%s1749_s0 + $0x440] sm:$0xff] }
  0x1a   :  { %336 = vmatprep.subr.mxu0 %v111_v48  ;;  %405 = vmatprep.subr.mxu1 %v129_v49  ;;  %v147_v13 = vld [vmem:[%s1749_s0 + $0x3c8] sm:$0xff]  ;;  %v165_v14 = vld [vmem:[%s1749_s0 + $0x458] sm:$0xff]  ;;  %v146_v15 = vld [vmem:[%s1749_s0 + $0x3c0] sm:$0xff] }
  0x1b   :  { %337 = vmatpush1.msra.mxu0 %v110_v50  ;;  %406 = vmatpush1.msra.mxu1 %v128_v51  ;;  %v164_v16 = vld [vmem:[%s1749_s0 + $0x450] sm:$0xff]  ;;  %v131_v17 = vld [vmem:[%s1749_s0 + $0x348] sm:$0xff]  ;;  %v149_v18 = vld [vmem:[%s1749_s0 + $0x3d8] sm:$0xff] }
  0x1c   :  { %338 = vmatprep.subr.mxu0 %v95_v52  ;;  %407 = vmatprep.subr.mxu1 %v113_v53  ;;  %v130_v19 = vld [vmem:[%s1749_s0 + $0x340] sm:$0xff]  ;;  %v148_v20 = vld [vmem:[%s1749_s0 + $0x3d0] sm:$0xff]  ;;  %v115_v21 = vld [vmem:[%s1749_s0 + $0x2c8] sm:$0xff] }
  0x1d   :  { %339 = vmatpush1.msra.mxu0 %v94_v54  ;;  %408 = vmatpush1.msra.mxu1 %v112_v55  ;;  %v133_v22 = vld [vmem:[%s1749_s0 + $0x358] sm:$0xff]  ;;  %v114_v23 = vld [vmem:[%s1749_s0 + $0x2c0] sm:$0xff]  ;;  %v132_v24 = vld [vmem:[%s1749_s0 + $0x350] sm:$0xff] }
  0x1e   :  { %340 = vmatprep.subr.mxu0 %v79_v56  ;;  %409 = vmatprep.subr.mxu1 %v97_v57  ;;  %v99_v25 = vld [vmem:[%s1749_s0 + $0x248] sm:$0xff]  ;;  %v117_v26 = vld [vmem:[%s1749_s0 + $0x2d8] sm:$0xff]  ;;  %v98_v27 = vld [vmem:[%s1749_s0 + $0x240] sm:$0xff] }
  0x1f   :  { %341 = vmatpush1.msra.mxu0 %v78_v58  ;;  %410 = vmatpush1.msra.mxu1 %v96_v59  ;;  %v116_v28 = vld [vmem:[%s1749_s0 + $0x2d0] sm:$0xff]  ;;  %v83_v29 = vld [vmem:[%s1749_s0 + $0x1c8] sm:$0xff]  ;;  %v101_v30 = vld [vmem:[%s1749_s0 + $0x258] sm:$0xff] }
  0x20   :  { %342 = vmatprep.subr.mxu0 %v63_v60  ;;  %411 = vmatprep.subr.mxu1 %v81_v61  ;;  %v82_v31 = vld [vmem:[%s1749_s0 + $0x1c0] sm:$0xff]  ;;  %v100_v32 = vld [vmem:[%s1749_s0 + $0x250] sm:$0xff]  ;;  %v67_v33 = vld [vmem:[%s1749_s0 + $0x148] sm:$0xff] }
  0x21   :  { %343 = vmatpush1.msra.mxu0 %v62_v62  ;;  %412 = vmatpush1.msra.mxu1 %v80_v63  ;;  %v85_v34 = vld [vmem:[%s1749_s0 + $0x1d8] sm:$0xff]  ;;  %v66_v35 = vld [vmem:[%s1749_s0 + $0x140] sm:$0xff]  ;;  %v84_v37 = vld [vmem:[%s1749_s0 + $0x1d0] sm:$0xff] }
  0x22   :  { %344 = vmatprep.subr.mxu0 %v47_v0  ;;  %413 = vmatprep.subr.mxu1 %v65_v1  ;;  %v51_v38 = vld [vmem:[%s1749_s0 + $0xc8] sm:$0xff]  ;;  %v69_v39 = vld [vmem:[%s1749_s0 + $0x158] sm:$0xff]  ;;  %v50_v40 = vld [vmem:[%s1749_s0 + $0xc0] sm:$0xff] }
  0x23   :  { %345 = vmatpush1.msra.mxu0 %v46_v2  ;;  %414 = vmatpush1.msra.mxu1 %v64_v4  ;;  %v68_v41 = vld [vmem:[%s1749_s0 + $0x150] sm:$0xff]  ;;  %v35_v42 = vld [vmem:[%s1749_s0 + $0x48] sm:$0xff]  ;;  %v53_v43 = vld [vmem:[%s1749_s0 + $0xd8] sm:$0xff] }
  0x24   :  { %346 = vmatprep.subr.mxu0 %v31_v5  ;;  %415 = vmatprep.subr.mxu1 %v49_v6  ;;  %v34_v44 = vld [vmem:[%s1749_s0 + $0x40] sm:$0xff]  ;;  %v52_v45 = vld [vmem:[%s1749_s0 + $0xd0] sm:$0xff]  ;;  %v37_v46 = vld [vmem:[%s1749_s0 + $0x58] sm:$0xff] }
  0x25   :  { %347 = vmatpush1.msra.mxu0 %v30_v7  ;;  %380 = vmatprep.mubr.f32.mxu0 %v1085_v3  ;;  %v167_v47 = vld [vmem:[%s1749_s0 + $0x468] sm:$0xff]  ;;  %v36_v48 = vld [vmem:[%s1749_s0 + $0x50] sm:$0xff]  ;;  %v166_v49 = vld [vmem:[%s1749_s0 + $0x460] sm:$0xff] }
  0x26   :  { %416 = vmatpush1.msra.mxu1 %v48_v8  ;;  %1072 = vmatmul.mubr.msk.f32.vlgmr.msra.gmra.mxu0 %vm170_vm0, %v1228_v36  ;;  %v151_v50 = vld [vmem:[%s1749_s0 + $0x3e8] sm:$0xff]  ;;  %v169_v51 = vld [vmem:[%s1749_s0 + $0x478] sm:$0xff]  ;;  %v150_v52 = vld [vmem:[%s1749_s0 + $0x3e0] sm:$0xff] }
  0x27   :  { %417 = vmatprep.subr.mxu1 %v33_v9  ;;  %472 = vmatprep.subr.mxu0 %v163_v10  ;;  %v168_v53 = vld [vmem:[%s1749_s0 + $0x470] sm:$0xff]  ;;  %v135_v54 = vld [vmem:[%s1749_s0 + $0x368] sm:$0xff]  ;;  %v153_v55 = vld [vmem:[%s1749_s0 + $0x3f8] sm:$0xff] }
  0x28   :  { %418 = vmatpush1.msra.mxu1 %v32_v11  ;;  %473 = vmatpush1.msra.mxu0 %v162_v12  ;;  %v134_v56 = vld [vmem:[%s1749_s0 + $0x360] sm:$0xff]  ;;  %v152_v57 = vld [vmem:[%s1749_s0 + $0x3f0] sm:$0xff]  ;;  %v119_v58 = vld [vmem:[%s1749_s0 + $0x2e8] sm:$0xff] }
  0x29   :  { %451 = vmatprep.mubr.f32.mxu1 %v1085_v3  ;;  %474 = vmatprep.subr.mxu0 %v147_v13  ;;  %v137_v59 = vld [vmem:[%s1749_s0 + $0x378] sm:$0xff]  ;;  %v118_v60 = vld [vmem:[%s1749_s0 + $0x2e0] sm:$0xff]  ;;  %v136_v61 = vld [vmem:[%s1749_s0 + $0x370] sm:$0xff] }
  0x2a   :  { %543 = vmatprep.subr.mxu1 %v165_v14  ;;  %1073 = vmatmul.mubr.msk.f32.vlgmr.msra.gmra.mxu1 %vm170_vm0, %v1228_v36  ;;  %v103_v62 = vld [vmem:[%s1749_s0 + $0x268] sm:$0xff]  ;;  %v121_v63 = vld [vmem:[%s1749_s0 + $0x2f8] sm:$0xff]  ;;  %v102_v0 = vld [vmem:[%s1749_s0 + $0x260] sm:$0xff] }
  0x2b   :  { %475 = vmatpush1.msra.mxu0 %v146_v15  ;;  %544 = vmatpush1.msra.mxu1 %v164_v16  ;;  %v120_v1 = vld [vmem:[%s1749_s0 + $0x2f0] sm:$0xff]  ;;  %v87_v2 = vld [vmem:[%s1749_s0 + $0x1e8] sm:$0xff]  ;;  %v105_v4 = vld [vmem:[%s1749_s0 + $0x278] sm:$0xff] }
  0x2c   :  { %476 = vmatprep.subr.mxu0 %v131_v17  ;;  %545 = vmatprep.subr.mxu1 %v149_v18  ;;  %v86_v5 = vld [vmem:[%s1749_s0 + $0x1e0] sm:$0xff]  ;;  %v104_v6 = vld [vmem:[%s1749_s0 + $0x270] sm:$0xff]  ;;  %v71_v7 = vld [vmem:[%s1749_s0 + $0x168] sm:$0xff] }
  0x2d   :  { %477 = vmatpush1.msra.mxu0 %v130_v19  ;;  %546 = vmatpush1.msra.mxu1 %v148_v20  ;;  %v89_v8 = vld [vmem:[%s1749_s0 + $0x1f8] sm:$0xff]  ;;  %v70_v9 = vld [vmem:[%s1749_s0 + $0x160] sm:$0xff]  ;;  %v88_v10 = vld [vmem:[%s1749_s0 + $0x1f0] sm:$0xff] }
  0x2e   :  { %478 = vmatprep.subr.mxu0 %v115_v21  ;;  %547 = vmatprep.subr.mxu1 %v133_v22  ;;  %v55_v11 = vld [vmem:[%s1749_s0 + $0xe8] sm:$0xff]  ;;  %v73_v12 = vld [vmem:[%s1749_s0 + $0x178] sm:$0xff]  ;;  %v54_v13 = vld [vmem:[%s1749_s0 + $0xe0] sm:$0xff] }
  0x2f   :  { %479 = vmatpush1.msra.mxu0 %v114_v23  ;;  %548 = vmatpush1.msra.mxu1 %v132_v24  ;;  %v72_v14 = vld [vmem:[%s1749_s0 + $0x170] sm:$0xff]  ;;  %v39_v15 = vld [vmem:[%s1749_s0 + $0x68] sm:$0xff]  ;;  %v57_v16 = vld [vmem:[%s1749_s0 + $0xf8] sm:$0xff] }
  0x30   :  { %480 = vmatprep.subr.mxu0 %v99_v25  ;;  %549 = vmatprep.subr.mxu1 %v117_v26  ;;  %v38_v17 = vld [vmem:[%s1749_s0 + $0x60] sm:$0xff]  ;;  %v56_v18 = vld [vmem:[%s1749_s0 + $0xf0] sm:$0xff]  ;;  %v41_v19 = vld [vmem:[%s1749_s0 + $0x78] sm:$0xff] }
  0x31   :  { %481 = vmatpush1.msra.mxu0 %v98_v27  ;;  %550 = vmatpush1.msra.mxu1 %v116_v28  ;;  %v40_v20 = vld [vmem:[%s1749_s0 + $0x70] sm:$0xff] }
  0x32   :  { %482 = vmatprep.subr.mxu0 %v83_v29  ;;  %551 = vmatprep.subr.mxu1 %v101_v30 }
  0x33   :  { %483 = vmatpush1.msra.mxu0 %v82_v31  ;;  %552 = vmatpush1.msra.mxu1 %v100_v32 }
  0x34   :  { %484 = vmatprep.subr.mxu0 %v67_v33  ;;  %553 = vmatprep.subr.mxu1 %v85_v34 }
  0x35   :  { %485 = vmatpush1.msra.mxu0 %v66_v35  ;;  %554 = vmatpush1.msra.mxu1 %v84_v37 }
  0x36   :  { %486 = vmatprep.subr.mxu0 %v51_v38  ;;  %555 = vmatprep.subr.mxu1 %v69_v39 }
  0x37   :  { %487 = vmatpush1.msra.mxu0 %v50_v40  ;;  %556 = vmatpush1.msra.mxu1 %v68_v41 }
  0x38   :  { %488 = vmatprep.subr.mxu0 %v35_v42  ;;  %557 = vmatprep.subr.mxu1 %v53_v43 }
  0x39   :  { %489 = vmatpush1.msra.mxu0 %v34_v44  ;;  %522 = vmatprep.mubr.f32.mxu0 %v1085_v3 }
  0x3a   :  { %558 = vmatpush1.msra.mxu1 %v52_v45  ;;  %1074 = vmatmul.mubr.msk.f32.vlgmr.msra.gmra.mxu0 %vm170_vm0, %v1228_v36 }
  0x3b   :  { %559 = vmatprep.subr.mxu1 %v37_v46  ;;  %614 = vmatprep.subr.mxu0 %v167_v47 }
  0x3c   :  { %560 = vmatpush1.msra.mxu1 %v36_v48  ;;  %615 = vmatpush1.msra.mxu0 %v166_v49 }
  0x3d   :  { %593 = vmatprep.mubr.f32.mxu1 %v1085_v3  ;;  %616 = vmatprep.subr.mxu0 %v151_v50 }
  0x3e   :  { %685 = vmatprep.subr.mxu1 %v169_v51  ;;  %1075 = vmatmul.mubr.msk.f32.vlgmr.msra.gmra.mxu1 %vm170_vm0, %v1228_v36 }
  0x3f   :  { %617 = vmatpush1.msra.mxu0 %v150_v52  ;;  %686 = vmatpush1.msra.mxu1 %v168_v53 }
  0x40   :  { %618 = vmatprep.subr.mxu0 %v135_v54  ;;  %687 = vmatprep.subr.mxu1 %v153_v55 }
  0x41   :  { %619 = vmatpush1.msra.mxu0 %v134_v56  ;;  %688 = vmatpush1.msra.mxu1 %v152_v57 }
  0x42   :  { %620 = vmatprep.subr.mxu0 %v119_v58  ;;  %689 = vmatprep.subr.mxu1 %v137_v59 }
  0x43   :  { %621 = vmatpush1.msra.mxu0 %v118_v60  ;;  %690 = vmatpush1.msra.mxu1 %v136_v61 }
  0x44   :  { %622 = vmatprep.subr.mxu0 %v103_v62  ;;  %691 = vmatprep.subr.mxu1 %v121_v63 }
  0x45   :  { %623 = vmatpush1.msra.mxu0 %v102_v0  ;;  %692 = vmatpush1.msra.mxu1 %v120_v1 }
  0x46   :  { %624 = vmatprep.subr.mxu0 %v87_v2  ;;  %693 = vmatprep.subr.mxu1 %v105_v4 }
  0x47   :  { %625 = vmatpush1.msra.mxu0 %v86_v5  ;;  %694 = vmatpush1.msra.mxu1 %v104_v6 }
  0x48   :  { %626 = vmatprep.subr.mxu0 %v71_v7  ;;  %695 = vmatprep.subr.mxu1 %v89_v8 }
  0x49   :  { %627 = vmatpush1.msra.mxu0 %v70_v9  ;;  %696 = vmatpush1.msra.mxu1 %v88_v10 }
  0x4a   :  { %628 = vmatprep.subr.mxu0 %v55_v11  ;;  %697 = vmatprep.subr.mxu1 %v73_v12 }
  0x4b   :  { %629 = vmatpush1.msra.mxu0 %v54_v13  ;;  %698 = vmatpush1.msra.mxu1 %v72_v14 }
  0x4c   :  { %630 = vmatprep.subr.mxu0 %v39_v15  ;;  %699 = vmatprep.subr.mxu1 %v57_v16 }
  0x4d   :  { %631 = vmatpush1.msra.mxu0 %v38_v17  ;;  %664 = vmatprep.mubr.f32.mxu0 %v1085_v3 }
  0x4e   :  { %700 = vmatpush1.msra.mxu1 %v56_v18  ;;  %1076 = vmatmul.mubr.msk.f32.vlgmr.msra.gmra.mxu0 %vm170_vm0, %v1228_v36 }
  0x4f   :  { %701 = vmatprep.subr.mxu1 %v41_v19  ;;  %735 = vmatprep.mubr.f32.mxu1 %v1085_v3 }
  0x50   :  { %702 = vmatpush1.msra.mxu1 %v40_v20 }
  0x51   :  { %1077 = vmatmul.mubr.msk.f32.vlgmr.msra.gmra.mxu1 %vm170_vm0, %v1228_v36 }
  0xd4   :  { %v240_v21 = vpop.f32.mrf.mxu0 }
  0xd5   :  { %v743_v23 = vsel %vm742_vm1, %v240_v21, 0.0 }
  0xd6   :  { %v242_v22 = vpop.f32.mrf.mxu0  ;;  %v311_v25 = vpop.f32.mrf.mxu1 }
  0xd7   :  { %v744_v24 = vsel %vm742_vm1, %v242_v22, 0.0  ;;  %v746_v27 = vsel %vm742_vm1, %v311_v25, 0.0 }
  0xd8   :  { %v745_v26 = vadd.f32 %v744_v24, %v743_v23  ;;  %v313_v28 = vpop.f32.mrf.mxu1 }
  0xd9   :  { %v748_v31 = vsel %vm742_vm1, %v313_v28, 0.0 }
  0xda   :  { %v747_v29 = vadd.f32 %v746_v27, %v745_v26 }
  0xdc   :  { %v749_v32 = vadd.f32 %v748_v31, %v747_v29 }
  0xe6   :  { %v382_v30 = vpop.f32.mrf.mxu0 }
  0xe7   :  { %v750_v3 = vsel %vm742_vm1, %v382_v30, 0.0 }
  0xe8   :  { %v384_v36 = vpop.f32.mrf.mxu0  ;;  %v751_v33 = vadd.f32 %v750_v3, %v749_v32 }
  0xe9   :  { %v752_v34 = vsel %vm742_vm1, %v384_v36, 0.0 }
  0xea   :  { %v453_v35 = vpop.f32.mrf.mxu1  ;;  %v753_v37 = vadd.f32 %v752_v34, %v751_v33 }
  0xeb   :  { %v754_v38 = vsel %vm742_vm1, %v453_v35, 0.0 }
  0xec   :  { %v455_v39 = vpop.f32.mrf.mxu1  ;;  %v755_v40 = vadd.f32 %v754_v38, %v753_v37 }
  0xed   :  { %v756_v42 = vsel %vm742_vm1, %v455_v39, 0.0 }
  0xee   :  { %v757_v44 = vadd.f32 %v756_v42, %v755_v40 }
  0xfa   :  { %v524_v41 = vpop.f32.mrf.mxu0 }
  0xfb   :  { %v758_v43 = vsel %vm742_vm1, %v524_v41, 0.0 }
  0xfc   :  { %v526_v45 = vpop.f32.mrf.mxu0  ;;  %v759_v46 = vadd.f32 %v758_v43, %v757_v44 }
  0xfd   :  { %v760_v47 = vsel %vm742_vm1, %v526_v45, 0.0 }
  0xfe   :  { %v595_v48 = vpop.f32.mrf.mxu1  ;;  %v761_v49 = vadd.f32 %v760_v47, %v759_v46 }
  0xff   :  { %v762_v50 = vsel %vm742_vm1, %v595_v48, 0.0 }
 0x100   :  { %v597_v51 = vpop.f32.mrf.mxu1  ;;  %v763_v52 = vadd.f32 %v762_v50, %v761_v49 }
 0x101   :  { %v764_v53 = vsel %vm742_vm1, %v597_v51, 0.0 }
 0x102   :  { %v765_v54 = vadd.f32 %v764_v53, %v763_v52 }
 0x10e   :  { %v666_v55 = vpop.f32.mrf.mxu0 }
 0x10f   :  { %v766_v56 = vsel %vm742_vm1, %v666_v55, 0.0 }
 0x110   :  { %v767_v57 = vadd.f32 %v766_v56, %v765_v54  ;;  %v668_v58 = vpop.f32.mrf.mxu0 }
 0x111   :  { %v737_v59 = vpop.f32.mrf.mxu1  ;;  %v768_v60 = vsel %vm742_vm1, %v668_v58, 0.0 }
 0x112   :  { %v770_v61 = vsel %vm742_vm1, %v737_v59, 0.0  ;;  %v769_v62 = vadd.f32 %v768_v60, %v767_v57 }
 0x113   :  { %v739_v63 = vpop.f32.mrf.mxu1 }
 0x114   :  { %v771_v0 = vadd.f32 %v770_v61, %v769_v62  ;;  %v772_v1 = vsel %vm742_vm1, %v739_v63, 0.0 }
 0x116   :  { %v773_v2 = vadd.f32 %v772_v1, %v771_v0 }
 0x118   :  { %774 = vadd.xlane.f32.xlu0 %v773_v2 }
 0x1a1   :  { %v775_v4 = vpop.xlane.xlu0 %774 }
 0x1a2   :  { %v776_v5 = vmul.f32 0.00048828125, %v775_v4 }
 0x1a4   :  { %v1595_v6 = vsub.f32 %v240_v21, %v776_v5  ;;  %v1597_v7 = vsub.f32 %v242_v22, %v776_v5  ;;  %v1599_v8 = vsub.f32 %v311_v25, %v776_v5  ;;  %v1601_v9 = vsub.f32 %v313_v28, %v776_v5 }
 0x1a5   :  { %v1607_v12 = vsub.f32 %v382_v30, %v776_v5  ;;  %v1611_v14 = vsub.f32 %v384_v36, %v776_v5  ;;  %v1617_v19 = vsub.f32 %v453_v35, %v776_v5  ;;  %v1622_v23 = vsub.f32 %v455_v39, %v776_v5 }
 0x1a6   :  { %v793_v10 = vmul.f32 %v1595_v6, %v1595_v6  ;;  %v794_v11 = vmul.f32 %v1597_v7, %v1597_v7  ;;  %v795_v13 = vmul.f32 %v1599_v8, %v1599_v8  ;;  %v796_v15 = vmul.f32 %v1601_v9, %v1601_v9 }
 0x1a7   :  { %v797_v20 = vmul.f32 %v1607_v12, %v1607_v12  ;;  %v798_v24 = vmul.f32 %v1611_v14, %v1611_v14  ;;  %v1627_v27 = vsub.f32 %v524_v41, %v776_v5  ;;  %v799_v28 = vmul.f32 %v1617_v19, %v1617_v19 }
 0x1a8   :  { %v809_v16 = vsel %vm742_vm1, %v793_v10, 0.0  ;;  %v810_v17 = vsel %vm742_vm1, %v794_v11, 0.0  ;;  %v812_v21 = vsel %vm742_vm1, %v795_v13, 0.0  ;;  %v814_v25 = vsel %vm742_vm1, %v796_v15, 0.0 }
 0x1a9   :  { %v811_v18 = vadd.f32 %v810_v17, %v809_v16  ;;  %v816_v29 = vsel %vm742_vm1, %v797_v20, 0.0  ;;  %v1632_v31 = vsub.f32 %v526_v45, %v776_v5  ;;  %v800_v3 = vmul.f32 %v1622_v23, %v1622_v23 }
 0x1aa   :  { %v818_v32 = vsel %vm742_vm1, %v798_v24, 0.0  ;;  %v1637_v33 = vsub.f32 %v595_v48, %v776_v5  ;;  %v801_v34 = vmul.f32 %v1627_v27, %v1627_v27  ;;  %v820_v35 = vsel %vm742_vm1, %v799_v28, 0.0 }
 0x1ab   :  { %v813_v22 = vadd.f32 %v812_v21, %v811_v18  ;;  %v1642_v38 = vsub.f32 %v597_v51, %v776_v5  ;;  %v802_v39 = vmul.f32 %v1632_v31, %v1632_v31  ;;  %v822_v40 = vsel %vm742_vm1, %v800_v3, 0.0 }
 0x1ac   :  { %v1647_v42 = vsub.f32 %v666_v55, %v776_v5  ;;  %v803_v43 = vmul.f32 %v1637_v33, %v1637_v33  ;;  %v824_v44 = vsel %vm742_vm1, %v801_v34, 0.0  ;;  %v1652_v46 = vsub.f32 %v668_v58, %v776_v5 }
 0x1ad   :  { %v815_v26 = vadd.f32 %v814_v25, %v813_v22  ;;  %v804_v47 = vmul.f32 %v1642_v38, %v1642_v38  ;;  %v826_v48 = vsel %vm742_vm1, %v802_v39, 0.0  ;;  %v1657_v50 = vsub.f32 %v737_v59, %v776_v5 }
 0x1ae   :  { %v805_v51 = vmul.f32 %v1647_v42, %v1647_v42  ;;  %v828_v52 = vsel %vm742_vm1, %v803_v43, 0.0  ;;  %v792_v54 = vsub.f32 %v739_v63, %v776_v5  ;;  %v806_v55 = vmul.f32 %v1652_v46, %v1652_v46 }
 0x1af   :  { %v817_v30 = vadd.f32 %v816_v29, %v815_v26  ;;  %v830_v56 = vsel %vm742_vm1, %v804_v47, 0.0  ;;  %v807_v58 = vmul.f32 %v1657_v50, %v1657_v50  ;;  %v1086_v5 = vmov 0  }
 0x1b0   :  { %v832_v60 = vsel %vm742_vm1, %v805_v51, 0.0  ;;  %v808_v61 = vmul.f32 %v792_v54, %v792_v54  ;;  %v834_v62 = vsel %vm742_vm1, %v806_v55, 0.0  ;;  %1081 = vset.pattern.permute.xlu1 %v1086_v5  ;;  %v10_v10 = vstv %s1751_s2  ;;  %1082 = vset.pattern.permute.xlu0 %v1086_v5 }
 0x1b1   :  { %v819_v36 = vadd.f32 %v818_v32, %v817_v30  ;;  %v836_v1 = vsel %vm742_vm1, %v807_v58, 0.0  ;;  %11 = vst [vmem:[#allocation2] sm:$0x1] %v10_v10  ;;  %v12_v11 = vstv %s1752_s3  ;;  %v852_v22 = vlaneseq }
 0x1b2   :  { %v838_v63 = vsel %vm742_vm1, %v808_v61, 0.0  ;;  %13 = vst [vmem:[#allocation3] sm:$0x1] %v12_v11  ;;  %v1087_v25 = vmov 1966171168   ;;  %v1683_v34 = vstv %s1753_s4 }
 0x1b3   :  { %v821_v37 = vadd.f32 %v820_v35, %v819_v36  ;;  %v853_v24 = vshrl.u32 %v852_v22, 7  ;;  %v969_v26 = vunpack.c.l.s4 %v1087_v25 }
 0x1b5   :  { %v823_v41 = vadd.f32 %v822_v40, %v821_v37  ;;  %v854_v28 = vsub.s32 0, %v853_v24  ;;  %v970_v29 = vunpack.c.0.s8 %v969_v26 }
 0x1b7   :  { %v825_v45 = vadd.f32 %v824_v44, %v823_v41  ;;  %v1677_v32 = vsub.s32 %v970_v29, %v853_v24 }
 0x1b8   :  { %v843_v17 = vld [vmem:[#allocation2] sm:$0x1] }
 0x1b9   :  { %v827_v49 = vadd.f32 %v826_v48, %v825_v45  ;;  %v872_v21 = vld [vmem:[#allocation3] sm:$0x1] }
 0x1bb   :  { %v829_v53 = vadd.f32 %v828_v52, %v827_v49 }
 0x1bd   :  { %v831_v57 = vadd.f32 %v830_v56, %v829_v53 }
 0x1bf   :  { %v833_v59 = vadd.f32 %v832_v60, %v831_v57 }
 0x1c1   :  { %v835_v0 = vadd.f32 %v834_v62, %v833_v59 }
 0x1c3   :  { %v837_v2 = vadd.f32 %v836_v1, %v835_v0 }
 0x1c5   :  { %v839_v4 = vadd.f32 %v838_v63, %v837_v2 }
 0x1c7   :  { %840 = vadd.xlane.f32.xlu0 %v839_v4 }
 0x250   :  { %v841_v13 = vpop.xlane.xlu0 %840 }
 0x251   :  { %v842_v15 = vmul.f32 0.00048828125, %v841_v13 }
 0x253   :  { %v844_v16 = vadd.f32 1e-05, %v842_v15 }
 0x255   :  { %1083 = vrsqrt.f32 %v844_v16 }
 0x262   :  { %v1084_v18 = vpop.eup %1083 }
 0x263   :  { %v846_v20 = vmul.f32 %v1084_v18, %v843_v17 }
 0x265   :  { %849 = vperm.xlu1 %1081, %v846_v20  }
 0x269   :  { %875 = vperm.xlu1 %1081, %v872_v21  }
 0x2e0   :  { %v850_v30 = vpop.permute.xlu1 %849 }
 0x2e1   :  { %v855_v3 = vrot.slane %v850_v30, %v854_v28 }
 0x2e3   :  { %v856_v36 = vmul.f32 %v855_v3, %v1595_v6  ;;  %v857_v37 = vmul.f32 %v855_v3, %v1597_v7  ;;  %v858_v39 = vmul.f32 %v855_v3, %v1599_v8  ;;  %v859_v40 = vmul.f32 %v855_v3, %v1601_v9 }
 0x2e4   :  { %v876_v35 = vpop.permute.xlu1 %875  ;;  %v860_v41 = vmul.f32 %v855_v3, %v1607_v12  ;;  %v861_v43 = vmul.f32 %v855_v3, %v1611_v14  ;;  %v862_v44 = vmul.f32 %v855_v3, %v1617_v19  ;;  %v863_v6 = vmul.f32 %v855_v3, %v1622_v23 }
 0x2e5   :  { %v864_v45 = vmul.f32 %v855_v3, %v1627_v27  ;;  %v865_v47 = vmul.f32 %v855_v3, %v1632_v31  ;;  %v866_v48 = vmul.f32 %v855_v3, %v1637_v33  ;;  %v867_v7 = vmul.f32 %v855_v3, %v1642_v38 }
 0x2e6   :  { %v881_v49 = vrot.slane %v876_v35, %v854_v28  ;;  %v868_v8 = vmul.f32 %v855_v3, %v1647_v42  ;;  %v869_v9 = vmul.f32 %v855_v3, %v1652_v46  ;;  %v870_v12 = vmul.f32 %v855_v3, %v1657_v50 }
 0x2e7   :  { %v871_v14 = vmul.f32 %v855_v3, %v792_v54 }
 0x2e8   :  { %v882_v51 = vadd.f32 %v881_v49, %v856_v36  ;;  %v883_v19 = vadd.f32 %v881_v49, %v857_v37  ;;  %v884_v52 = vadd.f32 %v881_v49, %v858_v39  ;;  %v885_v23 = vadd.f32 %v881_v49, %v859_v40 }
 0x2e9   :  { %v886_v53 = vadd.f32 %v881_v49, %v860_v41  ;;  %v887_v27 = vadd.f32 %v881_v49, %v861_v43  ;;  %v888_v55 = vadd.f32 %v881_v49, %v862_v44  ;;  %v889_v31 = vadd.f32 %v881_v49, %v863_v6 }
 0x2ea   :  { %v890_v56 = vadd.f32 %v881_v49, %v864_v45  ;;  %v891_v33 = vadd.f32 %v881_v49, %v865_v47  ;;  %v892_v57 = vadd.f32 %v881_v49, %v866_v48  ;;  %v893_v38 = vadd.f32 %v881_v49, %v867_v7 }
 0x2eb   :  { %v894_v58 = vadd.f32 %v881_v49, %v868_v8  ;;  %v895_v60 = vadd.f32 %v881_v49, %v869_v9  ;;  %v896_v42 = vadd.f32 %v881_v49, %v870_v12  ;;  %v897_v59 = vadd.f32 %v881_v49, %v871_v14 }
 0x2ec   :  { %vm899_vm2 = vcmp.ge.f32.partialorder %v882_v51, 0.0  ;;  %vm900_vm3 = vcmp.ge.f32.partialorder %v883_v19, 0.0  ;;  %vm901_vm4 = vcmp.ge.f32.partialorder %v884_v52, 0.0  ;;  %vm902_vm5 = vcmp.ge.f32.partialorder %v885_v23, 0.0 }
 0x2ed   :  { %vm903_vm6 = vcmp.ge.f32.partialorder %v886_v53, 0.0  ;;  %vm904_vm7 = vcmp.ge.f32.partialorder %v887_v27, 0.0  ;;  %vm905_vm8 = vcmp.ge.f32.partialorder %v888_v55, 0.0  ;;  %vm906_vm9 = vcmp.ge.f32.partialorder %v889_v31, 0.0 }
 0x2ee   :  { %vm907_vm10 = vcmp.ge.f32.partialorder %v890_v56, 0.0  ;;  %vm908_vm11 = vcmp.ge.f32.partialorder %v891_v33, 0.0  ;;  %vm909_vm12 = vcmp.ge.f32.partialorder %v892_v57, 0.0  ;;  %vm910_vm13 = vcmp.ge.f32.partialorder %v893_v38, 0.0 }
 0x2ef   :  { %vm911_vm14 = vcmp.ge.f32.partialorder %v894_v58, 0.0  ;;  %vm912_vm15 = vcmp.ge.f32.partialorder %v895_v60, 0.0  ;;  %vm913_vm0 = vcmp.ge.f32.partialorder %v896_v42, 0.0  ;;  %vm914_vm1 = vcmp.ge.f32.partialorder %v897_v59, 0.0 }
 0x2f0   :  { %v916_v46 = vmul.f32 %v1683_v34, %v882_v51  ;;  %v917_v50 = vmul.f32 %v1683_v34, %v883_v19  ;;  %v918_v54 = vmul.f32 %v1683_v34, %v884_v52  ;;  %v919_v61 = vmul.f32 %v1683_v34, %v885_v23 }
 0x2f1   :  { %v920_v62 = vmul.f32 %v1683_v34, %v886_v53  ;;  %v921_v0 = vmul.f32 %v1683_v34, %v887_v27  ;;  %v922_v1 = vmul.f32 %v1683_v34, %v888_v55  ;;  %v923_v2 = vmul.f32 %v1683_v34, %v889_v31 }
 0x2f2   :  { %v924_v63 = vmul.f32 %v1683_v34, %v890_v56  ;;  %v925_v4 = vmul.f32 %v1683_v34, %v891_v33  ;;  %v926_v5 = vmul.f32 %v1683_v34, %v892_v57  ;;  %v927_v10 = vmul.f32 %v1683_v34, %v893_v38 }
 0x2f3   :  { %v928_v11 = vmul.f32 %v1683_v34, %v894_v58  ;;  %v929_v13 = vmul.f32 %v1683_v34, %v895_v60  ;;  %v930_v15 = vmul.f32 %v1683_v34, %v896_v42  ;;  %v931_v16 = vmul.f32 %v1683_v34, %v897_v59 }
 0x2f4   :  { %v932_v17 = vsel %vm899_vm2, %v882_v51, %v916_v46  ;;  %v933_v18 = vsel %vm900_vm3, %v883_v19, %v917_v50  ;;  %v934_v20 = vsel %vm901_vm4, %v884_v52, %v918_v54  ;;  %v935_v21 = vsel %vm902_vm5, %v885_v23, %v919_v61 }
 0x2f5   :  { %v936_v22 = vsel %vm903_vm6, %v886_v53, %v920_v62  ;;  %v937_v24 = vsel %vm904_vm7, %v887_v27, %v921_v0  ;;  %v938_v25 = vsel %vm905_vm8, %v888_v55, %v922_v1  ;;  %v939_v26 = vsel %vm906_vm9, %v889_v31, %v923_v2 }
 0x2f6   :  { %v940_v28 = vsel %vm907_vm10, %v890_v56, %v924_v63  ;;  %v941_v29 = vsel %vm908_vm11, %v891_v33, %v925_v4  ;;  %v942_v30 = vsel %vm909_vm12, %v892_v57, %v926_v5  ;;  %v943_v3 = vsel %vm910_vm13, %v893_v38, %v927_v10 }
 0x2f7   :  { %v944_v36 = vsel %vm911_vm14, %v894_v58, %v928_v11  ;;  %v945_v34 = vsel %vm912_vm15, %v895_v60, %v929_v13  ;;  %v946_v35 = vsel %vm913_vm0, %v896_v42, %v930_v15  ;;  %v947_v37 = vsel %vm914_vm1, %v897_v59, %v931_v16 }
 0x2f8   :  { %v964_v39 = vcombine.low %v932_v17, %v933_v18  ;;  %v965_v40 = vcombine.low %v934_v20, %v935_v21  ;;  %v966_v41 = vcombine.low %v936_v22, %v937_v24  ;;  %v967_v43 = vcombine.low %v938_v25, %v939_v26 }
 0x2f9   :  { %v1013_v44 = vcombine.low %v940_v28, %v941_v29  ;;  %v1014_v6 = vcombine.low %v942_v30, %v943_v3  ;;  %v1015_v45 = vcombine.low %v944_v36, %v945_v34  ;;  %v1016_v47 = vcombine.low %v946_v35, %v947_v37 }
 0x2fa   :  { %v974_v48 = vrot.slane %v964_v39, %v1677_v32  ;;  %v981_v7 = vrot.slane %v965_v40, %v1677_v32  ;;  %v988_v49 = vrot.slane %v966_v41, %v1677_v32  ;;  %v995_v8 = vrot.slane %v967_v43, %v1677_v32 }
 0x2fb   :  { %v1023_v9 = vrot.slane %v1013_v44, %v1677_v32  ;;  %v1030_v12 = vrot.slane %v1014_v6, %v1677_v32  ;;  %v1037_v14 = vrot.slane %v1015_v45, %v1677_v32  ;;  %v1044_v51 = vrot.slane %v1016_v47, %v1677_v32 }
 0x2fc   :  { %v996_v19 = vcombine.low %v974_v48, %v981_v7  ;;  %v997_v52 = vcombine.low %v988_v49, %v995_v8 }
 0x2fd   :  { %v1045_v23 = vcombine.low %v1023_v9, %v1030_v12  ;;  %v1046_v53 = vcombine.low %v1037_v14, %v1044_v51 }
 0x2fe   :  { %v1004_v27 = vrot.slane %v996_v19, %v1677_v32  ;;  %v1011_v55 = vrot.slane %v997_v52, %v1677_v32 }
 0x2ff   :  { %v1053_v31 = vrot.slane %v1045_v23, %v1677_v32  ;;  %v1060_v56 = vrot.slane %v1046_v53, %v1677_v32 }
 0x300   :  { %v1012_v33 = vcombine.low %v1004_v27, %v1011_v55 }
 0x301   :  { %v1061_v57 = vcombine.low %v1053_v31, %v1060_v56 }
 0x302   :  { %1064 = vst [vmem:[%s1754_s5] sm:$0xff] %v1012_v33 }
 0x303   :  { %1065 = vst [vmem:[%s1754_s5 + $0x8] sm:$0xff] %v1061_v57 }

</bundles_post_ra>
